<compile_context>
chip_gen: v7x
topology: tpu7x:2x2x1
jax: 0.10.0
libtpu: 0.0.40
codegen_flags: <defaults>
</compile_context>

<pallas_src>
import functools
import math

import jax
import jax.numpy as jnp
import numpy as np
from jax.experimental import pallas as pl
from jax.experimental.pallas import tpu as pltpu


N_HEADS = 2          # n_heads -> d_k = d_model // N_HEADS (128, lane aligned)
N_LAYERS = 2
N_REL = 3            # etypes: ('tag','give','question'), ('tag','inter_1','tag'),
                     #         ('tag','inter_2','tag')


# ---------------------------------------------------------------------------
# Fused Pallas kernel: all QTLayers + shared output linear in one launch
# ---------------------------------------------------------------------------

def _mi_fused_kernel(hq_ref, ht_ref, wqq_ref, bqq_ref, wt_ref, bt_ref,
                     lng_ref, lnb_ref, bg_ref, b1_ref, b2_ref,
                     heg_ref, he1_ref, he2_ref, ow_ref, ob_ref,
                     oq_ref, ot_ref, *, n_layers, n_heads, d_model):
    dk = d_model // n_heads
    f32, bf16 = jnp.float32, jnp.bfloat16

    hq = hq_ref[...]                       # (Nq, D) question features, f32
    ht = ht_ref[...]                       # (Nt, D) tag features, f32
    nq = hq.shape[0]

    # Additive softmax biases (0 / -1e30) and per-dst-row has-edge multipliers,
    # precomputed on host and reused by every layer / head.
    bias_g, he_g = bg_ref[...], heg_ref[...]     # tag -> question ('give')
    bias_1, he_1 = b1_ref[...], he1_ref[...]     # tag -> tag ('inter_1')
    bias_2, he_2 = b2_ref[...], he2_ref[...]     # tag -> tag ('inter_2')

    ln_g = lng_ref[...]                    # (L, 2, 1, D) small, load once
    ln_b = lnb_ref[...]

    def layernorm(x, g, b):
        mu = jnp.mean(x, axis=-1, keepdims=True)
        xc = x - mu
        var = jnp.mean(xc * xc, axis=-1, keepdims=True)
        return xc * jax.lax.rsqrt(var + 1e-5) * g + b

    def masked_attn(q_b, k_b, v_b, bias, he):
        # q_b: (Nd, D) bf16, k_b/v_b: (Ns, D) bf16 (relation matrices + pri /
        # sqrt_dk already folded in), bias: (Nd, Ns) f32, he: (Nd, 1) f32.
        # Per-head dst-normalized masked softmax + weighted message sum.
        outs = []
        for h in range(n_heads):
            sl = slice(h * dk, (h + 1) * dk)
            s = jax.lax.dot_general(q_b[:, sl], k_b[:, sl],
                                    (((1,), (1,)), ((), ())),
                                    preferred_element_type=f32)
            s = s + bias
            s = s - jnp.max(s, axis=-1, keepdims=True)
            e = jnp.exp(s)
            p = e * pl.reciprocal(jnp.sum(e, axis=-1, keepdims=True),
                                  approx=True)
            outs.append(jnp.dot(p.astype(bf16), v_b[:, sl],
                                preferred_element_type=f32))
        # Rows with no in-edges of this etype reduce to 0 (DGL sum of no msgs).
        return jnp.concatenate(outs, axis=-1) * he

    for l in range(n_layers):
        hq_b = hq.astype(bf16)
        ht_b = ht.astype(bf16)

        # Question q projection and fused tag projection:
        #   wt layout per layer: [q_tag | k_give v_give | k_i1 v_i1 | k_i2 v_i2]
        q_q = (jnp.dot(hq_b, wqq_ref[l], preferred_element_type=f32)
               + bqq_ref[l]).astype(bf16)
        t_all = (jnp.dot(ht_b, wt_ref[l], preferred_element_type=f32)
                 + bt_ref[l]).astype(bf16)
        q_t = t_all[:, 0:d_model]
        k_g = t_all[:, 1 * d_model:2 * d_model]
        v_g = t_all[:, 2 * d_model:3 * d_model]
        k_1 = t_all[:, 3 * d_model:4 * d_model]
        v_1 = t_all[:, 4 * d_model:5 * d_model]
        k_2 = t_all[:, 5 * d_model:6 * d_model]
        v_2 = t_all[:, 6 * d_model:7 * d_model]

        # multi_update_all(cross_reducer='mean'):
        #   'question' receives only 'give'; 'tag' gets mean of inter_1/inter_2
        #   (zero contribution for edge-less nodes of an etype, matching fn.sum).
        t_q = masked_attn(q_q, k_g, v_g, bias_g, he_g)
        t_t = 0.5 * (masked_attn(q_t, k_1, v_1, bias_1, he_1)
                     + masked_attn(q_t, k_2, v_2, bias_2, he_2))

        # residual + per-node-type LayerNorm (use_norm=True default in Mi)
        hq = layernorm(t_q + hq, ln_g[l, 0], ln_b[l, 0])
        ht = layernorm(t_t + ht, ln_g[l, 1], ln_b[l, 1])

    # Shared output linear: one (Nq+Nt, D) x (D, n_out) GEMM, then row-slice.
    h_all = jnp.concatenate([hq, ht], axis=0).astype(bf16)
    out_all = jnp.dot(h_all, ow_ref[...], preferred_element_type=f32) + ob_ref[...]
    oq_ref[...] = out_all[:nq, :]
    ot_ref[...] = out_all[nq:, :]


def mi_forward(params, graph, hq, ht):
    """Mi.forward(G, 'question', 'tag', h) -> (out(h['question']), out(h['tag']))."""
    nq, d_model = hq.shape
    nt = ht.shape[0]
    n_out = params["out_w"].shape[1]

    inputs = [hq, ht,
              params["wq_q"], params["bq_q"],
              params["wt_all"], params["bt_all"],
              params["ln_g"], params["ln_b"],
              graph["bias_give"], graph["bias_inter_1"], graph["bias_inter_2"],
              graph["he_give"], graph["he_inter_1"], graph["he_inter_2"],
              params["out_w"], params["out_b"]]

    kernel = functools.partial(_mi_fused_kernel, n_layers=N_LAYERS,
                               n_heads=N_HEADS, d_model=d_model)
    vspec = pl.BlockSpec(memory_space=pltpu.MemorySpace.VMEM)
    out_q, out_t = pl.pallas_call(
        kernel,
        out_shape=(jax.ShapeDtypeStruct((nq, n_out), jnp.float32),
                   jax.ShapeDtypeStruct((nt, n_out), jnp.float32)),
        in_specs=[vspec] * len(inputs),
        out_specs=(vspec, vspec),
        compiler_params=pltpu.CompilerParams(
            vmem_limit_bytes=16 * 1024 * 1024),
    )(*inputs)
    return out_q, out_t


# ---------------------------------------------------------------------------
# Deterministic parameters (PyTorch-style init) + host-side preparation
# ---------------------------------------------------------------------------

def init_raw_params(key, d_model, n_out):
    dk = d_model // N_HEADS
    keys = iter(jax.random.split(key, 256))

    def uni(shape, bound):
        return jax.random.uniform(next(keys), shape, jnp.float32, -bound, bound)

    lb = 1.0 / math.sqrt(d_model)              # nn.Linear default bound
    xb = math.sqrt(6.0 / (dk + dk))            # xavier_uniform for dk x dk
    layers = []
    for _ in range(N_LAYERS):
        layers.append(dict(
            q_w_question=uni((d_model, d_model), lb),
            q_b_question=uni((d_model,), lb),
            k_w_tag=uni((d_model, d_model), lb), k_b_tag=uni((d_model,), lb),
            q_w_tag=uni((d_model, d_model), lb), q_b_tag=uni((d_model,), lb),
            v_w_tag=uni((d_model, d_model), lb), v_b_tag=uni((d_model,), lb),
            rel_pri=jnp.ones((N_REL, N_HEADS), jnp.float32),
            rel_att=uni((N_REL, N_HEADS, dk, dk), xb),
            rel_msg=uni((N_REL, N_HEADS, dk, dk), xb),
            ln_g=jnp.ones((2, d_model), jnp.float32),   # [question, tag]
            ln_b=jnp.zeros((2, d_model), jnp.float32),
        ))
    return dict(layers=layers,
                out_w=uni((d_model, n_out), lb),
                out_b=uni((n_out,), lb))


def prepare_params(raw, d_model):
    """Fold relation matrices (+ pri/sqrt_dk) into per-etype K/V projections."""
    dk = d_model // N_HEADS
    sqrt_dk = math.sqrt(dk)

    def fold(w, b, rel):
        # w: (D, D), b: (D,), rel: (H, dk, dk) -> folded (D, D), (D,)
        # Equivalent to W @ blockdiag(rel) without materializing zero blocks.
        cols, bcols = [], []
        for h in range(N_HEADS):
            sl = slice(h * dk, (h + 1) * dk)
            cols.append(w[:, sl] @ rel[h])
            bcols.append(b[sl] @ rel[h])
        return jnp.concatenate(cols, axis=1), jnp.concatenate(bcols)

    wq_q, bq_q, wt_all, bt_all, ln_g, ln_b = [], [], [], [], [], []
    for lp in raw["layers"]:
        wq_q.append(lp["q_w_question"])
        bq_q.append(lp["q_b_question"].reshape(1, d_model))
        w_cols = [lp["q_w_tag"]]
        b_cols = [lp["q_b_tag"]]
        for e in range(N_REL):
            scale = (lp["rel_pri"][e] / sqrt_dk)[:, None, None]      # (H,1,1)
            wk, bk = fold(lp["k_w_tag"], lp["k_b_tag"], lp["rel_att"][e] * scale)
            wv, bv = fold(lp["v_w_tag"], lp["v_b_tag"], lp["rel_msg"][e])
            w_cols += [wk, wv]
            b_cols += [bk, bv]
        wt_all.append(jnp.concatenate(w_cols, axis=1))               # (D, 7D)
        bt_all.append(jnp.concatenate(b_cols).reshape(1, -1))        # (1, 7D)
        ln_g.append(lp["ln_g"].reshape(2, 1, d_model))
        ln_b.append(lp["ln_b"].reshape(2, 1, d_model))
    bf16 = jnp.bfloat16
    return dict(
        wq_q=jnp.stack(wq_q).astype(bf16),        # (L, D, D)   bf16
        bq_q=jnp.stack(bq_q),                     # (L, 1, D)   f32
        wt_all=jnp.stack(wt_all).astype(bf16),    # (L, D, 7D)  bf16
        bt_all=jnp.stack(bt_all),                 # (L, 1, 7D)  f32
        ln_g=jnp.stack(ln_g),                     # (L, 2, 1, D)
        ln_b=jnp.stack(ln_b),                     # (L, 2, 1, D)
        out_w=raw["out_w"].astype(bf16),          # (D, n_out)  bf16
        out_b=raw["out_b"].reshape(1, -1),        # (1, n_out)  f32
    )


def build_graph_masks(nq, nt):
    """Dense (dst, src) adjacency for the three canonical etypes, converted to
    additive softmax biases (0 / -1e30) and per-dst-row has-edge multipliers."""
    give = np.zeros((nq, nt), np.float32)      # tag -> question
    for j in range(nq):
        give[j, j % nt] = 1.0
        give[j, (j + 2) % nt] = 1.0
    inter1 = np.zeros((nt, nt), np.float32)    # tag -> tag
    inter2 = np.zeros((nt, nt), np.float32)
    for s in range(nt):
        inter1[s, s] = 1.0
        inter1[(s + 1) % nt, s] = 1.0
        inter2[s, s] = 1.0
        inter2[(s + 2) % nt, s] = 1.0

    def to_bias_he(m):
        bias = np.where(m > 0.0, 0.0, -1e30).astype(np.float32)
        he = (m.sum(-1, keepdims=True) > 0.0).astype(np.float32)
        return jnp.asarray(bias), jnp.asarray(he)

    bg, heg = to_bias_he(give)
    b1, he1 = to_bias_he(inter1)
    b2, he2 = to_bias_he(inter2)
    return {"bias_give": bg, "he_give": heg,
            "bias_inter_1": b1, "he_inter_1": he1,
            "bias_inter_2": b2, "he_inter_2": he2}


if __name__ == "__main__":
    nq, nt = 8, 8                  # question / tag node counts
    d_model, n_out = 256, 128      # n_hid=256, n_heads=2 -> d_k=128 (aligned)

    key = jax.random.PRNGKey(0)
    kq, kt, kp = jax.random.split(key, 3)
    hq = jax.random.normal(kq, (nq, d_model), jnp.float32)
    ht = jax.random.normal(kt, (nt, d_model), jnp.float32)

    raw = init_raw_params(kp, d_model, n_out)
    params = prepare_params(raw, d_model)
    graph = build_graph_masks(nq, nt)

    fwd = jax.jit(mi_forward)
    out_q, out_t = fwd(params, graph, hq, ht)
    jax.block_until_ready((out_q, out_t))

    assert out_q.shape == (nq, n_out), out_q.shape
    assert out_t.shape == (nt, n_out), out_t.shape
    assert bool(jnp.all(jnp.isfinite(out_q))) and bool(jnp.all(jnp.isfinite(out_t)))
    print("KERNEL_OK")
</pallas_src>

<mosaic_0001>
module attributes {stable_mosaic.version = 11 : i64} {
  func.func @_mi_fused_kernel(%arg0: memref<8x256xf32, #tpu.memory_space<vmem>>, %arg1: memref<8x256xf32, #tpu.memory_space<vmem>>, %arg2: memref<2x256x256xbf16, #tpu.memory_space<vmem>>, %arg3: memref<2x1x256xf32, #tpu.memory_space<vmem>>, %arg4: memref<2x256x1792xbf16, #tpu.memory_space<vmem>>, %arg5: memref<2x1x1792xf32, #tpu.memory_space<vmem>>, %arg6: memref<2x2x1x256xf32, #tpu.memory_space<vmem>>, %arg7: memref<2x2x1x256xf32, #tpu.memory_space<vmem>>, %arg8: memref<8x8xf32, #tpu.memory_space<vmem>>, %arg9: memref<8x8xf32, #tpu.memory_space<vmem>>, %arg10: memref<8x8xf32, #tpu.memory_space<vmem>>, %arg11: memref<8x1xf32, #tpu.memory_space<vmem>>, %arg12: memref<8x1xf32, #tpu.memory_space<vmem>>, %arg13: memref<8x1xf32, #tpu.memory_space<vmem>>, %arg14: memref<256x128xbf16, #tpu.memory_space<vmem>>, %arg15: memref<1x128xf32, #tpu.memory_space<vmem>>, %arg16: memref<8x128xf32, #tpu.memory_space<vmem>>, %arg17: memref<8x128xf32, #tpu.memory_space<vmem>>) attributes {dimension_semantics = [], scalar_prefetch = 0 : i64, scratch_operands = 0 : i64, tpu.core_type = #tpu.core_type<tc>} {
    %c0 = arith.constant 0 : index
    %c0_0 = arith.constant 0 : index
    %0 = vector.load %arg0[%c0, %c0_0] : memref<8x256xf32, #tpu.memory_space<vmem>>, vector<8x256xf32>
    %c0_1 = arith.constant 0 : index
    %c0_2 = arith.constant 0 : index
    %1 = vector.load %arg1[%c0_1, %c0_2] : memref<8x256xf32, #tpu.memory_space<vmem>>, vector<8x256xf32>
    %c0_3 = arith.constant 0 : index
    %c0_4 = arith.constant 0 : index
    %2 = vector.load %arg8[%c0_3, %c0_4] : memref<8x8xf32, #tpu.memory_space<vmem>>, vector<8x8xf32>
    %c0_5 = arith.constant 0 : index
    %c0_6 = arith.constant 0 : index
    %3 = vector.load %arg11[%c0_5, %c0_6] : memref<8x1xf32, #tpu.memory_space<vmem>>, vector<8x1xf32>
    %c0_7 = arith.constant 0 : index
    %c0_8 = arith.constant 0 : index
    %4 = vector.load %arg9[%c0_7, %c0_8] : memref<8x8xf32, #tpu.memory_space<vmem>>, vector<8x8xf32>
    %c0_9 = arith.constant 0 : index
    %c0_10 = arith.constant 0 : index
    %5 = vector.load %arg12[%c0_9, %c0_10] : memref<8x1xf32, #tpu.memory_space<vmem>>, vector<8x1xf32>
    %c0_11 = arith.constant 0 : index
    %c0_12 = arith.constant 0 : index
    %6 = vector.load %arg10[%c0_11, %c0_12] : memref<8x8xf32, #tpu.memory_space<vmem>>, vector<8x8xf32>
    %c0_13 = arith.constant 0 : index
    %c0_14 = arith.constant 0 : index
    %7 = vector.load %arg13[%c0_13, %c0_14] : memref<8x1xf32, #tpu.memory_space<vmem>>, vector<8x1xf32>
    %c0_15 = arith.constant 0 : index
    %c0_16 = arith.constant 0 : index
    %c0_17 = arith.constant 0 : index
    %c0_18 = arith.constant 0 : index
    %8 = vector.load %arg6[%c0_15, %c0_16, %c0_17, %c0_18] : memref<2x2x1x256xf32, #tpu.memory_space<vmem>>, vector<2x2x1x256xf32>
    %c0_19 = arith.constant 0 : index
    %c0_20 = arith.constant 0 : index
    %c0_21 = arith.constant 0 : index
    %c0_22 = arith.constant 0 : index
    %9 = vector.load %arg7[%c0_19, %c0_20, %c0_21, %c0_22] : memref<2x2x1x256xf32, #tpu.memory_space<vmem>>, vector<2x2x1x256xf32>
    %10 = arith.truncf %0 : vector<8x256xf32> to vector<8x256xbf16>
    %11 = arith.truncf %1 : vector<8x256xf32> to vector<8x256xbf16>
    %c0_23 = arith.constant 0 : index
    %c0_24 = arith.constant 0 : index
    %c0_25 = arith.constant 0 : index
    %12 = vector.load %arg2[%c0_23, %c0_24, %c0_25] : memref<2x256x256xbf16, #tpu.memory_space<vmem>>, vector<1x256x256xbf16>
    %13 = vector.shape_cast %12 : vector<1x256x256xbf16> to vector<256x256xbf16>
    %cst = arith.constant dense<0.000000e+00> : vector<8x256xf32>
    %14 = tpu.matmul %10, %13, %cst {dimension_numbers = #tpu.dot_dimension_numbers<[1], [0], [0], [1], [0, 0, 1, 1], [], []>} : vector<8x256xbf16>, vector<256x256xbf16>, vector<8x256xf32> -> vector<8x256xf32>
    %c0_26 = arith.constant 0 : index
    %c0_27 = arith.constant 0 : index
    %c0_28 = arith.constant 0 : index
    %15 = vector.load %arg3[%c0_26, %c0_27, %c0_28] : memref<2x1x256xf32, #tpu.memory_space<vmem>>, vector<1x1x256xf32>
    %16 = vector.shape_cast %15 : vector<1x1x256xf32> to vector<1x256xf32>
    %17 = vector.broadcast %16 : vector<1x256xf32> to vector<8x256xf32>
    %18 = arith.addf %14, %17 : vector<8x256xf32>
    %19 = arith.truncf %18 : vector<8x256xf32> to vector<8x256xbf16>
    %c0_29 = arith.constant 0 : index
    %c0_30 = arith.constant 0 : index
    %c0_31 = arith.constant 0 : index
    %20 = vector.load %arg4[%c0_29, %c0_30, %c0_31] : memref<2x256x1792xbf16, #tpu.memory_space<vmem>>, vector<1x256x1792xbf16>
    %21 = vector.shape_cast %20 : vector<1x256x1792xbf16> to vector<256x1792xbf16>
    %cst_32 = arith.constant dense<0.000000e+00> : vector<8x1792xf32>
    %22 = tpu.matmul %11, %21, %cst_32 {dimension_numbers = #tpu.dot_dimension_numbers<[1], [0], [0], [1], [0, 0, 1, 1], [], []>} : vector<8x256xbf16>, vector<256x1792xbf16>, vector<8x1792xf32> -> vector<8x1792xf32>
    %c0_33 = arith.constant 0 : index
    %c0_34 = arith.constant 0 : index
    %c0_35 = arith.constant 0 : index
    %23 = vector.load %arg5[%c0_33, %c0_34, %c0_35] : memref<2x1x1792xf32, #tpu.memory_space<vmem>>, vector<1x1x1792xf32>
    %24 = vector.shape_cast %23 : vector<1x1x1792xf32> to vector<1x1792xf32>
    %25 = vector.broadcast %24 : vector<1x1792xf32> to vector<8x1792xf32>
    %26 = arith.addf %22, %25 : vector<8x1792xf32>
    %27 = arith.truncf %26 : vector<8x1792xf32> to vector<8x1792xbf16>
    %28 = vector.extract_strided_slice %27 {offsets = [0, 0], sizes = [8, 256], strides = [1, 1]} : vector<8x1792xbf16> to vector<8x256xbf16>
    %29 = vector.extract_strided_slice %27 {offsets = [0, 256], sizes = [8, 256], strides = [1, 1]} : vector<8x1792xbf16> to vector<8x256xbf16>
    %30 = vector.extract_strided_slice %27 {offsets = [0, 512], sizes = [8, 256], strides = [1, 1]} : vector<8x1792xbf16> to vector<8x256xbf16>
    %31 = vector.extract_strided_slice %27 {offsets = [0, 768], sizes = [8, 256], strides = [1, 1]} : vector<8x1792xbf16> to vector<8x256xbf16>
    %32 = vector.extract_strided_slice %27 {offsets = [0, 1024], sizes = [8, 256], strides = [1, 1]} : vector<8x1792xbf16> to vector<8x256xbf16>
    %33 = vector.extract_strided_slice %27 {offsets = [0, 1280], sizes = [8, 256], strides = [1, 1]} : vector<8x1792xbf16> to vector<8x256xbf16>
    %34 = vector.extract_strided_slice %27 {offsets = [0, 1536], sizes = [8, 256], strides = [1, 1]} : vector<8x1792xbf16> to vector<8x256xbf16>
    %35 = vector.extract_strided_slice %19 {offsets = [0, 0], sizes = [8, 128], strides = [1, 1]} : vector<8x256xbf16> to vector<8x128xbf16>
    %36 = vector.extract_strided_slice %29 {offsets = [0, 0], sizes = [8, 128], strides = [1, 1]} : vector<8x256xbf16> to vector<8x128xbf16>
    %cst_36 = arith.constant dense<0.000000e+00> : vector<8x8xf32>
    %37 = tpu.matmul %35, %36, %cst_36 {dimension_numbers = #tpu.dot_dimension_numbers<[1], [1], [0], [0], [0, 0, 1, 0], [], []>} : vector<8x128xbf16>, vector<8x128xbf16>, vector<8x8xf32> -> vector<8x8xf32>
    %38 = arith.addf %37, %2 : vector<8x8xf32>
    %cst_37 = arith.constant dense<0xFF800000> : vector<8xf32>
    %39 = vector.multi_reduction <maximumf>, %38, %cst_37 [1] : vector<8x8xf32> to vector<8xf32>
    %40 = vector.shape_cast %39 : vector<8xf32> to vector<8x1xf32>
    %41 = vector.broadcast %40 : vector<8x1xf32> to vector<8x8xf32>
    %42 = arith.subf %38, %41 : vector<8x8xf32>
    %43 = math.exp %42 : vector<8x8xf32>
    %cst_38 = arith.constant dense<0.000000e+00> : vector<8xf32>
    %44 = vector.multi_reduction <add>, %43, %cst_38 [1] : vector<8x8xf32> to vector<8xf32>
    %45 = vector.shape_cast %44 : vector<8xf32> to vector<8x1xf32>
    %46 = tpu.reciprocal %45 {approx = true} : vector<8x1xf32> -> vector<8x1xf32>
    %47 = vector.broadcast %46 : vector<8x1xf32> to vector<8x8xf32>
    %48 = arith.mulf %43, %47 : vector<8x8xf32>
    %49 = arith.truncf %48 : vector<8x8xf32> to vector<8x8xbf16>
    %50 = vector.extract_strided_slice %30 {offsets = [0, 0], sizes = [8, 128], strides = [1, 1]} : vector<8x256xbf16> to vector<8x128xbf16>
    %cst_39 = arith.constant dense<0.000000e+00> : vector<8x128xf32>
    %51 = tpu.matmul %49, %50, %cst_39 {dimension_numbers = #tpu.dot_dimension_numbers<[1], [0], [0], [1], [0, 0, 1, 1], [], []>} : vector<8x8xbf16>, vector<8x128xbf16>, vector<8x128xf32> -> vector<8x128xf32>
    %52 = vector.extract_strided_slice %19 {offsets = [0, 128], sizes = [8, 128], strides = [1, 1]} : vector<8x256xbf16> to vector<8x128xbf16>
    %53 = vector.extract_strided_slice %29 {offsets = [0, 128], sizes = [8, 128], strides = [1, 1]} : vector<8x256xbf16> to vector<8x128xbf16>
    %cst_40 = arith.constant dense<0.000000e+00> : vector<8x8xf32>
    %54 = tpu.matmul %52, %53, %cst_40 {dimension_numbers = #tpu.dot_dimension_numbers<[1], [1], [0], [0], [0, 0, 1, 0], [], []>} : vector<8x128xbf16>, vector<8x128xbf16>, vector<8x8xf32> -> vector<8x8xf32>
    %55 = arith.addf %54, %2 : vector<8x8xf32>
    %cst_41 = arith.constant dense<0xFF800000> : vector<8xf32>
    %56 = vector.multi_reduction <maximumf>, %55, %cst_41 [1] : vector<8x8xf32> to vector<8xf32>
    %57 = vector.shape_cast %56 : vector<8xf32> to vector<8x1xf32>
    %58 = vector.broadcast %57 : vector<8x1xf32> to vector<8x8xf32>
    %59 = arith.subf %55, %58 : vector<8x8xf32>
    %60 = math.exp %59 : vector<8x8xf32>
    %cst_42 = arith.constant dense<0.000000e+00> : vector<8xf32>
    %61 = vector.multi_reduction <add>, %60, %cst_42 [1] : vector<8x8xf32> to vector<8xf32>
    %62 = vector.shape_cast %61 : vector<8xf32> to vector<8x1xf32>
    %63 = tpu.reciprocal %62 {approx = true} : vector<8x1xf32> -> vector<8x1xf32>
    %64 = vector.broadcast %63 : vector<8x1xf32> to vector<8x8xf32>
    %65 = arith.mulf %60, %64 : vector<8x8xf32>
    %66 = arith.truncf %65 : vector<8x8xf32> to vector<8x8xbf16>
    %67 = vector.extract_strided_slice %30 {offsets = [0, 128], sizes = [8, 128], strides = [1, 1]} : vector<8x256xbf16> to vector<8x128xbf16>
    %cst_43 = arith.constant dense<0.000000e+00> : vector<8x128xf32>
    %68 = tpu.matmul %66, %67, %cst_43 {dimension_numbers = #tpu.dot_dimension_numbers<[1], [0], [0], [1], [0, 0, 1, 1], [], []>} : vector<8x8xbf16>, vector<8x128xbf16>, vector<8x128xf32> -> vector<8x128xf32>
    %69 = tpu.concatenate %51, %68 in 1 : vector<8x128xf32>, vector<8x128xf32> -> vector<8x256xf32>
    %70 = vector.broadcast %3 : vector<8x1xf32> to vector<8x256xf32>
    %71 = arith.mulf %69, %70 : vector<8x256xf32>
    %72 = vector.extract_strided_slice %28 {offsets = [0, 0], sizes = [8, 128], strides = [1, 1]} : vector<8x256xbf16> to vector<8x128xbf16>
    %73 = vector.extract_strided_slice %31 {offsets = [0, 0], sizes = [8, 128], strides = [1, 1]} : vector<8x256xbf16> to vector<8x128xbf16>
    %cst_44 = arith.constant dense<0.000000e+00> : vector<8x8xf32>
    %74 = tpu.matmul %72, %73, %cst_44 {dimension_numbers = #tpu.dot_dimension_numbers<[1], [1], [0], [0], [0, 0, 1, 0], [], []>} : vector<8x128xbf16>, vector<8x128xbf16>, vector<8x8xf32> -> vector<8x8xf32>
    %75 = arith.addf %74, %4 : vector<8x8xf32>
    %cst_45 = arith.constant dense<0xFF800000> : vector<8xf32>
    %76 = vector.multi_reduction <maximumf>, %75, %cst_45 [1] : vector<8x8xf32> to vector<8xf32>
    %77 = vector.shape_cast %76 : vector<8xf32> to vector<8x1xf32>
    %78 = vector.broadcast %77 : vector<8x1xf32> to vector<8x8xf32>
    %79 = arith.subf %75, %78 : vector<8x8xf32>
    %80 = math.exp %79 : vector<8x8xf32>
    %cst_46 = arith.constant dense<0.000000e+00> : vector<8xf32>
    %81 = vector.multi_reduction <add>, %80, %cst_46 [1] : vector<8x8xf32> to vector<8xf32>
    %82 = vector.shape_cast %81 : vector<8xf32> to vector<8x1xf32>
    %83 = tpu.reciprocal %82 {approx = true} : vector<8x1xf32> -> vector<8x1xf32>
    %84 = vector.broadcast %83 : vector<8x1xf32> to vector<8x8xf32>
    %85 = arith.mulf %80, %84 : vector<8x8xf32>
    %86 = arith.truncf %85 : vector<8x8xf32> to vector<8x8xbf16>
    %87 = vector.extract_strided_slice %32 {offsets = [0, 0], sizes = [8, 128], strides = [1, 1]} : vector<8x256xbf16> to vector<8x128xbf16>
    %cst_47 = arith.constant dense<0.000000e+00> : vector<8x128xf32>
    %88 = tpu.matmul %86, %87, %cst_47 {dimension_numbers = #tpu.dot_dimension_numbers<[1], [0], [0], [1], [0, 0, 1, 1], [], []>} : vector<8x8xbf16>, vector<8x128xbf16>, vector<8x128xf32> -> vector<8x128xf32>
    %89 = vector.extract_strided_slice %28 {offsets = [0, 128], sizes = [8, 128], strides = [1, 1]} : vector<8x256xbf16> to vector<8x128xbf16>
    %90 = vector.extract_strided_slice %31 {offsets = [0, 128], sizes = [8, 128], strides = [1, 1]} : vector<8x256xbf16> to vector<8x128xbf16>
    %cst_48 = arith.constant dense<0.000000e+00> : vector<8x8xf32>
    %91 = tpu.matmul %89, %90, %cst_48 {dimension_numbers = #tpu.dot_dimension_numbers<[1], [1], [0], [0], [0, 0, 1, 0], [], []>} : vector<8x128xbf16>, vector<8x128xbf16>, vector<8x8xf32> -> vector<8x8xf32>
    %92 = arith.addf %91, %4 : vector<8x8xf32>
    %cst_49 = arith.constant dense<0xFF800000> : vector<8xf32>
    %93 = vector.multi_reduction <maximumf>, %92, %cst_49 [1] : vector<8x8xf32> to vector<8xf32>
    %94 = vector.shape_cast %93 : vector<8xf32> to vector<8x1xf32>
    %95 = vector.broadcast %94 : vector<8x1xf32> to vector<8x8xf32>
    %96 = arith.subf %92, %95 : vector<8x8xf32>
    %97 = math.exp %96 : vector<8x8xf32>
    %cst_50 = arith.constant dense<0.000000e+00> : vector<8xf32>
    %98 = vector.multi_reduction <add>, %97, %cst_50 [1] : vector<8x8xf32> to vector<8xf32>
    %99 = vector.shape_cast %98 : vector<8xf32> to vector<8x1xf32>
    %100 = tpu.reciprocal %99 {approx = true} : vector<8x1xf32> -> vector<8x1xf32>
    %101 = vector.broadcast %100 : vector<8x1xf32> to vector<8x8xf32>
    %102 = arith.mulf %97, %101 : vector<8x8xf32>
    %103 = arith.truncf %102 : vector<8x8xf32> to vector<8x8xbf16>
    %104 = vector.extract_strided_slice %32 {offsets = [0, 128], sizes = [8, 128], strides = [1, 1]} : vector<8x256xbf16> to vector<8x128xbf16>
    %cst_51 = arith.constant dense<0.000000e+00> : vector<8x128xf32>
    %105 = tpu.matmul %103, %104, %cst_51 {dimension_numbers = #tpu.dot_dimension_numbers<[1], [0], [0], [1], [0, 0, 1, 1], [], []>} : vector<8x8xbf16>, vector<8x128xbf16>, vector<8x128xf32> -> vector<8x128xf32>
    %106 = tpu.concatenate %88, %105 in 1 : vector<8x128xf32>, vector<8x128xf32> -> vector<8x256xf32>
    %107 = vector.broadcast %5 : vector<8x1xf32> to vector<8x256xf32>
    %108 = arith.mulf %106, %107 : vector<8x256xf32>
    %109 = vector.extract_strided_slice %28 {offsets = [0, 0], sizes = [8, 128], strides = [1, 1]} : vector<8x256xbf16> to vector<8x128xbf16>
    %110 = vector.extract_strided_slice %33 {offsets = [0, 0], sizes = [8, 128], strides = [1, 1]} : vector<8x256xbf16> to vector<8x128xbf16>
    %cst_52 = arith.constant dense<0.000000e+00> : vector<8x8xf32>
    %111 = tpu.matmul %109, %110, %cst_52 {dimension_numbers = #tpu.dot_dimension_numbers<[1], [1], [0], [0], [0, 0, 1, 0], [], []>} : vector<8x128xbf16>, vector<8x128xbf16>, vector<8x8xf32> -> vector<8x8xf32>
    %112 = arith.addf %111, %6 : vector<8x8xf32>
    %cst_53 = arith.constant dense<0xFF800000> : vector<8xf32>
    %113 = vector.multi_reduction <maximumf>, %112, %cst_53 [1] : vector<8x8xf32> to vector<8xf32>
    %114 = vector.shape_cast %113 : vector<8xf32> to vector<8x1xf32>
    %115 = vector.broadcast %114 : vector<8x1xf32> to vector<8x8xf32>
    %116 = arith.subf %112, %115 : vector<8x8xf32>
    %117 = math.exp %116 : vector<8x8xf32>
    %cst_54 = arith.constant dense<0.000000e+00> : vector<8xf32>
    %118 = vector.multi_reduction <add>, %117, %cst_54 [1] : vector<8x8xf32> to vector<8xf32>
    %119 = vector.shape_cast %118 : vector<8xf32> to vector<8x1xf32>
    %120 = tpu.reciprocal %119 {approx = true} : vector<8x1xf32> -> vector<8x1xf32>
    %121 = vector.broadcast %120 : vector<8x1xf32> to vector<8x8xf32>
    %122 = arith.mulf %117, %121 : vector<8x8xf32>
    %123 = arith.truncf %122 : vector<8x8xf32> to vector<8x8xbf16>
    %124 = vector.extract_strided_slice %34 {offsets = [0, 0], sizes = [8, 128], strides = [1, 1]} : vector<8x256xbf16> to vector<8x128xbf16>
    %cst_55 = arith.constant dense<0.000000e+00> : vector<8x128xf32>
    %125 = tpu.matmul %123, %124, %cst_55 {dimension_numbers = #tpu.dot_dimension_numbers<[1], [0], [0], [1], [0, 0, 1, 1], [], []>} : vector<8x8xbf16>, vector<8x128xbf16>, vector<8x128xf32> -> vector<8x128xf32>
    %126 = vector.extract_strided_slice %28 {offsets = [0, 128], sizes = [8, 128], strides = [1, 1]} : vector<8x256xbf16> to vector<8x128xbf16>
    %127 = vector.extract_strided_slice %33 {offsets = [0, 128], sizes = [8, 128], strides = [1, 1]} : vector<8x256xbf16> to vector<8x128xbf16>
    %cst_56 = arith.constant dense<0.000000e+00> : vector<8x8xf32>
    %128 = tpu.matmul %126, %127, %cst_56 {dimension_numbers = #tpu.dot_dimension_numbers<[1], [1], [0], [0], [0, 0, 1, 0], [], []>} : vector<8x128xbf16>, vector<8x128xbf16>, vector<8x8xf32> -> vector<8x8xf32>
    %129 = arith.addf %128, %6 : vector<8x8xf32>
    %cst_57 = arith.constant dense<0xFF800000> : vector<8xf32>
    %130 = vector.multi_reduction <maximumf>, %129, %cst_57 [1] : vector<8x8xf32> to vector<8xf32>
    %131 = vector.shape_cast %130 : vector<8xf32> to vector<8x1xf32>
    %132 = vector.broadcast %131 : vector<8x1xf32> to vector<8x8xf32>
    %133 = arith.subf %129, %132 : vector<8x8xf32>
    %134 = math.exp %133 : vector<8x8xf32>
    %cst_58 = arith.constant dense<0.000000e+00> : vector<8xf32>
    %135 = vector.multi_reduction <add>, %134, %cst_58 [1] : vector<8x8xf32> to vector<8xf32>
    %136 = vector.shape_cast %135 : vector<8xf32> to vector<8x1xf32>
    %137 = tpu.reciprocal %136 {approx = true} : vector<8x1xf32> -> vector<8x1xf32>
    %138 = vector.broadcast %137 : vector<8x1xf32> to vector<8x8xf32>
    %139 = arith.mulf %134, %138 : vector<8x8xf32>
    %140 = arith.truncf %139 : vector<8x8xf32> to vector<8x8xbf16>
    %141 = vector.extract_strided_slice %34 {offsets = [0, 128], sizes = [8, 128], strides = [1, 1]} : vector<8x256xbf16> to vector<8x128xbf16>
    %cst_59 = arith.constant dense<0.000000e+00> : vector<8x128xf32>
    %142 = tpu.matmul %140, %141, %cst_59 {dimension_numbers = #tpu.dot_dimension_numbers<[1], [0], [0], [1], [0, 0, 1, 1], [], []>} : vector<8x8xbf16>, vector<8x128xbf16>, vector<8x128xf32> -> vector<8x128xf32>
    %143 = tpu.concatenate %125, %142 in 1 : vector<8x128xf32>, vector<8x128xf32> -> vector<8x256xf32>
    %144 = vector.broadcast %7 : vector<8x1xf32> to vector<8x256xf32>
    %145 = arith.mulf %143, %144 : vector<8x256xf32>
    %146 = arith.addf %108, %145 : vector<8x256xf32>
    %cst_60 = arith.constant 5.000000e-01 : f32
    %147 = vector.broadcast %cst_60 : f32 to vector<8x256xf32>
    %148 = arith.mulf %147, %146 : vector<8x256xf32>
    %149 = arith.addf %71, %0 : vector<8x256xf32>
    %150 = vector.extract_strided_slice %8 {offsets = [0, 0, 0, 0], sizes = [1, 1, 1, 256], strides = [1, 1, 1, 1]} : vector<2x2x1x256xf32> to vector<1x1x1x256xf32>
    %151 = vector.shape_cast %150 : vector<1x1x1x256xf32> to vector<1x256xf32>
    %152 = vector.extract_strided_slice %9 {offsets = [0, 0, 0, 0], sizes = [1, 1, 1, 256], strides = [1, 1, 1, 1]} : vector<2x2x1x256xf32> to vector<1x1x1x256xf32>
    %153 = vector.shape_cast %152 : vector<1x1x1x256xf32> to vector<1x256xf32>
    %cst_61 = arith.constant dense<0.000000e+00> : vector<8xf32>
    %154 = vector.multi_reduction <add>, %149, %cst_61 [1] : vector<8x256xf32> to vector<8xf32>
    %155 = vector.shape_cast %154 : vector<8xf32> to vector<8x1xf32>
    %cst_62 = arith.constant 2.560000e+02 : f32
    %156 = vector.broadcast %cst_62 : f32 to vector<8x1xf32>
    %157 = arith.divf %155, %156 : vector<8x1xf32>
    %158 = vector.broadcast %157 : vector<8x1xf32> to vector<8x256xf32>
    %159 = arith.subf %149, %158 : vector<8x256xf32>
    %160 = arith.mulf %159, %159 : vector<8x256xf32>
    %cst_63 = arith.constant dense<0.000000e+00> : vector<8xf32>
    %161 = vector.multi_reduction <add>, %160, %cst_63 [1] : vector<8x256xf32> to vector<8xf32>
    %162 = vector.shape_cast %161 : vector<8xf32> to vector<8x1xf32>
    %cst_64 = arith.constant 2.560000e+02 : f32
    %163 = vector.broadcast %cst_64 : f32 to vector<8x1xf32>
    %164 = arith.divf %162, %163 : vector<8x1xf32>
    %cst_65 = arith.constant 9.99999974E-6 : f32
    %165 = vector.broadcast %cst_65 : f32 to vector<8x1xf32>
    %166 = arith.addf %164, %165 : vector<8x1xf32>
    %167 = math.rsqrt %166 : vector<8x1xf32>
    %168 = vector.broadcast %167 : vector<8x1xf32> to vector<8x256xf32>
    %169 = arith.mulf %159, %168 : vector<8x256xf32>
    %170 = vector.broadcast %151 : vector<1x256xf32> to vector<8x256xf32>
    %171 = arith.mulf %169, %170 : vector<8x256xf32>
    %172 = vector.broadcast %153 : vector<1x256xf32> to vector<8x256xf32>
    %173 = arith.addf %171, %172 : vector<8x256xf32>
    %174 = arith.addf %148, %1 : vector<8x256xf32>
    %175 = vector.extract_strided_slice %8 {offsets = [0, 1, 0, 0], sizes = [1, 1, 1, 256], strides = [1, 1, 1, 1]} : vector<2x2x1x256xf32> to vector<1x1x1x256xf32>
    %176 = vector.shape_cast %175 : vector<1x1x1x256xf32> to vector<1x256xf32>
    %177 = vector.extract_strided_slice %9 {offsets = [0, 1, 0, 0], sizes = [1, 1, 1, 256], strides = [1, 1, 1, 1]} : vector<2x2x1x256xf32> to vector<1x1x1x256xf32>
    %178 = vector.shape_cast %177 : vector<1x1x1x256xf32> to vector<1x256xf32>
    %cst_66 = arith.constant dense<0.000000e+00> : vector<8xf32>
    %179 = vector.multi_reduction <add>, %174, %cst_66 [1] : vector<8x256xf32> to vector<8xf32>
    %180 = vector.shape_cast %179 : vector<8xf32> to vector<8x1xf32>
    %cst_67 = arith.constant 2.560000e+02 : f32
    %181 = vector.broadcast %cst_67 : f32 to vector<8x1xf32>
    %182 = arith.divf %180, %181 : vector<8x1xf32>
    %183 = vector.broadcast %182 : vector<8x1xf32> to vector<8x256xf32>
    %184 = arith.subf %174, %183 : vector<8x256xf32>
    %185 = arith.mulf %184, %184 : vector<8x256xf32>
    %cst_68 = arith.constant dense<0.000000e+00> : vector<8xf32>
    %186 = vector.multi_reduction <add>, %185, %cst_68 [1] : vector<8x256xf32> to vector<8xf32>
    %187 = vector.shape_cast %186 : vector<8xf32> to vector<8x1xf32>
    %cst_69 = arith.constant 2.560000e+02 : f32
    %188 = vector.broadcast %cst_69 : f32 to vector<8x1xf32>
    %189 = arith.divf %187, %188 : vector<8x1xf32>
    %cst_70 = arith.constant 9.99999974E-6 : f32
    %190 = vector.broadcast %cst_70 : f32 to vector<8x1xf32>
    %191 = arith.addf %189, %190 : vector<8x1xf32>
    %192 = math.rsqrt %191 : vector<8x1xf32>
    %193 = vector.broadcast %192 : vector<8x1xf32> to vector<8x256xf32>
    %194 = arith.mulf %184, %193 : vector<8x256xf32>
    %195 = vector.broadcast %176 : vector<1x256xf32> to vector<8x256xf32>
    %196 = arith.mulf %194, %195 : vector<8x256xf32>
    %197 = vector.broadcast %178 : vector<1x256xf32> to vector<8x256xf32>
    %198 = arith.addf %196, %197 : vector<8x256xf32>
    %199 = arith.truncf %173 : vector<8x256xf32> to vector<8x256xbf16>
    %200 = arith.truncf %198 : vector<8x256xf32> to vector<8x256xbf16>
    %c1 = arith.constant 1 : index
    %c0_71 = arith.constant 0 : index
    %c0_72 = arith.constant 0 : index
    %201 = vector.load %arg2[%c1, %c0_71, %c0_72] : memref<2x256x256xbf16, #tpu.memory_space<vmem>>, vector<1x256x256xbf16>
    %202 = vector.shape_cast %201 : vector<1x256x256xbf16> to vector<256x256xbf16>
    %cst_73 = arith.constant dense<0.000000e+00> : vector<8x256xf32>
    %203 = tpu.matmul %199, %202, %cst_73 {dimension_numbers = #tpu.dot_dimension_numbers<[1], [0], [0], [1], [0, 0, 1, 1], [], []>} : vector<8x256xbf16>, vector<256x256xbf16>, vector<8x256xf32> -> vector<8x256xf32>
    %c1_74 = arith.constant 1 : index
    %c0_75 = arith.constant 0 : index
    %c0_76 = arith.constant 0 : index
    %204 = vector.load %arg3[%c1_74, %c0_75, %c0_76] : memref<2x1x256xf32, #tpu.memory_space<vmem>>, vector<1x1x256xf32>
    %205 = vector.shape_cast %204 : vector<1x1x256xf32> to vector<1x256xf32>
    %206 = vector.broadcast %205 : vector<1x256xf32> to vector<8x256xf32>
    %207 = arith.addf %203, %206 : vector<8x256xf32>
    %208 = arith.truncf %207 : vector<8x256xf32> to vector<8x256xbf16>
    %c1_77 = arith.constant 1 : index
    %c0_78 = arith.constant 0 : index
    %c0_79 = arith.constant 0 : index
    %209 = vector.load %arg4[%c1_77, %c0_78, %c0_79] : memref<2x256x1792xbf16, #tpu.memory_space<vmem>>, vector<1x256x1792xbf16>
    %210 = vector.shape_cast %209 : vector<1x256x1792xbf16> to vector<256x1792xbf16>
    %cst_80 = arith.constant dense<0.000000e+00> : vector<8x1792xf32>
    %211 = tpu.matmul %200, %210, %cst_80 {dimension_numbers = #tpu.dot_dimension_numbers<[1], [0], [0], [1], [0, 0, 1, 1], [], []>} : vector<8x256xbf16>, vector<256x1792xbf16>, vector<8x1792xf32> -> vector<8x1792xf32>
    %c1_81 = arith.constant 1 : index
    %c0_82 = arith.constant 0 : index
    %c0_83 = arith.constant 0 : index
    %212 = vector.load %arg5[%c1_81, %c0_82, %c0_83] : memref<2x1x1792xf32, #tpu.memory_space<vmem>>, vector<1x1x1792xf32>
    %213 = vector.shape_cast %212 : vector<1x1x1792xf32> to vector<1x1792xf32>
    %214 = vector.broadcast %213 : vector<1x1792xf32> to vector<8x1792xf32>
    %215 = arith.addf %211, %214 : vector<8x1792xf32>
    %216 = arith.truncf %215 : vector<8x1792xf32> to vector<8x1792xbf16>
    %217 = vector.extract_strided_slice %216 {offsets = [0, 0], sizes = [8, 256], strides = [1, 1]} : vector<8x1792xbf16> to vector<8x256xbf16>
    %218 = vector.extract_strided_slice %216 {offsets = [0, 256], sizes = [8, 256], strides = [1, 1]} : vector<8x1792xbf16> to vector<8x256xbf16>
    %219 = vector.extract_strided_slice %216 {offsets = [0, 512], sizes = [8, 256], strides = [1, 1]} : vector<8x1792xbf16> to vector<8x256xbf16>
    %220 = vector.extract_strided_slice %216 {offsets = [0, 768], sizes = [8, 256], strides = [1, 1]} : vector<8x1792xbf16> to vector<8x256xbf16>
    %221 = vector.extract_strided_slice %216 {offsets = [0, 1024], sizes = [8, 256], strides = [1, 1]} : vector<8x1792xbf16> to vector<8x256xbf16>
    %222 = vector.extract_strided_slice %216 {offsets = [0, 1280], sizes = [8, 256], strides = [1, 1]} : vector<8x1792xbf16> to vector<8x256xbf16>
    %223 = vector.extract_strided_slice %216 {offsets = [0, 1536], sizes = [8, 256], strides = [1, 1]} : vector<8x1792xbf16> to vector<8x256xbf16>
    %224 = vector.extract_strided_slice %208 {offsets = [0, 0], sizes = [8, 128], strides = [1, 1]} : vector<8x256xbf16> to vector<8x128xbf16>
    %225 = vector.extract_strided_slice %218 {offsets = [0, 0], sizes = [8, 128], strides = [1, 1]} : vector<8x256xbf16> to vector<8x128xbf16>
    %cst_84 = arith.constant dense<0.000000e+00> : vector<8x8xf32>
    %226 = tpu.matmul %224, %225, %cst_84 {dimension_numbers = #tpu.dot_dimension_numbers<[1], [1], [0], [0], [0, 0, 1, 0], [], []>} : vector<8x128xbf16>, vector<8x128xbf16>, vector<8x8xf32> -> vector<8x8xf32>
    %227 = arith.addf %226, %2 : vector<8x8xf32>
    %cst_85 = arith.constant dense<0xFF800000> : vector<8xf32>
    %228 = vector.multi_reduction <maximumf>, %227, %cst_85 [1] : vector<8x8xf32> to vector<8xf32>
    %229 = vector.shape_cast %228 : vector<8xf32> to vector<8x1xf32>
    %230 = vector.broadcast %229 : vector<8x1xf32> to vector<8x8xf32>
    %231 = arith.subf %227, %230 : vector<8x8xf32>
    %232 = math.exp %231 : vector<8x8xf32>
    %cst_86 = arith.constant dense<0.000000e+00> : vector<8xf32>
    %233 = vector.multi_reduction <add>, %232, %cst_86 [1] : vector<8x8xf32> to vector<8xf32>
    %234 = vector.shape_cast %233 : vector<8xf32> to vector<8x1xf32>
    %235 = tpu.reciprocal %234 {approx = true} : vector<8x1xf32> -> vector<8x1xf32>
    %236 = vector.broadcast %235 : vector<8x1xf32> to vector<8x8xf32>
    %237 = arith.mulf %232, %236 : vector<8x8xf32>
    %238 = arith.truncf %237 : vector<8x8xf32> to vector<8x8xbf16>
    %239 = vector.extract_strided_slice %219 {offsets = [0, 0], sizes = [8, 128], strides = [1, 1]} : vector<8x256xbf16> to vector<8x128xbf16>
    %cst_87 = arith.constant dense<0.000000e+00> : vector<8x128xf32>
    %240 = tpu.matmul %238, %239, %cst_87 {dimension_numbers = #tpu.dot_dimension_numbers<[1], [0], [0], [1], [0, 0, 1, 1], [], []>} : vector<8x8xbf16>, vector<8x128xbf16>, vector<8x128xf32> -> vector<8x128xf32>
    %241 = vector.extract_strided_slice %208 {offsets = [0, 128], sizes = [8, 128], strides = [1, 1]} : vector<8x256xbf16> to vector<8x128xbf16>
    %242 = vector.extract_strided_slice %218 {offsets = [0, 128], sizes = [8, 128], strides = [1, 1]} : vector<8x256xbf16> to vector<8x128xbf16>
    %cst_88 = arith.constant dense<0.000000e+00> : vector<8x8xf32>
    %243 = tpu.matmul %241, %242, %cst_88 {dimension_numbers = #tpu.dot_dimension_numbers<[1], [1], [0], [0], [0, 0, 1, 0], [], []>} : vector<8x128xbf16>, vector<8x128xbf16>, vector<8x8xf32> -> vector<8x8xf32>
    %244 = arith.addf %243, %2 : vector<8x8xf32>
    %cst_89 = arith.constant dense<0xFF800000> : vector<8xf32>
    %245 = vector.multi_reduction <maximumf>, %244, %cst_89 [1] : vector<8x8xf32> to vector<8xf32>
    %246 = vector.shape_cast %245 : vector<8xf32> to vector<8x1xf32>
    %247 = vector.broadcast %246 : vector<8x1xf32> to vector<8x8xf32>
    %248 = arith.subf %244, %247 : vector<8x8xf32>
    %249 = math.exp %248 : vector<8x8xf32>
    %cst_90 = arith.constant dense<0.000000e+00> : vector<8xf32>
    %250 = vector.multi_reduction <add>, %249, %cst_90 [1] : vector<8x8xf32> to vector<8xf32>
    %251 = vector.shape_cast %250 : vector<8xf32> to vector<8x1xf32>
    %252 = tpu.reciprocal %251 {approx = true} : vector<8x1xf32> -> vector<8x1xf32>
    %253 = vector.broadcast %252 : vector<8x1xf32> to vector<8x8xf32>
    %254 = arith.mulf %249, %253 : vector<8x8xf32>
    %255 = arith.truncf %254 : vector<8x8xf32> to vector<8x8xbf16>
    %256 = vector.extract_strided_slice %219 {offsets = [0, 128], sizes = [8, 128], strides = [1, 1]} : vector<8x256xbf16> to vector<8x128xbf16>
    %cst_91 = arith.constant dense<0.000000e+00> : vector<8x128xf32>
    %257 = tpu.matmul %255, %256, %cst_91 {dimension_numbers = #tpu.dot_dimension_numbers<[1], [0], [0], [1], [0, 0, 1, 1], [], []>} : vector<8x8xbf16>, vector<8x128xbf16>, vector<8x128xf32> -> vector<8x128xf32>
    %258 = tpu.concatenate %240, %257 in 1 : vector<8x128xf32>, vector<8x128xf32> -> vector<8x256xf32>
    %259 = vector.broadcast %3 : vector<8x1xf32> to vector<8x256xf32>
    %260 = arith.mulf %258, %259 : vector<8x256xf32>
    %261 = vector.extract_strided_slice %217 {offsets = [0, 0], sizes = [8, 128], strides = [1, 1]} : vector<8x256xbf16> to vector<8x128xbf16>
    %262 = vector.extract_strided_slice %220 {offsets = [0, 0], sizes = [8, 128], strides = [1, 1]} : vector<8x256xbf16> to vector<8x128xbf16>
    %cst_92 = arith.constant dense<0.000000e+00> : vector<8x8xf32>
    %263 = tpu.matmul %261, %262, %cst_92 {dimension_numbers = #tpu.dot_dimension_numbers<[1], [1], [0], [0], [0, 0, 1, 0], [], []>} : vector<8x128xbf16>, vector<8x128xbf16>, vector<8x8xf32> -> vector<8x8xf32>
    %264 = arith.addf %263, %4 : vector<8x8xf32>
    %cst_93 = arith.constant dense<0xFF800000> : vector<8xf32>
    %265 = vector.multi_reduction <maximumf>, %264, %cst_93 [1] : vector<8x8xf32> to vector<8xf32>
    %266 = vector.shape_cast %265 : vector<8xf32> to vector<8x1xf32>
    %267 = vector.broadcast %266 : vector<8x1xf32> to vector<8x8xf32>
    %268 = arith.subf %264, %267 : vector<8x8xf32>
    %269 = math.exp %268 : vector<8x8xf32>
    %cst_94 = arith.constant dense<0.000000e+00> : vector<8xf32>
    %270 = vector.multi_reduction <add>, %269, %cst_94 [1] : vector<8x8xf32> to vector<8xf32>
    %271 = vector.shape_cast %270 : vector<8xf32> to vector<8x1xf32>
    %272 = tpu.reciprocal %271 {approx = true} : vector<8x1xf32> -> vector<8x1xf32>
    %273 = vector.broadcast %272 : vector<8x1xf32> to vector<8x8xf32>
    %274 = arith.mulf %269, %273 : vector<8x8xf32>
    %275 = arith.truncf %274 : vector<8x8xf32> to vector<8x8xbf16>
    %276 = vector.extract_strided_slice %221 {offsets = [0, 0], sizes = [8, 128], strides = [1, 1]} : vector<8x256xbf16> to vector<8x128xbf16>
    %cst_95 = arith.constant dense<0.000000e+00> : vector<8x128xf32>
    %277 = tpu.matmul %275, %276, %cst_95 {dimension_numbers = #tpu.dot_dimension_numbers<[1], [0], [0], [1], [0, 0, 1, 1], [], []>} : vector<8x8xbf16>, vector<8x128xbf16>, vector<8x128xf32> -> vector<8x128xf32>
    %278 = vector.extract_strided_slice %217 {offsets = [0, 128], sizes = [8, 128], strides = [1, 1]} : vector<8x256xbf16> to vector<8x128xbf16>
    %279 = vector.extract_strided_slice %220 {offsets = [0, 128], sizes = [8, 128], strides = [1, 1]} : vector<8x256xbf16> to vector<8x128xbf16>
    %cst_96 = arith.constant dense<0.000000e+00> : vector<8x8xf32>
    %280 = tpu.matmul %278, %279, %cst_96 {dimension_numbers = #tpu.dot_dimension_numbers<[1], [1], [0], [0], [0, 0, 1, 0], [], []>} : vector<8x128xbf16>, vector<8x128xbf16>, vector<8x8xf32> -> vector<8x8xf32>
    %281 = arith.addf %280, %4 : vector<8x8xf32>
    %cst_97 = arith.constant dense<0xFF800000> : vector<8xf32>
    %282 = vector.multi_reduction <maximumf>, %281, %cst_97 [1] : vector<8x8xf32> to vector<8xf32>
    %283 = vector.shape_cast %282 : vector<8xf32> to vector<8x1xf32>
    %284 = vector.broadcast %283 : vector<8x1xf32> to vector<8x8xf32>
    %285 = arith.subf %281, %284 : vector<8x8xf32>
    %286 = math.exp %285 : vector<8x8xf32>
    %cst_98 = arith.constant dense<0.000000e+00> : vector<8xf32>
    %287 = vector.multi_reduction <add>, %286, %cst_98 [1] : vector<8x8xf32> to vector<8xf32>
    %288 = vector.shape_cast %287 : vector<8xf32> to vector<8x1xf32>
    %289 = tpu.reciprocal %288 {approx = true} : vector<8x1xf32> -> vector<8x1xf32>
    %290 = vector.broadcast %289 : vector<8x1xf32> to vector<8x8xf32>
    %291 = arith.mulf %286, %290 : vector<8x8xf32>
    %292 = arith.truncf %291 : vector<8x8xf32> to vector<8x8xbf16>
    %293 = vector.extract_strided_slice %221 {offsets = [0, 128], sizes = [8, 128], strides = [1, 1]} : vector<8x256xbf16> to vector<8x128xbf16>
    %cst_99 = arith.constant dense<0.000000e+00> : vector<8x128xf32>
    %294 = tpu.matmul %292, %293, %cst_99 {dimension_numbers = #tpu.dot_dimension_numbers<[1], [0], [0], [1], [0, 0, 1, 1], [], []>} : vector<8x8xbf16>, vector<8x128xbf16>, vector<8x128xf32> -> vector<8x128xf32>
    %295 = tpu.concatenate %277, %294 in 1 : vector<8x128xf32>, vector<8x128xf32> -> vector<8x256xf32>
    %296 = vector.broadcast %5 : vector<8x1xf32> to vector<8x256xf32>
    %297 = arith.mulf %295, %296 : vector<8x256xf32>
    %298 = vector.extract_strided_slice %217 {offsets = [0, 0], sizes = [8, 128], strides = [1, 1]} : vector<8x256xbf16> to vector<8x128xbf16>
    %299 = vector.extract_strided_slice %222 {offsets = [0, 0], sizes = [8, 128], strides = [1, 1]} : vector<8x256xbf16> to vector<8x128xbf16>
    %cst_100 = arith.constant dense<0.000000e+00> : vector<8x8xf32>
    %300 = tpu.matmul %298, %299, %cst_100 {dimension_numbers = #tpu.dot_dimension_numbers<[1], [1], [0], [0], [0, 0, 1, 0], [], []>} : vector<8x128xbf16>, vector<8x128xbf16>, vector<8x8xf32> -> vector<8x8xf32>
    %301 = arith.addf %300, %6 : vector<8x8xf32>
    %cst_101 = arith.constant dense<0xFF800000> : vector<8xf32>
    %302 = vector.multi_reduction <maximumf>, %301, %cst_101 [1] : vector<8x8xf32> to vector<8xf32>
    %303 = vector.shape_cast %302 : vector<8xf32> to vector<8x1xf32>
    %304 = vector.broadcast %303 : vector<8x1xf32> to vector<8x8xf32>
    %305 = arith.subf %301, %304 : vector<8x8xf32>
    %306 = math.exp %305 : vector<8x8xf32>
    %cst_102 = arith.constant dense<0.000000e+00> : vector<8xf32>
    %307 = vector.multi_reduction <add>, %306, %cst_102 [1] : vector<8x8xf32> to vector<8xf32>
    %308 = vector.shape_cast %307 : vector<8xf32> to vector<8x1xf32>
    %309 = tpu.reciprocal %308 {approx = true} : vector<8x1xf32> -> vector<8x1xf32>
    %310 = vector.broadcast %309 : vector<8x1xf32> to vector<8x8xf32>
    %311 = arith.mulf %306, %310 : vector<8x8xf32>
    %312 = arith.truncf %311 : vector<8x8xf32> to vector<8x8xbf16>
    %313 = vector.extract_strided_slice %223 {offsets = [0, 0], sizes = [8, 128], strides = [1, 1]} : vector<8x256xbf16> to vector<8x128xbf16>
    %cst_103 = arith.constant dense<0.000000e+00> : vector<8x128xf32>
    %314 = tpu.matmul %312, %313, %cst_103 {dimension_numbers = #tpu.dot_dimension_numbers<[1], [0], [0], [1], [0, 0, 1, 1], [], []>} : vector<8x8xbf16>, vector<8x128xbf16>, vector<8x128xf32> -> vector<8x128xf32>
    %315 = vector.extract_strided_slice %217 {offsets = [0, 128], sizes = [8, 128], strides = [1, 1]} : vector<8x256xbf16> to vector<8x128xbf16>
    %316 = vector.extract_strided_slice %222 {offsets = [0, 128], sizes = [8, 128], strides = [1, 1]} : vector<8x256xbf16> to vector<8x128xbf16>
    %cst_104 = arith.constant dense<0.000000e+00> : vector<8x8xf32>
    %317 = tpu.matmul %315, %316, %cst_104 {dimension_numbers = #tpu.dot_dimension_numbers<[1], [1], [0], [0], [0, 0, 1, 0], [], []>} : vector<8x128xbf16>, vector<8x128xbf16>, vector<8x8xf32> -> vector<8x8xf32>
    %318 = arith.addf %317, %6 : vector<8x8xf32>
    %cst_105 = arith.constant dense<0xFF800000> : vector<8xf32>
    %319 = vector.multi_reduction <maximumf>, %318, %cst_105 [1] : vector<8x8xf32> to vector<8xf32>
    %320 = vector.shape_cast %319 : vector<8xf32> to vector<8x1xf32>
    %321 = vector.broadcast %320 : vector<8x1xf32> to vector<8x8xf32>
    %322 = arith.subf %318, %321 : vector<8x8xf32>
    %323 = math.exp %322 : vector<8x8xf32>
    %cst_106 = arith.constant dense<0.000000e+00> : vector<8xf32>
    %324 = vector.multi_reduction <add>, %323, %cst_106 [1] : vector<8x8xf32> to vector<8xf32>
    %325 = vector.shape_cast %324 : vector<8xf32> to vector<8x1xf32>
    %326 = tpu.reciprocal %325 {approx = true} : vector<8x1xf32> -> vector<8x1xf32>
    %327 = vector.broadcast %326 : vector<8x1xf32> to vector<8x8xf32>
    %328 = arith.mulf %323, %327 : vector<8x8xf32>
    %329 = arith.truncf %328 : vector<8x8xf32> to vector<8x8xbf16>
    %330 = vector.extract_strided_slice %223 {offsets = [0, 128], sizes = [8, 128], strides = [1, 1]} : vector<8x256xbf16> to vector<8x128xbf16>
    %cst_107 = arith.constant dense<0.000000e+00> : vector<8x128xf32>
    %331 = tpu.matmul %329, %330, %cst_107 {dimension_numbers = #tpu.dot_dimension_numbers<[1], [0], [0], [1], [0, 0, 1, 1], [], []>} : vector<8x8xbf16>, vector<8x128xbf16>, vector<8x128xf32> -> vector<8x128xf32>
    %332 = tpu.concatenate %314, %331 in 1 : vector<8x128xf32>, vector<8x128xf32> -> vector<8x256xf32>
    %333 = vector.broadcast %7 : vector<8x1xf32> to vector<8x256xf32>
    %334 = arith.mulf %332, %333 : vector<8x256xf32>
    %335 = arith.addf %297, %334 : vector<8x256xf32>
    %cst_108 = arith.constant 5.000000e-01 : f32
    %336 = vector.broadcast %cst_108 : f32 to vector<8x256xf32>
    %337 = arith.mulf %336, %335 : vector<8x256xf32>
    %338 = arith.addf %260, %173 : vector<8x256xf32>
    %339 = vector.extract_strided_slice %8 {offsets = [1, 0, 0, 0], sizes = [1, 1, 1, 256], strides = [1, 1, 1, 1]} : vector<2x2x1x256xf32> to vector<1x1x1x256xf32>
    %340 = vector.shape_cast %339 : vector<1x1x1x256xf32> to vector<1x256xf32>
    %341 = vector.extract_strided_slice %9 {offsets = [1, 0, 0, 0], sizes = [1, 1, 1, 256], strides = [1, 1, 1, 1]} : vector<2x2x1x256xf32> to vector<1x1x1x256xf32>
    %342 = vector.shape_cast %341 : vector<1x1x1x256xf32> to vector<1x256xf32>
    %cst_109 = arith.constant dense<0.000000e+00> : vector<8xf32>
    %343 = vector.multi_reduction <add>, %338, %cst_109 [1] : vector<8x256xf32> to vector<8xf32>
    %344 = vector.shape_cast %343 : vector<8xf32> to vector<8x1xf32>
    %cst_110 = arith.constant 2.560000e+02 : f32
    %345 = vector.broadcast %cst_110 : f32 to vector<8x1xf32>
    %346 = arith.divf %344, %345 : vector<8x1xf32>
    %347 = vector.broadcast %346 : vector<8x1xf32> to vector<8x256xf32>
    %348 = arith.subf %338, %347 : vector<8x256xf32>
    %349 = arith.mulf %348, %348 : vector<8x256xf32>
    %cst_111 = arith.constant dense<0.000000e+00> : vector<8xf32>
    %350 = vector.multi_reduction <add>, %349, %cst_111 [1] : vector<8x256xf32> to vector<8xf32>
    %351 = vector.shape_cast %350 : vector<8xf32> to vector<8x1xf32>
    %cst_112 = arith.constant 2.560000e+02 : f32
    %352 = vector.broadcast %cst_112 : f32 to vector<8x1xf32>
    %353 = arith.divf %351, %352 : vector<8x1xf32>
    %cst_113 = arith.constant 9.99999974E-6 : f32
    %354 = vector.broadcast %cst_113 : f32 to vector<8x1xf32>
    %355 = arith.addf %353, %354 : vector<8x1xf32>
    %356 = math.rsqrt %355 : vector<8x1xf32>
    %357 = vector.broadcast %356 : vector<8x1xf32> to vector<8x256xf32>
    %358 = arith.mulf %348, %357 : vector<8x256xf32>
    %359 = vector.broadcast %340 : vector<1x256xf32> to vector<8x256xf32>
    %360 = arith.mulf %358, %359 : vector<8x256xf32>
    %361 = vector.broadcast %342 : vector<1x256xf32> to vector<8x256xf32>
    %362 = arith.addf %360, %361 : vector<8x256xf32>
    %363 = arith.addf %337, %198 : vector<8x256xf32>
    %364 = vector.extract_strided_slice %8 {offsets = [1, 1, 0, 0], sizes = [1, 1, 1, 256], strides = [1, 1, 1, 1]} : vector<2x2x1x256xf32> to vector<1x1x1x256xf32>
    %365 = vector.shape_cast %364 : vector<1x1x1x256xf32> to vector<1x256xf32>
    %366 = vector.extract_strided_slice %9 {offsets = [1, 1, 0, 0], sizes = [1, 1, 1, 256], strides = [1, 1, 1, 1]} : vector<2x2x1x256xf32> to vector<1x1x1x256xf32>
    %367 = vector.shape_cast %366 : vector<1x1x1x256xf32> to vector<1x256xf32>
    %cst_114 = arith.constant dense<0.000000e+00> : vector<8xf32>
    %368 = vector.multi_reduction <add>, %363, %cst_114 [1] : vector<8x256xf32> to vector<8xf32>
    %369 = vector.shape_cast %368 : vector<8xf32> to vector<8x1xf32>
    %cst_115 = arith.constant 2.560000e+02 : f32
    %370 = vector.broadcast %cst_115 : f32 to vector<8x1xf32>
    %371 = arith.divf %369, %370 : vector<8x1xf32>
    %372 = vector.broadcast %371 : vector<8x1xf32> to vector<8x256xf32>
    %373 = arith.subf %363, %372 : vector<8x256xf32>
    %374 = arith.mulf %373, %373 : vector<8x256xf32>
    %cst_116 = arith.constant dense<0.000000e+00> : vector<8xf32>
    %375 = vector.multi_reduction <add>, %374, %cst_116 [1] : vector<8x256xf32> to vector<8xf32>
    %376 = vector.shape_cast %375 : vector<8xf32> to vector<8x1xf32>
    %cst_117 = arith.constant 2.560000e+02 : f32
    %377 = vector.broadcast %cst_117 : f32 to vector<8x1xf32>
    %378 = arith.divf %376, %377 : vector<8x1xf32>
    %cst_118 = arith.constant 9.99999974E-6 : f32
    %379 = vector.broadcast %cst_118 : f32 to vector<8x1xf32>
    %380 = arith.addf %378, %379 : vector<8x1xf32>
    %381 = math.rsqrt %380 : vector<8x1xf32>
    %382 = vector.broadcast %381 : vector<8x1xf32> to vector<8x256xf32>
    %383 = arith.mulf %373, %382 : vector<8x256xf32>
    %384 = vector.broadcast %365 : vector<1x256xf32> to vector<8x256xf32>
    %385 = arith.mulf %383, %384 : vector<8x256xf32>
    %386 = vector.broadcast %367 : vector<1x256xf32> to vector<8x256xf32>
    %387 = arith.addf %385, %386 : vector<8x256xf32>
    %388 = tpu.concatenate %362, %387 in 0 : vector<8x256xf32>, vector<8x256xf32> -> vector<16x256xf32>
    %389 = arith.truncf %388 : vector<16x256xf32> to vector<16x256xbf16>
    %c0_119 = arith.constant 0 : index
    %c0_120 = arith.constant 0 : index
    %390 = vector.load %arg14[%c0_119, %c0_120] : memref<256x128xbf16, #tpu.memory_space<vmem>>, vector<256x128xbf16>
    %cst_121 = arith.constant dense<0.000000e+00> : vector<16x128xf32>
    %391 = tpu.matmul %389, %390, %cst_121 {dimension_numbers = #tpu.dot_dimension_numbers<[1], [0], [0], [1], [0, 0, 1, 1], [], []>} : vector<16x256xbf16>, vector<256x128xbf16>, vector<16x128xf32> -> vector<16x128xf32>
    %c0_122 = arith.constant 0 : index
    %c0_123 = arith.constant 0 : index
    %392 = vector.load %arg15[%c0_122, %c0_123] : memref<1x128xf32, #tpu.memory_space<vmem>>, vector<1x128xf32>
    %393 = vector.broadcast %392 : vector<1x128xf32> to vector<16x128xf32>
    %394 = arith.addf %391, %393 : vector<16x128xf32>
    %395 = vector.extract_strided_slice %394 {offsets = [0, 0], sizes = [8, 128], strides = [1, 1]} : vector<16x128xf32> to vector<8x128xf32>
    %c0_124 = arith.constant 0 : index
    %c0_125 = arith.constant 0 : index
    %396 = vector.load %arg16[%c0_124, %c0_125] : memref<8x128xf32, #tpu.memory_space<vmem>>, vector<8x128xf32>
    tpu.vector_store %arg16[%c0_124, %c0_125], %395 {strides = array<i32>} : memref<8x128xf32, #tpu.memory_space<vmem>>, vector<8x128xf32>,
    %397 = vector.extract_strided_slice %394 {offsets = [8, 0], sizes = [8, 128], strides = [1, 1]} : vector<16x128xf32> to vector<8x128xf32>
    %c0_126 = arith.constant 0 : index
    %c0_127 = arith.constant 0 : index
    %398 = vector.load %arg17[%c0_126, %c0_127] : memref<8x128xf32, #tpu.memory_space<vmem>>, vector<8x128xf32>
    tpu.vector_store %arg17[%c0_126, %c0_127], %397 {strides = array<i32>} : memref<8x128xf32, #tpu.memory_space<vmem>>, vector<8x128xf32>,
    return
  }
}

</mosaic_0001>

<bundles_post_ra>
// kernel: mi_forward.1
= control target key start
LH: loop header
LB: loop body
LE: loop exit
PB: predicated region body
PF: predicated region fallthrough
CT: control target
= control target key end

     0   :  { %s8495_s0 = inlined_call_operand.hbm [shape: f32[8,256], index: 0, kind: input, shape index: {}]   ;;  %s8496_s1 = inlined_call_operand.hbm [shape: f32[8,256], index: 1, kind: input, shape index: {}]   ;;  %s8497_s2 = inlined_call_operand.hbm [shape: bf16[2,256,256], index: 2, kind: input, shape index: {}]   ;;  %s8498_s3 = inlined_call_operand.hbm [shape: f32[2,1,256], index: 3, kind: input, shape index: {}]   ;;  %s8499_s4 = inlined_call_operand.hbm [shape: bf16[2,256,1792], index: 4, kind: input, shape index: {}]   ;;  %s8500_s5 = inlined_call_operand.hbm [shape: f32[2,1,1792], index: 5, kind: input, shape index: {}]   ;;  %s8501_s6 = inlined_call_operand.hbm [shape: f32[2,2,1,256], index: 6, kind: input, shape index: {}]   ;;  %s8502_s7 = inlined_call_operand.hbm [shape: f32[2,2,1,256], index: 7, kind: input, shape index: {}]   ;;  %s8503_s8 = inlined_call_operand.hbm [shape: f32[8,8], index: 8, kind: input, shape index: {}]   ;;  %s8504_s9 = inlined_call_operand.hbm [shape: f32[8,8], index: 9, kind: input, shape index: {}]   ;;  %s8505_s10 = inlined_call_operand.hbm [shape: f32[8,8], index: 10, kind: input, shape index: {}]   ;;  %s8506_s11 = inlined_call_operand.vmem [shape: f32[8,1], index: 11, kind: input, shape index: {}]   ;;  %s8507_s12 = inlined_call_operand.vmem [shape: f32[8,1], index: 12, kind: input, shape index: {}]   ;;  %s8508_s13 = inlined_call_operand.vmem [shape: f32[8,1], index: 13, kind: input, shape index: {}]   ;;  %s8509_s14 = inlined_call_operand.hbm [shape: bf16[256,128], index: 14, kind: input, shape index: {}]   ;;  %s8510_s15 = inlined_call_operand.hbm [shape: f32[1,128], index: 15, kind: input, shape index: {}]   ;;  %s8511_s16 = inlined_call_operand.hbm [shape: f32[8,128], index: 16, kind: output, shape index: {0}]   ;;  %s8512_s17 = inlined_call_operand.hbm [shape: f32[8,128], index: 17, kind: output, shape index: {1}]  }
   0x1   :  { %8519 = sst [smem:[#allocation35_spill]] %s8495_s0 }
   0x2   :  { %8520 = sst [smem:[#allocation36_spill]] %s8496_s1 }
   0x3   :  { %23 = vsyncpa [#allocation3], 0 }
   0x4   :  { %24 = vsyncpa [#allocation6], 0 }
   0x5   :  { %25 = vsyncpa [#allocation9], 0 }
   0x6   :  { %26 = vsyncpa [#allocation12], 0 }
   0x7   :  { %27 = vsyncpa [#allocation15], 0 }
   0x8   :  { %28 = vsyncpa [#allocation18], 0 }
   0x9   :  { %29 = vsyncpa [#allocation21], 0 }
   0xa   :  { %30 = vsyncpa [#allocation4], 0 }
   0xb   :  { %31 = vsyncpa [#allocation25], 0  ;;  %s7769_s24 = smov [#allocation5]   ;;  %s7770_s26 = smov [#allocation8]  }
   0xc   :  { %s48_s25 = sshll.u32 %s7769_s24, 4  ;;  %s69_s27 = sshll.u32 %s7770_s26, 4  ;;  %s49_s25 = int_to_ptr.vmem [resolvable:$true] %s48_s25  ;;  %s7887_s27 = int_to_ptr.vmem [resolvable:$true] %s69_s27 }
   0xd   :  { %s8521_s0 = sld [smem:[#allocation36_spill]] }
  0x13   :  { %s7421_s30 = scalar_lea.hbm %s8521_s0, 256 }
  0x14   :  { %p7422_p0 = scmp.ne.s32.totalorder %s8521_s0, %s7421_s30  ;;  %p7425_p1 = scmp.lt.u32.totalorder %s7421_s30, %s8521_s0 }
  0x16   :  { %p7427_p2 = pnand %p7425_p1, %p7422_p0 }
  0x18   :  { %7430 = shalt.err (!%p7427_p2)
}
  0x19   :  { %s7431_s21 = scalar_lea.vmem %s49_s25, 256  ;;  %p7436_p4 = scmp.lt.s32.totalorder %s49_s25, %s49_s25 }
  0x1a   :  { %p7432_p3 = scmp.ne.s32.totalorder %s49_s25, %s7431_s21  ;;  %p7437_p5 = scmp.lt.s32.totalorder %s7431_s21, %s7431_s21 }
  0x1c   :  { %p7438_p6 = por %p7437_p5, %p7436_p4 }
  0x1e   :  { %p7439_p7 = pnand %p7438_p6, %p7432_p3 }
  0x20   :  { %7442 = shalt.err (!%p7439_p7)
}
  0x21   :  { %51 = dma.hbm_to_vmem [thread:$0]  %s8521_s0, 256, %s49_s25, [#allocation6]  }
  0x22   :  { %s7443_s28 = scalar_lea.hbm %s8498_s3, 64 }
  0x23   :  { %p7444_p8 = scmp.ne.s32.totalorder %s8498_s3, %s7443_s28  ;;  %p7447_p9 = scmp.lt.u32.totalorder %s7443_s28, %s8498_s3 }
  0x25   :  { %p7449_p10 = pnand %p7447_p9, %p7444_p8 }
  0x27   :  { %7452 = shalt.err (!%p7449_p10)
}
  0x28   :  { %s7453_s1 = scalar_lea.vmem %s7887_s27, 64  ;;  %p7458_p12 = scmp.lt.s32.totalorder %s7887_s27, %s7887_s27 }
  0x29   :  { %p7454_p11 = scmp.ne.s32.totalorder %s7887_s27, %s7453_s1  ;;  %p7459_p13 = scmp.lt.s32.totalorder %s7453_s1, %s7453_s1 }
  0x2b   :  { %p7460_p0 = por %p7459_p13, %p7458_p12 }
  0x2d   :  { %p7461_p1 = pnand %p7460_p0, %p7454_p11 }
  0x2f   :  { %7464 = shalt.err (!%p7461_p1)
}
  0x30   :  { %s8515_s25 = smov 32   ;;  %s8517_s0 = smov 2  }
  0x31   :  { %75 = dma.hbm_to_vmem [thread:$0]  %s8498_s3, 64, %s7887_s27, [#allocation9], %s8515_s25, %s8515_s25, %s8517_s0  }
  0x32   :  { %s7773_s22 = smov [#allocation11]   ;;  %s7465_s28 = scalar_lea.hbm %s8500_s5, 448 }
  0x33   :  { %s93_s23 = sshll.u32 %s7773_s22, 4  ;;  %p7466_p2 = scmp.ne.s32.totalorder %s8500_s5, %s7465_s28  ;;  %s94_s23 = int_to_ptr.vmem [resolvable:$true] %s93_s23 }
  0x34   :  { %p7469_p3 = scmp.lt.u32.totalorder %s7465_s28, %s8500_s5 }
  0x36   :  { %p7471_p4 = pnand %p7469_p3, %p7466_p2 }
  0x38   :  { %7474 = shalt.err (!%p7471_p4)
}
  0x39   :  { %s7475_s1 = scalar_lea.vmem %s94_s23, 448  ;;  %p7480_p6 = scmp.lt.s32.totalorder %s94_s23, %s94_s23 }
  0x3a   :  { %p7476_p5 = scmp.ne.s32.totalorder %s94_s23, %s7475_s1  ;;  %p7481_p7 = scmp.lt.s32.totalorder %s7475_s1, %s7475_s1 }
  0x3c   :  { %p7482_p8 = por %p7481_p7, %p7480_p6 }
  0x3e   :  { %p7483_p9 = pnand %p7482_p8, %p7476_p5 }
  0x40   :  { %7486 = shalt.err (!%p7483_p9)
}
  0x41   :  { %s7774_s3 = smov 224   ;;  %s7775_s27 = smov 14  }
  0x42   :  { %99 = dma.hbm_to_vmem [thread:$0]  %s8500_s5, 448, %s94_s23, [#allocation12], %s7774_s3, %s7774_s3, %s7775_s27  }
  0x43   :  { %s7776_s22 = smov [#allocation14]   ;;  %s7777_s26 = smov [#allocation17]  }
  0x44   :  { %s117_s24 = sshll.u32 %s7776_s22, 4  ;;  %s140_s28 = sshll.u32 %s7777_s26, 4  ;;  %s118_s24 = int_to_ptr.vmem [resolvable:$true] %s117_s24  ;;  %s141_s28 = int_to_ptr.vmem [resolvable:$true] %s140_s28 }
  0x45   :  { %s7487_s30 = scalar_lea.hbm %s8502_s7, 128 }
  0x46   :  { %p7488_p10 = scmp.ne.s32.totalorder %s8502_s7, %s7487_s30  ;;  %p7491_p11 = scmp.lt.u32.totalorder %s7487_s30, %s8502_s7 }
  0x48   :  { %p7493_p12 = pnand %p7491_p11, %p7488_p10 }
  0x4a   :  { %7496 = shalt.err (!%p7493_p12)
}
  0x4b   :  { %s7497_s5 = scalar_lea.vmem %s118_s24, 128  ;;  %p7502_p0 = scmp.lt.s32.totalorder %s118_s24, %s118_s24 }
  0x4c   :  { %p7498_p13 = scmp.ne.s32.totalorder %s118_s24, %s7497_s5  ;;  %p7503_p1 = scmp.lt.s32.totalorder %s7497_s5, %s7497_s5 }
  0x4e   :  { %p7504_p2 = por %p7503_p1, %p7502_p0 }
  0x50   :  { %p7505_p3 = pnand %p7504_p2, %p7498_p13 }
  0x52   :  { %7508 = shalt.err (!%p7505_p3)
}
  0x53   :  { %s8522_s23 = smov 2   ;;  %s8523_s3 = smov 32  }
  0x54   :  { %123 = dma.hbm_to_vmem [thread:$0]  %s8502_s7, 128, %s118_s24, [#allocation15], %s8523_s3, %s8523_s3, %s8522_s23  }
  0x55   :  { %s7509_s0 = scalar_lea.hbm %s8504_s9, 128 }
  0x56   :  { %p7510_p4 = scmp.ne.s32.totalorder %s8504_s9, %s7509_s0  ;;  %p7513_p5 = scmp.lt.u32.totalorder %s7509_s0, %s8504_s9 }
  0x58   :  { %p7515_p6 = pnand %p7513_p5, %p7510_p4 }
  0x5a   :  { %7518 = shalt.err (!%p7515_p6)
}
  0x5b   :  { %s7519_s30 = scalar_lea.vmem %s141_s28, 128  ;;  %p7524_p8 = scmp.lt.s32.totalorder %s141_s28, %s141_s28 }
  0x5c   :  { %p7520_p7 = scmp.ne.s32.totalorder %s141_s28, %s7519_s30  ;;  %p7525_p9 = scmp.lt.s32.totalorder %s7519_s30, %s7519_s30 }
  0x5e   :  { %p7526_p10 = por %p7525_p9, %p7524_p8 }
  0x60   :  { %p7527_p11 = pnand %p7526_p10, %p7520_p7 }
  0x62   :  { %7530 = shalt.err (!%p7527_p11)
}
  0x63   :  { %143 = dma.hbm_to_vmem [thread:$0]  %s8504_s9, 128, %s141_s28, [#allocation18]  }
  0x64   :  { %s7778_s19 = smov [#allocation20]   ;;  %s7531_s20 = scalar_lea.hbm %s8509_s14, 2048 }
  0x65   :  { %s165_s1 = sshll.u32 %s7778_s19, 4  ;;  %p7532_p12 = scmp.ne.s32.totalorder %s8509_s14, %s7531_s20  ;;  %s166_s1 = int_to_ptr.vmem [resolvable:$true] %s165_s1 }
  0x66   :  { %p7535_p13 = scmp.lt.u32.totalorder %s7531_s20, %s8509_s14 }
  0x68   :  { %p7537_p0 = pnand %p7535_p13, %p7532_p12 }
  0x6a   :  { %7540 = shalt.err (!%p7537_p0)
}
  0x6b   :  { %s7541_s26 = scalar_lea.vmem %s166_s1, 2048  ;;  %p7546_p2 = scmp.lt.s32.totalorder %s166_s1, %s166_s1 }
  0x6c   :  { %p7542_p1 = scmp.ne.s32.totalorder %s166_s1, %s7541_s26  ;;  %p7547_p3 = scmp.lt.s32.totalorder %s7541_s26, %s7541_s26 }
  0x6e   :  { %p7548_p4 = por %p7547_p3, %p7546_p2 }
  0x70   :  { %p7549_p5 = pnand %p7548_p4, %p7542_p1 }
  0x72   :  { %7552 = shalt.err (!%p7549_p5)
}
  0x73   :  { %s7779_s9 = smov 64   ;;  %s7780_s28 = smov 4  }
  0x74   :  { %171 = dma.hbm_to_vmem [thread:$0]  %s8509_s14, 2048, %s166_s1, [#allocation21], %s7779_s9, %s7779_s9, %s7780_s28  }
  0x75   :  { %s7781_s30 = smov [#allocation2]   ;;  %s7782_s24 = smov [#allocation7]  }
  0x76   :  { %s38_s7 = sshll.u32 %s7781_s30, 4  ;;  %s57_s19 = sshll.u32 %s7782_s24, 4  ;;  %s39_s7 = int_to_ptr.vmem [resolvable:$true] %s38_s7  ;;  %s7972_s19 = int_to_ptr.vmem [resolvable:$true] %s57_s19 }
  0x77   :  { %s8524_s20 = sld [smem:[#allocation35_spill]] }
  0x7d   :  { %s7553_s21 = scalar_lea.hbm %s8524_s20, 256 }
  0x7e   :  { %p7554_p6 = scmp.ne.s32.totalorder %s8524_s20, %s7553_s21  ;;  %p7557_p7 = scmp.lt.u32.totalorder %s7553_s21, %s8524_s20 }
  0x80   :  { %p7559_p8 = pnand %p7557_p7, %p7554_p6 }
  0x82   :  { %7562 = shalt.err (!%p7559_p8)
}
  0x83   :  { %s7563_s14 = scalar_lea.vmem %s39_s7, 256  ;;  %p7568_p10 = scmp.lt.s32.totalorder %s39_s7, %s39_s7 }
  0x84   :  { %p7564_p9 = scmp.ne.s32.totalorder %s39_s7, %s7563_s14  ;;  %p7569_p11 = scmp.lt.s32.totalorder %s7563_s14, %s7563_s14 }
  0x86   :  { %p7570_p12 = por %p7569_p11, %p7568_p10 }
  0x88   :  { %p7571_p13 = pnand %p7570_p12, %p7564_p9 }
  0x8a   :  { %7574 = shalt.err (!%p7571_p13)
}
  0x8b   :  { %41 = dma.hbm_to_vmem [thread:$0]  %s8524_s20, 256, %s39_s7, [#allocation3]  }
  0x8c   :  { %s7575_s18 = scalar_lea.hbm %s8497_s2, 8192 }
  0x8d   :  { %p7576_p0 = scmp.ne.s32.totalorder %s8497_s2, %s7575_s18  ;;  %p7579_p1 = scmp.lt.u32.totalorder %s7575_s18, %s8497_s2 }
  0x8f   :  { %p7581_p2 = pnand %p7579_p1, %p7576_p0 }
  0x91   :  { %7584 = shalt.err (!%p7581_p2)
}
  0x92   :  { %s7585_s21 = scalar_lea.vmem %s7972_s19, 8192  ;;  %p7590_p4 = scmp.lt.s32.totalorder %s7972_s19, %s7972_s19 }
  0x93   :  { %p7586_p3 = scmp.ne.s32.totalorder %s7972_s19, %s7585_s21  ;;  %p7591_p5 = scmp.lt.s32.totalorder %s7585_s21, %s7585_s21 }
  0x95   :  { %p7592_p6 = por %p7591_p5, %p7590_p4 }
  0x97   :  { %p7593_p7 = pnand %p7592_p6, %p7586_p3 }
  0x99   :  { %7596 = shalt.err (!%p7593_p7)
}
  0x9a   :  { %s7783_s7 = smov 128   ;;  %s7784_s20 = smov 8  }
  0x9b   :  { %63 = dma.hbm_to_vmem [thread:$0]  %s8497_s2, 8192, %s7972_s19, [#allocation6], %s7783_s7, %s7783_s7, %s7784_s20  }
  0x9c   :  { %s7785_s22 = smov [#allocation10]   ;;  %s7597_s9 = scalar_lea.hbm %s8499_s4, 57344 }
  0x9d   :  { %s81_s26 = sshll.u32 %s7785_s22, 4  ;;  %p7598_p8 = scmp.ne.s32.totalorder %s8499_s4, %s7597_s9  ;;  %s82_s26 = int_to_ptr.vmem [resolvable:$true] %s81_s26 }
  0x9e   :  { %p7601_p9 = scmp.lt.u32.totalorder %s7597_s9, %s8499_s4 }
  0xa0   :  { %p7603_p10 = pnand %p7601_p9, %p7598_p8 }
  0xa2   :  { %7606 = shalt.err (!%p7603_p10)
}
  0xa3   :  { %s7607_s24 = scalar_lea.vmem %s82_s26, 57344  ;;  %p7612_p12 = scmp.lt.s32.totalorder %s82_s26, %s82_s26 }
  0xa4   :  { %p7608_p11 = scmp.ne.s32.totalorder %s82_s26, %s7607_s24  ;;  %p7613_p13 = scmp.lt.s32.totalorder %s7607_s24, %s7607_s24 }
  0xa6   :  { %p7614_p0 = por %p7613_p13, %p7612_p12 }
  0xa8   :  { %p7615_p1 = pnand %p7614_p0, %p7608_p11 }
  0xaa   :  { %7618 = shalt.err (!%p7615_p1)
}
  0xab   :  { %s7786_s2 = smov 896   ;;  %s7787_s19 = smov 56  }
  0xac   :  { %87 = dma.hbm_to_vmem [thread:$0]  %s8499_s4, 57344, %s82_s26, [#allocation9], %s7786_s2, %s7786_s2, %s7787_s19  }
  0xad   :  { %s7788_s21 = smov [#allocation13]   ;;  %s7789_s20 = smov [#allocation16]  }
  0xae   :  { %s105_s7 = sshll.u32 %s7788_s21, 4  ;;  %s130_s25 = sshll.u32 %s7789_s20, 4  ;;  %s106_s7 = int_to_ptr.vmem [resolvable:$true] %s105_s7  ;;  %s131_s25 = int_to_ptr.vmem [resolvable:$true] %s130_s25 }
  0xaf   :  { %s7619_s14 = scalar_lea.hbm %s8501_s6, 128 }
  0xb0   :  { %p7620_p2 = scmp.ne.s32.totalorder %s8501_s6, %s7619_s14  ;;  %p7623_p3 = scmp.lt.u32.totalorder %s7619_s14, %s8501_s6 }
  0xb2   :  { %p7625_p4 = pnand %p7623_p3, %p7620_p2 }
  0xb4   :  { %7628 = shalt.err (!%p7625_p4)
}
  0xb5   :  { %s7629_s4 = scalar_lea.vmem %s106_s7, 128  ;;  %p7634_p6 = scmp.lt.s32.totalorder %s106_s7, %s106_s7 }
  0xb6   :  { %p7630_p5 = scmp.ne.s32.totalorder %s106_s7, %s7629_s4  ;;  %p7635_p7 = scmp.lt.s32.totalorder %s7629_s4, %s7629_s4 }
  0xb8   :  { %p7636_p8 = por %p7635_p7, %p7634_p6 }
  0xba   :  { %p7637_p9 = pnand %p7636_p8, %p7630_p5 }
  0xbc   :  { %7640 = shalt.err (!%p7637_p9)
}
  0xbd   :  { %111 = dma.hbm_to_vmem [thread:$0]  %s8501_s6, 128, %s106_s7, [#allocation12], %s8523_s3, %s8523_s3, %s8522_s23  }
  0xbe   :  { %s7641_s2 = scalar_lea.hbm %s8503_s8, 128 }
  0xbf   :  { %p7642_p10 = scmp.ne.s32.totalorder %s8503_s8, %s7641_s2  ;;  %p7645_p11 = scmp.lt.u32.totalorder %s7641_s2, %s8503_s8 }
  0xc1   :  { %p7647_p12 = pnand %p7645_p11, %p7642_p10 }
  0xc3   :  { %7650 = shalt.err (!%p7647_p12)
}
  0xc4   :  { %s7651_s20 = scalar_lea.vmem %s131_s25, 128  ;;  %p7656_p0 = scmp.lt.s32.totalorder %s131_s25, %s131_s25 }
  0xc5   :  { %p7652_p13 = scmp.ne.s32.totalorder %s131_s25, %s7651_s20  ;;  %p7657_p1 = scmp.lt.s32.totalorder %s7651_s20, %s7651_s20 }
  0xc7   :  { %p7658_p2 = por %p7657_p1, %p7656_p0 }
  0xc9   :  { %p7659_p3 = pnand %p7658_p2, %p7652_p13 }
  0xcb   :  { %7662 = shalt.err (!%p7659_p3)
}
  0xcc   :  { %133 = dma.hbm_to_vmem [thread:$0]  %s8503_s8, 128, %s131_s25, [#allocation15]  }
  0xcd   :  { %s7790_s3 = smov [#allocation19]   ;;  %s7791_s0 = smov [#allocation22]  }
  0xce   :  { %s150_s7 = sshll.u32 %s7790_s3, 4  ;;  %s178_s22 = sshll.u32 %s7791_s0, 4  ;;  %s151_s7 = int_to_ptr.vmem [resolvable:$true] %s150_s7  ;;  %s179_s22 = int_to_ptr.vmem [resolvable:$true] %s178_s22 }
  0xcf   :  { %s7663_s9 = scalar_lea.hbm %s8505_s10, 128 }
  0xd0   :  { %p7664_p4 = scmp.ne.s32.totalorder %s8505_s10, %s7663_s9  ;;  %p7667_p5 = scmp.lt.u32.totalorder %s7663_s9, %s8505_s10 }
  0xd2   :  { %p7669_p6 = pnand %p7667_p5, %p7664_p4 }
  0xd4   :  { %7672 = shalt.err (!%p7669_p6)
}
  0xd5   :  { %s7673_s8 = scalar_lea.vmem %s151_s7, 128  ;;  %p7678_p8 = scmp.lt.s32.totalorder %s151_s7, %s151_s7 }
  0xd6   :  { %p7674_p7 = scmp.ne.s32.totalorder %s151_s7, %s7673_s8  ;;  %p7679_p9 = scmp.lt.s32.totalorder %s7673_s8, %s7673_s8 }
  0xd8   :  { %p7680_p10 = por %p7679_p9, %p7678_p8 }
  0xda   :  { %p7681_p11 = pnand %p7680_p10, %p7674_p7 }
  0xdc   :  { %7684 = shalt.err (!%p7681_p11)
}
  0xdd   :  { %153 = dma.hbm_to_vmem [thread:$0]  %s8505_s10, 128, %s151_s7, [#allocation18]  }
  0xde   :  { %s7685_s2 = scalar_lea.hbm %s8510_s15, 16 }
  0xdf   :  { %p7686_p12 = scmp.ne.s32.totalorder %s8510_s15, %s7685_s2  ;;  %p7689_p13 = scmp.lt.u32.totalorder %s7685_s2, %s8510_s15 }
  0xe1   :  { %p7691_p0 = pnand %p7689_p13, %p7686_p12 }
  0xe3   :  { %7694 = shalt.err (!%p7691_p0)
}
  0xe4   :  { %s7695_s20 = scalar_lea.vmem %s179_s22, 16  ;;  %s7699_s6 = scalar_lea.vmem %s179_s22, 32 }
  0xe5   :  { %p7696_p1 = scmp.ne.s32.totalorder %s179_s22, %s7695_s20  ;;  %p7700_p2 = scmp.lt.s32.totalorder %s179_s22, %s179_s22 }
  0xe6   :  { %p7701_p3 = scmp.lt.s32.totalorder %s7699_s6, %s7695_s20 }
  0xe8   :  { %p7702_p4 = por %p7701_p3, %p7700_p2 }
  0xea   :  { %p7703_p5 = pnand %p7702_p4, %p7696_p1 }
  0xec   :  { %7706 = shalt.err (!%p7703_p5)
}
  0xed   :  { %181 = dma.hbm_to_vmem [thread:$0]  %s8510_s15, 16, %s179_s22, [#allocation21]  }
  0xee   :  { %7751 = dma.done.wait [#allocation3], 256  }
  0xef   :  { %7752 = vsyncadd [#allocation3], 4294967040 }
  0xf0   :  { %7753 = dma.done.wait [#allocation6], 8448  }
  0xf1   :  { %7754 = vsyncadd [#allocation6], 4294958848 }
  0xf2   :  { %7755 = dma.done.wait [#allocation9], 57408  }
  0xf3   :  { %7756 = vsyncadd [#allocation9], 4294909888 }
  0xf4   :  { %7757 = dma.done.wait [#allocation12], 576  }
  0xf5   :  { %7758 = vsyncadd [#allocation12], 4294966720 }
  0xf6   :  { %7759 = dma.done.wait [#allocation15], 256  }
  0xf7   :  { %7760 = vsyncadd [#allocation15], 4294967040 }
  0xf8   :  { %7761 = dma.done.wait [#allocation18], 256  }
  0xf9   :  { %7762 = vsyncadd [#allocation18], 4294967040 }
  0xfa   :  { %7763 = dma.done.wait [#allocation21], 2064  }
  0xfb   :  { %7764 = vsyncadd [#allocation21], 4294965232  ;;  %v6574_v0 = vld [vmem:[#allocation7 + $0x4] ss:$8 sps:$4 sm:$0xff]   ;;  %v6576_v1 = vld [vmem:[#allocation7] ss:$8 sps:$4 sm:$0xff]  }
  0xfc   :  { %448 = vmatprep.subr.bf16.mxu0 %v6574_v0  ;;  %v6577_v2 = vld [vmem:[#allocation7 + $0x14] ss:$8 sps:$4 sm:$0xff]   ;;  %v6579_v3 = vld [vmem:[#allocation7 + $0x10] ss:$8 sps:$4 sm:$0xff]   ;;  %v6580_v4 = vld [vmem:[#allocation7 + $0x24] ss:$8 sps:$4 sm:$0xff]  }
  0xfd   :  { %449 = vmatpush1.bf16.msra.mxu0 %v6576_v1  ;;  %v6582_v5 = vld [vmem:[#allocation7 + $0x20] ss:$8 sps:$4 sm:$0xff]   ;;  %v6583_v6 = vld [vmem:[#allocation7 + $0x34] ss:$8 sps:$4 sm:$0xff]   ;;  %v6585_v7 = vld [vmem:[#allocation7 + $0x30] ss:$8 sps:$4 sm:$0xff]  }
  0xfe   :  { %450 = vmatprep.subr.bf16.mxu0 %v6577_v2  ;;  %v6586_v8 = vld [vmem:[#allocation7 + $0x44] ss:$8 sps:$4 sm:$0xff]   ;;  %v6588_v9 = vld [vmem:[#allocation7 + $0x40] ss:$8 sps:$4 sm:$0xff]   ;;  %v6589_v10 = vld [vmem:[#allocation7 + $0x54] ss:$8 sps:$4 sm:$0xff]  }
  0xff   :  { %v6591_v11 = vld [vmem:[#allocation7 + $0x50] ss:$8 sps:$4 sm:$0xff]   ;;  %v6592_v12 = vld [vmem:[#allocation7 + $0x64] ss:$8 sps:$4 sm:$0xff]   ;;  %v6594_v15 = vld [vmem:[#allocation7 + $0x60] ss:$8 sps:$4 sm:$0xff]  }
 0x100   :  { %v223_v13 = vld [vmem:[#allocation2 + $0x8] sm:$0xff]  ;;  %v6595_v16 = vld [vmem:[#allocation7 + $0x74] ss:$8 sps:$4 sm:$0xff]   ;;  %v6597_v17 = vld [vmem:[#allocation7 + $0x70] ss:$8 sps:$4 sm:$0xff]   ;;  %vm7793_vm0 = vmmov 0  }
 0x101   :  { %451 = vmatpush1.bf16.msra.mxu0 %v6579_v3  ;;  %v241_v14 = vpack.c.bf16 %v223_v13, %v223_v13  ;;  %v6598_v18 = vld [vmem:[#allocation7 + $0x84] ss:$8 sps:$4 sm:$0xff]   ;;  %v6634_v19 = vld [vmem:[#allocation10 + $0x4] ss:$56 sps:$4 sm:$0xff]   ;;  %v6640_v21 = vld [vmem:[#allocation10 + $0x74] ss:$56 sps:$4 sm:$0xff]  }
 0x102   :  { %452 = vmatprep.subr.bf16.mxu0 %v6580_v4  ;;  %v6639_v20 = vld [vmem:[#allocation10] ss:$56 sps:$4 sm:$0xff]   ;;  %1909 = vmatprep.subr.bf16.mxu1 %v6634_v19  ;;  %v6600_v22 = vld [vmem:[#allocation7 + $0x80] ss:$8 sps:$4 sm:$0xff]   ;;  %v6645_v24 = vld [vmem:[#allocation10 + $0x70] ss:$56 sps:$4 sm:$0xff]  }
 0x103   :  { %480 = vmatprep.mubr.bf16.mxu0 %v241_v14  ;;  %1910 = vmatpush1.bf16.msra.mxu1 %v6639_v20  ;;  %v6601_v23 = vld [vmem:[#allocation7 + $0x94] ss:$8 sps:$4 sm:$0xff]   ;;  %v6646_v25 = vld [vmem:[#allocation10 + $0xe4] ss:$56 sps:$4 sm:$0xff]   ;;  %v6603_v26 = vld [vmem:[#allocation7 + $0x90] ss:$8 sps:$4 sm:$0xff]  }
 0x104   :  { %1911 = vmatprep.subr.bf16.mxu1 %v6640_v21  ;;  %v6604_v27 = vld [vmem:[#allocation7 + $0xa4] ss:$8 sps:$4 sm:$0xff]   ;;  %v6652_v29 = vld [vmem:[#allocation10 + $0x154] ss:$56 sps:$4 sm:$0xff]   ;;  %v6606_v30 = vld [vmem:[#allocation7 + $0xa0] ss:$8 sps:$4 sm:$0xff]  }
 0x105   :  { %453 = vmatpush1.bf16.msra.mxu0 %v6582_v5  ;;  %v6651_v28 = vld [vmem:[#allocation10 + $0xe0] ss:$56 sps:$4 sm:$0xff]   ;;  %v6657_v31 = vld [vmem:[#allocation10 + $0x150] ss:$56 sps:$4 sm:$0xff]   ;;  %v6658_v33 = vld [vmem:[#allocation10 + $0x1c4] ss:$56 sps:$4 sm:$0xff]  }
 0x106   :  { %454 = vmatprep.subr.bf16.mxu0 %v6583_v6  ;;  %v6607_v32 = vld [vmem:[#allocation7 + $0xb4] ss:$8 sps:$4 sm:$0xff]   ;;  %v6609_v34 = vld [vmem:[#allocation7 + $0xb0] ss:$8 sps:$4 sm:$0xff]   ;;  %v6610_v35 = vld [vmem:[#allocation7 + $0xc4] ss:$8 sps:$4 sm:$0xff]  }
 0x107   :  { %1912 = vmatpush1.bf16.msra.mxu1 %v6645_v24  ;;  %v6663_v36 = vld [vmem:[#allocation10 + $0x1c0] ss:$56 sps:$4 sm:$0xff]   ;;  %v6664_v37 = vld [vmem:[#allocation10 + $0x234] ss:$56 sps:$4 sm:$0xff]   ;;  %v6612_v38 = vld [vmem:[#allocation7 + $0xc0] ss:$8 sps:$4 sm:$0xff]  }
 0x108   :  { %1913 = vmatprep.subr.bf16.mxu1 %v6646_v25  ;;  %v6669_v39 = vld [vmem:[#allocation10 + $0x230] ss:$56 sps:$4 sm:$0xff]   ;;  %v6670_v41 = vld [vmem:[#allocation10 + $0x2a4] ss:$56 sps:$4 sm:$0xff]   ;;  %v6615_v42 = vld [vmem:[#allocation7 + $0xd0] ss:$8 sps:$4 sm:$0xff]  }
 0x109   :  { %455 = vmatpush1.bf16.msra.mxu0 %v6585_v7  ;;  %v6613_v40 = vld [vmem:[#allocation7 + $0xd4] ss:$8 sps:$4 sm:$0xff]   ;;  %v6616_v43 = vld [vmem:[#allocation7 + $0xe4] ss:$8 sps:$4 sm:$0xff]   ;;  %v6676_v45 = vld [vmem:[#allocation10 + $0x314] ss:$56 sps:$4 sm:$0xff]  }
 0x10a   :  { %456 = vmatprep.subr.bf16.mxu0 %v6586_v8  ;;  %v6675_v44 = vld [vmem:[#allocation10 + $0x2a0] ss:$56 sps:$4 sm:$0xff]   ;;  %v6618_v46 = vld [vmem:[#allocation7 + $0xe0] ss:$8 sps:$4 sm:$0xff]   ;;  %v6681_v47 = vld [vmem:[#allocation10 + $0x310] ss:$56 sps:$4 sm:$0xff]  }
 0x10b   :  { %1914 = vmatpush1.bf16.msra.mxu1 %v6651_v28  ;;  %v6619_v48 = vld [vmem:[#allocation7 + $0xf4] ss:$8 sps:$4 sm:$0xff]   ;;  %v6682_v49 = vld [vmem:[#allocation10 + $0x384] ss:$56 sps:$4 sm:$0xff]   ;;  %v6621_v50 = vld [vmem:[#allocation7 + $0xf0] ss:$8 sps:$4 sm:$0xff]  }
 0x10c   :  { %1915 = vmatprep.subr.bf16.mxu1 %v6652_v29  ;;  %v222_v51 = vld [vmem:[#allocation2] sm:$0xff]  ;;  %v225_v53 = vld [vmem:[#allocation5 + $0x8] sm:$0xff]  ;;  %v6624_v54 = vld [vmem:[#allocation10 + $0xc] ss:$56 sps:$4 sm:$0xff]   ;;  %vm2266_vm1 = vcmask 1043456   ;;  %vm2250_vm2 = vcmask 64512  }
 0x10d   :  { %457 = vmatpush1.bf16.msra.mxu0 %v6588_v9  ;;  %v6687_v52 = vld [vmem:[#allocation10 + $0x380] ss:$56 sps:$4 sm:$0xff]   ;;  %v6688_v55 = vld [vmem:[#allocation10 + $0x3f4] ss:$56 sps:$4 sm:$0xff]   ;;  %v8066_v56 = vpack.c.bf16 %v225_v53, %v225_v53  ;;  %v240_v57 = vpack.c.bf16 %v222_v51, %v222_v51  ;;  %v6693_v59 = vld [vmem:[#allocation10 + $0x3f0] ss:$56 sps:$4 sm:$0xff]  }
 0x10e   :  { %458 = vmatprep.subr.bf16.mxu0 %v6589_v10  ;;  %v6622_v58 = vld [vmem:[#allocation10 + $0x8] ss:$56 sps:$4 sm:$0xff]   ;;  %v6627_v60 = vld [vmem:[#allocation10 + $0x7c] ss:$56 sps:$4 sm:$0xff]   ;;  %v6625_v62 = vld [vmem:[#allocation10 + $0x78] ss:$56 sps:$4 sm:$0xff]  }
 0x10f   :  { %1916 = vmatpush1.bf16.msra.mxu1 %v6657_v31  ;;  %1941 = vmatprep.mubr.bf16.mxu1 %v8066_v56  ;;  %v6694_v61 = vld [vmem:[#allocation10 + $0x464] ss:$56 sps:$4 sm:$0xff]   ;;  %v6699_v0 = vld [vmem:[#allocation10 + $0x460] ss:$56 sps:$4 sm:$0xff]   ;;  %v6700_v1 = vld [vmem:[#allocation10 + $0x4d4] ss:$56 sps:$4 sm:$0xff]  }
 0x110   :  { %1917 = vmatprep.subr.bf16.mxu1 %v6658_v33  ;;  %v6630_v63 = vld [vmem:[#allocation10 + $0xec] ss:$56 sps:$4 sm:$0xff]   ;;  %v6628_v2 = vld [vmem:[#allocation10 + $0xe8] ss:$56 sps:$4 sm:$0xff]   ;;  %v6633_v3 = vld [vmem:[#allocation10 + $0x15c] ss:$56 sps:$4 sm:$0xff]  }
 0x111   :  { %459 = vmatpush1.bf16.msra.mxu0 %v6591_v11  ;;  %v6705_v4 = vld [vmem:[#allocation10 + $0x4d0] ss:$56 sps:$4 sm:$0xff]   ;;  %v6706_v5 = vld [vmem:[#allocation10 + $0x544] ss:$56 sps:$4 sm:$0xff]   ;;  %v6711_v8 = vld [vmem:[#allocation10 + $0x540] ss:$56 sps:$4 sm:$0xff]  }
 0x112   :  { %460 = vmatprep.subr.bf16.mxu0 %v6592_v12  ;;  %v6631_v6 = vld [vmem:[#allocation10 + $0x158] ss:$56 sps:$4 sm:$0xff]   ;;  %v6638_v7 = vld [vmem:[#allocation10 + $0x1cc] ss:$56 sps:$4 sm:$0xff]   ;;  %v6636_v10 = vld [vmem:[#allocation10 + $0x1c8] ss:$56 sps:$4 sm:$0xff]  }
 0x113   :  { %1918 = vmatpush1.bf16.msra.mxu1 %v6663_v36  ;;  %v6712_v9 = vld [vmem:[#allocation10 + $0x5b4] ss:$56 sps:$4 sm:$0xff]   ;;  %v6717_v12 = vld [vmem:[#allocation10 + $0x5b0] ss:$56 sps:$4 sm:$0xff]   ;;  %v6718_v13 = vld [vmem:[#allocation10 + $0x624] ss:$56 sps:$4 sm:$0xff]  }
 0x114   :  { %1919 = vmatprep.subr.bf16.mxu1 %v6664_v37  ;;  %v6644_v11 = vld [vmem:[#allocation10 + $0x23c] ss:$56 sps:$4 sm:$0xff]   ;;  %v6642_v14 = vld [vmem:[#allocation10 + $0x238] ss:$56 sps:$4 sm:$0xff]   ;;  %v6662_v24 = vld [vmem:[#allocation10 + $0x38c] ss:$56 sps:$4 sm:$0xff]  }
 0x115   :  { %461 = vmatpush1.bf16.msra.mxu0 %v6594_v15  ;;  %v6650_v15 = vld [vmem:[#allocation10 + $0x2ac] ss:$56 sps:$4 sm:$0xff]   ;;  %v6656_v19 = vld [vmem:[#allocation10 + $0x31c] ss:$56 sps:$4 sm:$0xff]   ;;  %v6729_v20 = vld [vmem:[#allocation10 + $0x690] ss:$56 sps:$4 sm:$0xff]  }
 0x116   :  { %462 = vmatprep.subr.bf16.mxu0 %v6595_v16  ;;  %v6723_v16 = vld [vmem:[#allocation10 + $0x620] ss:$56 sps:$4 sm:$0xff]   ;;  %v6732_v21 = vld [vmem:[#allocation10 + $0x14] ss:$56 sps:$4 sm:$0xff]   ;;  %v6730_v25 = vld [vmem:[#allocation10 + $0x10] ss:$56 sps:$4 sm:$0xff]  }
 0x117   :  { %1920 = vmatpush1.bf16.msra.mxu1 %v6669_v39  ;;  %v6660_v28 = vld [vmem:[#allocation10 + $0x388] ss:$56 sps:$4 sm:$0xff]   ;;  %v6668_v29 = vld [vmem:[#allocation10 + $0x3fc] ss:$56 sps:$4 sm:$0xff]   ;;  %v6674_v33 = vld [vmem:[#allocation10 + $0x46c] ss:$56 sps:$4 sm:$0xff]  }
 0x118   :  { %1921 = vmatprep.subr.bf16.mxu1 %v6670_v41  ;;  %v6744_v31 = vld [vmem:[#allocation10 + $0xf4] ss:$56 sps:$4 sm:$0xff]   ;;  %v6672_v36 = vld [vmem:[#allocation10 + $0x468] ss:$56 sps:$4 sm:$0xff]   ;;  %v6774_v51 = vld [vmem:[#allocation10 + $0x324] ss:$56 sps:$4 sm:$0xff]  }
 0x119   :  { %463 = vmatpush1.bf16.msra.mxu0 %v6597_v17  ;;  %v6724_v17 = vld [vmem:[#allocation10 + $0x694] ss:$56 sps:$4 sm:$0xff]  }
 0x11a   :  { %464 = vmatprep.subr.bf16.mxu0 %v6598_v18  ;;  %v6648_v18 = vld [vmem:[#allocation10 + $0x2a8] ss:$56 sps:$4 sm:$0xff]   ;;  %v6680_v37 = vld [vmem:[#allocation10 + $0x4dc] ss:$56 sps:$4 sm:$0xff]   ;;  %v6686_v41 = vld [vmem:[#allocation10 + $0x54c] ss:$56 sps:$4 sm:$0xff]  }
 0x11b   :  { %1922 = vmatpush1.bf16.msra.mxu1 %v6675_v44  ;;  %v6756_v39 = vld [vmem:[#allocation10 + $0x1d4] ss:$56 sps:$4 sm:$0xff]   ;;  %v6684_v44 = vld [vmem:[#allocation10 + $0x548] ss:$56 sps:$4 sm:$0xff]  }
 0x11c   :  { %1923 = vmatprep.subr.bf16.mxu1 %v6676_v45  ;;  %v6692_v45 = vld [vmem:[#allocation10 + $0x5bc] ss:$56 sps:$4 sm:$0xff]  }
 0x11d   :  { %465 = vmatpush1.bf16.msra.mxu0 %v6600_v22  ;;  %v224_v22 = vld [vmem:[#allocation5] sm:$0xff]  ;;  %v6704_v53 = vld [vmem:[#allocation10 + $0x69c] ss:$56 sps:$4 sm:$0xff]  }
 0x11e   :  { %466 = vmatprep.subr.bf16.mxu0 %v6601_v23  ;;  %v6654_v23 = vld [vmem:[#allocation10 + $0x318] ss:$56 sps:$4 sm:$0xff]  }
 0x11f   :  { %1924 = vmatpush1.bf16.msra.mxu1 %v6681_v47  ;;  %v6768_v47 = vld [vmem:[#allocation10 + $0x2b4] ss:$56 sps:$4 sm:$0xff]  }
 0x120   :  { %1925 = vmatprep.subr.bf16.mxu1 %v6682_v49  ;;  %v6698_v49 = vld [vmem:[#allocation10 + $0x62c] ss:$56 sps:$4 sm:$0xff]  }
 0x121   :  { %467 = vmatpush1.bf16.msra.mxu0 %v6603_v26  ;;  %v8070_v26 = vpack.c.bf16 %v224_v22, %v224_v22  ;;  %v6753_v22 = vld [vmem:[#allocation10 + $0x32c] ss:$56 sps:$4 sm:$0xff]  }
 0x122   :  { %468 = vmatprep.subr.bf16.mxu0 %v6604_v27  ;;  %v6738_v27 = vld [vmem:[#allocation10 + $0x84] ss:$56 sps:$4 sm:$0xff]  }
 0x123   :  { %1926 = vmatpush1.bf16.msra.mxu1 %v6687_v52  ;;  %v6696_v52 = vld [vmem:[#allocation10 + $0x628] ss:$56 sps:$4 sm:$0xff]  }
 0x124   :  { %1927 = vmatprep.subr.bf16.mxu1 %v6688_v55  ;;  %v6780_v55 = vld [vmem:[#allocation10 + $0x394] ss:$56 sps:$4 sm:$0xff]  }
 0x125   :  { %469 = vmatpush1.bf16.msra.mxu0 %v6606_v30  ;;  %v6736_v30 = vld [vmem:[#allocation10 + $0x80] ss:$56 sps:$4 sm:$0xff]  }
 0x126   :  { %470 = vmatprep.subr.bf16.mxu0 %v6607_v32  ;;  %v6666_v32 = vld [vmem:[#allocation10 + $0x3f8] ss:$56 sps:$4 sm:$0xff]  }
 0x127   :  { %1928 = vmatpush1.bf16.msra.mxu1 %v6693_v59  ;;  %v6778_v59 = vld [vmem:[#allocation10 + $0x390] ss:$56 sps:$4 sm:$0xff]  }
 0x128   :  { %1929 = vmatprep.subr.bf16.mxu1 %v6694_v61  ;;  %v6708_v61 = vld [vmem:[#allocation10 + $0x18] ss:$56 sps:$4 sm:$0xff]  }
 0x129   :  { %471 = vmatpush1.bf16.msra.mxu0 %v6609_v34  ;;  %v6742_v34 = vld [vmem:[#allocation10 + $0xf0] ss:$56 sps:$4 sm:$0xff]  }
 0x12a   :  { %472 = vmatprep.subr.bf16.mxu0 %v6610_v35  ;;  %v6750_v35 = vld [vmem:[#allocation10 + $0x164] ss:$56 sps:$4 sm:$0xff]  }
 0x12b   :  { %1930 = vmatpush1.bf16.msra.mxu1 %v6699_v0  ;;  %v6792_v0 = vld [vmem:[#allocation10 + $0x474] ss:$56 sps:$4 sm:$0xff]  }
 0x12c   :  { %1931 = vmatprep.subr.bf16.mxu1 %v6700_v1  ;;  %v6714_v1 = vld [vmem:[#allocation10 + $0x88] ss:$56 sps:$4 sm:$0xff]  }
 0x12d   :  { %473 = vmatpush1.bf16.msra.mxu0 %v6612_v38  ;;  %v6748_v38 = vld [vmem:[#allocation10 + $0x160] ss:$56 sps:$4 sm:$0xff]  }
 0x12e   :  { %474 = vmatprep.subr.bf16.mxu0 %v6613_v40  ;;  %v6678_v40 = vld [vmem:[#allocation10 + $0x4d8] ss:$56 sps:$4 sm:$0xff]  }
 0x12f   :  { %1932 = vmatpush1.bf16.msra.mxu1 %v6705_v4  ;;  %v6798_v4 = vld [vmem:[#allocation10 + $0x4e4] ss:$56 sps:$4 sm:$0xff]  }
 0x130   :  { %1933 = vmatprep.subr.bf16.mxu1 %v6706_v5  ;;  %v6720_v5 = vld [vmem:[#allocation10 + $0xf8] ss:$56 sps:$4 sm:$0xff]  }
 0x131   :  { %475 = vmatpush1.bf16.msra.mxu0 %v6615_v42  ;;  %v6754_v42 = vld [vmem:[#allocation10 + $0x1d0] ss:$56 sps:$4 sm:$0xff]  }
 0x132   :  { %476 = vmatprep.subr.bf16.mxu0 %v6616_v43  ;;  %v6762_v43 = vld [vmem:[#allocation10 + $0x244] ss:$56 sps:$4 sm:$0xff]  }
 0x133   :  { %1934 = vmatpush1.bf16.msra.mxu1 %v6711_v8  ;;  %v6804_v8 = vld [vmem:[#allocation10 + $0x554] ss:$56 sps:$4 sm:$0xff]  }
 0x134   :  { %1935 = vmatprep.subr.bf16.mxu1 %v6712_v9  ;;  %v6726_v9 = vld [vmem:[#allocation10 + $0x168] ss:$56 sps:$4 sm:$0xff]  }
 0x135   :  { %477 = vmatpush1.bf16.msra.mxu0 %v6618_v46  ;;  %v6760_v46 = vld [vmem:[#allocation10 + $0x240] ss:$56 sps:$4 sm:$0xff]  }
 0x136   :  { %478 = vmatprep.subr.bf16.mxu0 %v6619_v48  ;;  %v6690_v48 = vld [vmem:[#allocation10 + $0x5b8] ss:$56 sps:$4 sm:$0xff]  }
 0x137   :  { %1936 = vmatpush1.bf16.msra.mxu1 %v6717_v12  ;;  %v6810_v12 = vld [vmem:[#allocation10 + $0x5c4] ss:$56 sps:$4 sm:$0xff]  }
 0x138   :  { %1937 = vmatprep.subr.bf16.mxu1 %v6718_v13  ;;  %v6733_v13 = vld [vmem:[#allocation10 + $0x1d8] ss:$56 sps:$4 sm:$0xff]  }
 0x139   :  { %479 = vmatpush1.bf16.msra.mxu0 %v6621_v50  ;;  %v6766_v50 = vld [vmem:[#allocation10 + $0x2b0] ss:$56 sps:$4 sm:$0xff]  }
 0x13a   :  { %1950 = vmatprep.subr.bf16.mxu0 %v6624_v54  ;;  %v6772_v54 = vld [vmem:[#allocation10 + $0x320] ss:$56 sps:$4 sm:$0xff]  }
 0x13b   :  { %1938 = vmatpush1.bf16.msra.mxu1 %v6723_v16  ;;  %v6816_v16 = vld [vmem:[#allocation10 + $0x634] ss:$56 sps:$4 sm:$0xff]  }
 0x13c   :  { %481 = vmatmul.mubr.bf16.vlgmr.msra.gmra.mrb[0].mxu0 %v240_v57  ;;  %1939 = vmatprep.subr.bf16.mxu1 %v6724_v17  ;;  %v6702_v57 = vld [vmem:[#allocation10 + $0x698] ss:$56 sps:$4 sm:$0xff]   ;;  %v6739_v17 = vld [vmem:[#allocation10 + $0x248] ss:$56 sps:$4 sm:$0xff]  }
 0x13d   :  { %1951 = vmatpush1.bf16.msra.mxu0 %v6622_v58  ;;  %1982 = vmatprep.mubr.bf16.mxu0 %v8066_v56  ;;  %v6710_v58 = vld [vmem:[#allocation10 + $0x1c] ss:$56 sps:$4 sm:$0xff]  }
 0x13e   :  { %1952 = vmatprep.subr.bf16.mxu0 %v6627_v60  ;;  %v6786_v60 = vld [vmem:[#allocation10 + $0x404] ss:$56 sps:$4 sm:$0xff]  }
 0x13f   :  { %1940 = vmatpush1.bf16.msra.mxu1 %v6729_v20  ;;  %v6822_v20 = vld [vmem:[#allocation10 + $0x6a4] ss:$56 sps:$4 sm:$0xff]  }
 0x140   :  { %1991 = vmatprep.subr.bf16.mxu1 %v6732_v21  ;;  %v6745_v21 = vld [vmem:[#allocation10 + $0x2b8] ss:$56 sps:$4 sm:$0xff]  }
 0x141   :  { %1953 = vmatpush1.bf16.msra.mxu0 %v6625_v62  ;;  %v6716_v62 = vld [vmem:[#allocation10 + $0x8c] ss:$56 sps:$4 sm:$0xff]  }
 0x142   :  { %1954 = vmatprep.subr.bf16.mxu0 %v6630_v63  ;;  %1942 = vmatmul.mubr.bf16.vlgmr.msra.gmra.mrb[0].mxu1 %v8070_v26  ;;  %v6784_v63 = vld [vmem:[#allocation10 + $0x400] ss:$56 sps:$4 sm:$0xff]  }
 0x143   :  { %1992 = vmatpush1.bf16.msra.mxu1 %v6730_v25  ;;  %2023 = vmatprep.mubr.bf16.mxu1 %v8066_v56  ;;  %v6751_v25 = vld [vmem:[#allocation10 + $0x328] ss:$56 sps:$4 sm:$0xff]  }
 0x144   :  { %1993 = vmatprep.subr.bf16.mxu1 %v6738_v27  ;;  %v6759_v27 = vld [vmem:[#allocation10 + $0x39c] ss:$56 sps:$4 sm:$0xff]  }
 0x145   :  { %1955 = vmatpush1.bf16.msra.mxu0 %v6628_v2  ;;  %v6722_v2 = vld [vmem:[#allocation10 + $0xfc] ss:$56 sps:$4 sm:$0xff]  }
 0x146   :  { %1956 = vmatprep.subr.bf16.mxu0 %v6633_v3  ;;  %v6790_v3 = vld [vmem:[#allocation10 + $0x470] ss:$56 sps:$4 sm:$0xff]  }
 0x147   :  { %1994 = vmatpush1.bf16.msra.mxu1 %v6736_v30  ;;  %v6757_v30 = vld [vmem:[#allocation10 + $0x398] ss:$56 sps:$4 sm:$0xff]  }
 0x148   :  { %1995 = vmatprep.subr.bf16.mxu1 %v6744_v31  ;;  %v6765_v31 = vld [vmem:[#allocation10 + $0x40c] ss:$56 sps:$4 sm:$0xff]  }
 0x149   :  { %1957 = vmatpush1.bf16.msra.mxu0 %v6631_v6  ;;  %v6728_v6 = vld [vmem:[#allocation10 + $0x16c] ss:$56 sps:$4 sm:$0xff]  }
 0x14a   :  { %1958 = vmatprep.subr.bf16.mxu0 %v6638_v7  ;;  %v6796_v7 = vld [vmem:[#allocation10 + $0x4e0] ss:$56 sps:$4 sm:$0xff]  }
 0x14b   :  { %1996 = vmatpush1.bf16.msra.mxu1 %v6742_v34  ;;  %v6763_v34 = vld [vmem:[#allocation10 + $0x408] ss:$56 sps:$4 sm:$0xff]  }
 0x14c   :  { %1997 = vmatprep.subr.bf16.mxu1 %v6750_v35  ;;  %v6771_v35 = vld [vmem:[#allocation10 + $0x47c] ss:$56 sps:$4 sm:$0xff]  }
 0x14d   :  { %1959 = vmatpush1.bf16.msra.mxu0 %v6636_v10  ;;  %v6735_v10 = vld [vmem:[#allocation10 + $0x1dc] ss:$56 sps:$4 sm:$0xff]  }
 0x14e   :  { %1960 = vmatprep.subr.bf16.mxu0 %v6644_v11  ;;  %v6802_v11 = vld [vmem:[#allocation10 + $0x550] ss:$56 sps:$4 sm:$0xff]  }
 0x14f   :  { %1998 = vmatpush1.bf16.msra.mxu1 %v6748_v38  ;;  %v6769_v38 = vld [vmem:[#allocation10 + $0x478] ss:$56 sps:$4 sm:$0xff]  }
 0x150   :  { %1999 = vmatprep.subr.bf16.mxu1 %v6756_v39  ;;  %v6777_v39 = vld [vmem:[#allocation10 + $0x4ec] ss:$56 sps:$4 sm:$0xff]  }
 0x151   :  { %1961 = vmatpush1.bf16.msra.mxu0 %v6642_v14  ;;  %v6741_v14 = vld [vmem:[#allocation10 + $0x24c] ss:$56 sps:$4 sm:$0xff]  }
 0x152   :  { %1962 = vmatprep.subr.bf16.mxu0 %v6650_v15  ;;  %v6808_v15 = vld [vmem:[#allocation10 + $0x5c0] ss:$56 sps:$4 sm:$0xff]  }
 0x153   :  { %2000 = vmatpush1.bf16.msra.mxu1 %v6754_v42  ;;  %v6775_v42 = vld [vmem:[#allocation10 + $0x4e8] ss:$56 sps:$4 sm:$0xff]  }
 0x154   :  { %2001 = vmatprep.subr.bf16.mxu1 %v6762_v43  ;;  %v6850_v43 = vld [vmem:[#allocation10 + $0x1e0] ss:$56 sps:$4 sm:$0xff]  }
 0x155   :  { %1963 = vmatpush1.bf16.msra.mxu0 %v6648_v18  ;;  %v6747_v18 = vld [vmem:[#allocation10 + $0x2bc] ss:$56 sps:$4 sm:$0xff]  }
 0x156   :  { %1964 = vmatprep.subr.bf16.mxu0 %v6656_v19  ;;  %v6814_v19 = vld [vmem:[#allocation10 + $0x630] ss:$56 sps:$4 sm:$0xff]  }
 0x157   :  { %2002 = vmatpush1.bf16.msra.mxu1 %v6760_v46  ;;  %v6781_v46 = vld [vmem:[#allocation10 + $0x558] ss:$56 sps:$4 sm:$0xff]  }
 0x158   :  { %2003 = vmatprep.subr.bf16.mxu1 %v6768_v47  ;;  %v6856_v47 = vld [vmem:[#allocation10 + $0x250] ss:$56 sps:$4 sm:$0xff]  }
 0x159   :  { %1965 = vmatpush1.bf16.msra.mxu0 %v6654_v23  ;;  %v6820_v23 = vld [vmem:[#allocation10 + $0x6a0] ss:$56 sps:$4 sm:$0xff]  }
 0x15a   :  { %1966 = vmatprep.subr.bf16.mxu0 %v6662_v24  ;;  %v6828_v24 = vld [vmem:[#allocation10 + $0x24] ss:$56 sps:$4 sm:$0xff]  }
 0x15b   :  { %2004 = vmatpush1.bf16.msra.mxu1 %v6766_v50  ;;  %v6787_v50 = vld [vmem:[#allocation10 + $0x5c8] ss:$56 sps:$4 sm:$0xff]  }
 0x15c   :  { %2005 = vmatprep.subr.bf16.mxu1 %v6774_v51  ;;  %v6862_v51 = vld [vmem:[#allocation10 + $0x2c0] ss:$56 sps:$4 sm:$0xff]  }
 0x15d   :  { %1967 = vmatpush1.bf16.msra.mxu0 %v6660_v28  ;;  %v6826_v28 = vld [vmem:[#allocation10 + $0x20] ss:$56 sps:$4 sm:$0xff]  }
 0x15e   :  { %1968 = vmatprep.subr.bf16.mxu0 %v6668_v29  ;;  %v6834_v29 = vld [vmem:[#allocation10 + $0x94] ss:$56 sps:$4 sm:$0xff]  }
 0x15f   :  { %2006 = vmatpush1.bf16.msra.mxu1 %v6772_v54  ;;  %v6793_v54 = vld [vmem:[#allocation10 + $0x638] ss:$56 sps:$4 sm:$0xff]  }
 0x160   :  { %2007 = vmatprep.subr.bf16.mxu1 %v6780_v55  ;;  %v6868_v55 = vld [vmem:[#allocation10 + $0x330] ss:$56 sps:$4 sm:$0xff]  }
 0x161   :  { %1969 = vmatpush1.bf16.msra.mxu0 %v6666_v32  ;;  %v6832_v32 = vld [vmem:[#allocation10 + $0x90] ss:$56 sps:$4 sm:$0xff]  }
 0x162   :  { %1970 = vmatprep.subr.bf16.mxu0 %v6674_v33  ;;  %v6840_v33 = vld [vmem:[#allocation10 + $0x104] ss:$56 sps:$4 sm:$0xff]  }
 0x163   :  { %2008 = vmatpush1.bf16.msra.mxu1 %v6778_v59  ;;  %v6799_v59 = vld [vmem:[#allocation10 + $0x6a8] ss:$56 sps:$4 sm:$0xff]  }
 0x164   :  { %2009 = vmatprep.subr.bf16.mxu1 %v6786_v60  ;;  %v6874_v60 = vld [vmem:[#allocation10 + $0x3a0] ss:$56 sps:$4 sm:$0xff]  }
 0x165   :  { %1971 = vmatpush1.bf16.msra.mxu0 %v6672_v36  ;;  %v6838_v36 = vld [vmem:[#allocation10 + $0x100] ss:$56 sps:$4 sm:$0xff]  }
 0x166   :  { %1972 = vmatprep.subr.bf16.mxu0 %v6680_v37  ;;  %v6846_v37 = vld [vmem:[#allocation10 + $0x174] ss:$56 sps:$4 sm:$0xff]  }
 0x167   :  { %2010 = vmatpush1.bf16.msra.mxu1 %v6784_v63  ;;  %v6805_v63 = vld [vmem:[#allocation10 + $0x28] ss:$56 sps:$4 sm:$0xff]  }
 0x168   :  { %2011 = vmatprep.subr.bf16.mxu1 %v6792_v0  ;;  %v6880_v0 = vld [vmem:[#allocation10 + $0x410] ss:$56 sps:$4 sm:$0xff]  }
 0x169   :  { %1973 = vmatpush1.bf16.msra.mxu0 %v6678_v40  ;;  %v6844_v40 = vld [vmem:[#allocation10 + $0x170] ss:$56 sps:$4 sm:$0xff]  }
 0x16a   :  { %1974 = vmatprep.subr.bf16.mxu0 %v6686_v41  ;;  %v6852_v41 = vld [vmem:[#allocation10 + $0x1e4] ss:$56 sps:$4 sm:$0xff]  }
 0x16b   :  { %2012 = vmatpush1.bf16.msra.mxu1 %v6790_v3  ;;  %v6811_v3 = vld [vmem:[#allocation10 + $0x98] ss:$56 sps:$4 sm:$0xff]  }
 0x16c   :  { %2013 = vmatprep.subr.bf16.mxu1 %v6798_v4  ;;  %v6886_v4 = vld [vmem:[#allocation10 + $0x480] ss:$56 sps:$4 sm:$0xff]  }
 0x16d   :  { %1975 = vmatpush1.bf16.msra.mxu0 %v6684_v44  ;;  %v6783_v44 = vld [vmem:[#allocation10 + $0x55c] ss:$56 sps:$4 sm:$0xff]  }
 0x16e   :  { %1976 = vmatprep.subr.bf16.mxu0 %v6692_v45  ;;  %v6858_v45 = vld [vmem:[#allocation10 + $0x254] ss:$56 sps:$4 sm:$0xff]  }
 0x16f   :  { %2014 = vmatpush1.bf16.msra.mxu1 %v6796_v7  ;;  %v6817_v7 = vld [vmem:[#allocation10 + $0x108] ss:$56 sps:$4 sm:$0xff]  }
 0x170   :  { %2015 = vmatprep.subr.bf16.mxu1 %v6804_v8  ;;  %v6892_v8 = vld [vmem:[#allocation10 + $0x4f0] ss:$56 sps:$4 sm:$0xff]  }
 0x171   :  { %1977 = vmatpush1.bf16.msra.mxu0 %v6690_v48  ;;  %v6789_v48 = vld [vmem:[#allocation10 + $0x5cc] ss:$56 sps:$4 sm:$0xff]  }
 0x172   :  { %1978 = vmatprep.subr.bf16.mxu0 %v6698_v49  ;;  %v6864_v49 = vld [vmem:[#allocation10 + $0x2c4] ss:$56 sps:$4 sm:$0xff]  }
 0x173   :  { %2016 = vmatpush1.bf16.msra.mxu1 %v6802_v11  ;;  %v6823_v11 = vld [vmem:[#allocation10 + $0x178] ss:$56 sps:$4 sm:$0xff]  }
 0x174   :  { %2017 = vmatprep.subr.bf16.mxu1 %v6810_v12  ;;  %v6898_v12 = vld [vmem:[#allocation10 + $0x560] ss:$56 sps:$4 sm:$0xff]  }
 0x175   :  { %1979 = vmatpush1.bf16.msra.mxu0 %v6696_v52  ;;  %v6795_v52 = vld [vmem:[#allocation10 + $0x63c] ss:$56 sps:$4 sm:$0xff]  }
 0x176   :  { %1980 = vmatprep.subr.bf16.mxu0 %v6704_v53  ;;  %v6870_v53 = vld [vmem:[#allocation10 + $0x334] ss:$56 sps:$4 sm:$0xff]  }
 0x177   :  { %2018 = vmatpush1.bf16.msra.mxu1 %v6808_v15  ;;  %v6829_v15 = vld [vmem:[#allocation10 + $0x1e8] ss:$56 sps:$4 sm:$0xff]  }
 0x178   :  { %2019 = vmatprep.subr.bf16.mxu1 %v6816_v16  ;;  %v6901_v16 = vld [vmem:[#allocation10 + $0x5d0] ss:$56 sps:$4 sm:$0xff]  }
 0x179   :  { %1981 = vmatpush1.bf16.msra.mxu0 %v6702_v57  ;;  %v6801_v57 = vld [vmem:[#allocation10 + $0x6ac] ss:$56 sps:$4 sm:$0xff]  }
 0x17a   :  { %2032 = vmatprep.subr.bf16.mxu0 %v6710_v58  ;;  %v6876_v58 = vld [vmem:[#allocation10 + $0x3a4] ss:$56 sps:$4 sm:$0xff]  }
 0x17b   :  { %2020 = vmatpush1.bf16.msra.mxu1 %v6814_v19  ;;  %v6835_v19 = vld [vmem:[#allocation10 + $0x258] ss:$56 sps:$4 sm:$0xff]  }
 0x17c   :  { %1983 = vmatmul.mubr.bf16.vlgmr.msra.gmra.mrb[4].mxu0 %v8070_v26  ;;  %2021 = vmatprep.subr.bf16.mxu1 %v6822_v20  ;;  %v6904_v20 = vld [vmem:[#allocation10 + $0x640] ss:$56 sps:$4 sm:$0xff]  }
 0x17d   :  { %2033 = vmatpush1.bf16.msra.mxu0 %v6708_v61  ;;  %2064 = vmatprep.mubr.bf16.mxu0 %v8066_v56  ;;  %v6807_v61 = vld [vmem:[#allocation10 + $0x2c] ss:$56 sps:$4 sm:$0xff]  }
 0x17e   :  { %2034 = vmatprep.subr.bf16.mxu0 %v6716_v62  ;;  %v6882_v62 = vld [vmem:[#allocation10 + $0x414] ss:$56 sps:$4 sm:$0xff]  }
 0x17f   :  { %2022 = vmatpush1.bf16.msra.mxu1 %v6820_v23  ;;  %v6841_v23 = vld [vmem:[#allocation10 + $0x2c8] ss:$56 sps:$4 sm:$0xff]  }
 0x180   :  { %2073 = vmatprep.subr.bf16.mxu1 %v6828_v24  ;;  %v6907_v24 = vld [vmem:[#allocation10 + $0x6b0] ss:$56 sps:$4 sm:$0xff]  }
 0x181   :  { %2035 = vmatpush1.bf16.msra.mxu0 %v6714_v1  ;;  %v6813_v1 = vld [vmem:[#allocation10 + $0x9c] ss:$56 sps:$4 sm:$0xff]  }
 0x182   :  { %2036 = vmatprep.subr.bf16.mxu0 %v6722_v2  ;;  %2024 = vmatmul.mubr.bf16.vlgmr.msra.gmra.mrb[4].mxu1 %v8070_v26  ;;  %v6888_v2 = vld [vmem:[#allocation10 + $0x484] ss:$56 sps:$4 sm:$0xff]  }
 0x183   :  { %2074 = vmatpush1.bf16.msra.mxu1 %v6826_v28  ;;  %2105 = vmatprep.mubr.bf16.mxu1 %v8066_v56  ;;  %v6847_v28 = vld [vmem:[#allocation10 + $0x338] ss:$56 sps:$4 sm:$0xff]  }
 0x184   :  { %2075 = vmatprep.subr.bf16.mxu1 %v6834_v29  ;;  %v6910_v29 = vld [vmem:[#allocation10 + $0x30] ss:$56 sps:$4 sm:$0xff]  }
 0x185   :  { %2037 = vmatpush1.bf16.msra.mxu0 %v6720_v5  ;;  %v6819_v5 = vld [vmem:[#allocation10 + $0x10c] ss:$56 sps:$4 sm:$0xff]  }
 0x186   :  { %2038 = vmatprep.subr.bf16.mxu0 %v6728_v6  ;;  %v6894_v6 = vld [vmem:[#allocation10 + $0x4f4] ss:$56 sps:$4 sm:$0xff]  }
 0x187   :  { %2076 = vmatpush1.bf16.msra.mxu1 %v6832_v32  ;;  %v6853_v32 = vld [vmem:[#allocation10 + $0x3a8] ss:$56 sps:$4 sm:$0xff]  }
 0x188   :  { %2077 = vmatprep.subr.bf16.mxu1 %v6840_v33  ;;  %v6913_v33 = vld [vmem:[#allocation10 + $0xa0] ss:$56 sps:$4 sm:$0xff]  }
 0x189   :  { %2039 = vmatpush1.bf16.msra.mxu0 %v6726_v9  ;;  %v6825_v9 = vld [vmem:[#allocation10 + $0x17c] ss:$56 sps:$4 sm:$0xff]  }
 0x18a   :  { %2040 = vmatprep.subr.bf16.mxu0 %v6735_v10  ;;  %v6900_v10 = vld [vmem:[#allocation10 + $0x564] ss:$56 sps:$4 sm:$0xff]  }
 0x18b   :  { %2078 = vmatpush1.bf16.msra.mxu1 %v6838_v36  ;;  %v6859_v36 = vld [vmem:[#allocation10 + $0x418] ss:$56 sps:$4 sm:$0xff]  }
 0x18c   :  { %2079 = vmatprep.subr.bf16.mxu1 %v6846_v37  ;;  %v6916_v37 = vld [vmem:[#allocation10 + $0x110] ss:$56 sps:$4 sm:$0xff]  }
 0x18d   :  { %2041 = vmatpush1.bf16.msra.mxu0 %v6733_v13  ;;  %v6831_v13 = vld [vmem:[#allocation10 + $0x1ec] ss:$56 sps:$4 sm:$0xff]  }
 0x18e   :  { %2042 = vmatprep.subr.bf16.mxu0 %v6741_v14  ;;  %v6903_v14 = vld [vmem:[#allocation10 + $0x5d4] ss:$56 sps:$4 sm:$0xff]  }
 0x18f   :  { %2080 = vmatpush1.bf16.msra.mxu1 %v6844_v40  ;;  %v6865_v40 = vld [vmem:[#allocation10 + $0x488] ss:$56 sps:$4 sm:$0xff]  }
 0x190   :  { %2081 = vmatprep.subr.bf16.mxu1 %v6852_v41  ;;  %v6919_v41 = vld [vmem:[#allocation10 + $0x180] ss:$56 sps:$4 sm:$0xff]  }
 0x191   :  { %2043 = vmatpush1.bf16.msra.mxu0 %v6739_v17  ;;  %v6837_v17 = vld [vmem:[#allocation10 + $0x25c] ss:$56 sps:$4 sm:$0xff]  }
 0x192   :  { %2044 = vmatprep.subr.bf16.mxu0 %v6747_v18  ;;  %v6906_v18 = vld [vmem:[#allocation10 + $0x644] ss:$56 sps:$4 sm:$0xff]  }
 0x193   :  { %2082 = vmatpush1.bf16.msra.mxu1 %v6850_v43  ;;  %v6924_v43 = vld [vmem:[#allocation10 + $0x1f4] ss:$56 sps:$4 sm:$0xff]  }
 0x194   :  { %2083 = vmatprep.subr.bf16.mxu1 %v6858_v45  ;;  %v6922_v45 = vld [vmem:[#allocation10 + $0x1f0] ss:$56 sps:$4 sm:$0xff]  }
 0x195   :  { %2045 = vmatpush1.bf16.msra.mxu0 %v6745_v21  ;;  %v6843_v21 = vld [vmem:[#allocation10 + $0x2cc] ss:$56 sps:$4 sm:$0xff]  }
 0x196   :  { %2046 = vmatprep.subr.bf16.mxu0 %v6753_v22  ;;  %v6909_v22 = vld [vmem:[#allocation10 + $0x6b4] ss:$56 sps:$4 sm:$0xff]  }
 0x197   :  { %2084 = vmatpush1.bf16.msra.mxu1 %v6856_v47  ;;  %v6927_v47 = vld [vmem:[#allocation10 + $0x264] ss:$56 sps:$4 sm:$0xff]  }
 0x198   :  { %2085 = vmatprep.subr.bf16.mxu1 %v6864_v49  ;;  %v6885_v49 = vld [vmem:[#allocation10 + $0x5dc] ss:$56 sps:$4 sm:$0xff]  }
 0x199   :  { %2047 = vmatpush1.bf16.msra.mxu0 %v6751_v25  ;;  %v6849_v25 = vld [vmem:[#allocation10 + $0x33c] ss:$56 sps:$4 sm:$0xff]  }
 0x19a   :  { %2048 = vmatprep.subr.bf16.mxu0 %v6759_v27  ;;  %v6912_v27 = vld [vmem:[#allocation10 + $0x34] ss:$56 sps:$4 sm:$0xff]  }
 0x19b   :  { %2086 = vmatpush1.bf16.msra.mxu1 %v6862_v51  ;;  %v6883_v51 = vld [vmem:[#allocation10 + $0x5d8] ss:$56 sps:$4 sm:$0xff]  }
 0x19c   :  { %2087 = vmatprep.subr.bf16.mxu1 %v6870_v53  ;;  %v6891_v53 = vld [vmem:[#allocation10 + $0x64c] ss:$56 sps:$4 sm:$0xff]  }
 0x19d   :  { %2049 = vmatpush1.bf16.msra.mxu0 %v6757_v30  ;;  %v6855_v30 = vld [vmem:[#allocation10 + $0x3ac] ss:$56 sps:$4 sm:$0xff]  }
 0x19e   :  { %2050 = vmatprep.subr.bf16.mxu0 %v6765_v31  ;;  %v6915_v31 = vld [vmem:[#allocation10 + $0xa4] ss:$56 sps:$4 sm:$0xff]  }
 0x19f   :  { %2088 = vmatpush1.bf16.msra.mxu1 %v6868_v55  ;;  %v6889_v55 = vld [vmem:[#allocation10 + $0x648] ss:$56 sps:$4 sm:$0xff]  }
 0x1a0   :  { %2089 = vmatprep.subr.bf16.mxu1 %v6876_v58  ;;  %v6897_v58 = vld [vmem:[#allocation10 + $0x6bc] ss:$56 sps:$4 sm:$0xff]  }
 0x1a1   :  { %2051 = vmatpush1.bf16.msra.mxu0 %v6763_v34  ;;  %v6861_v34 = vld [vmem:[#allocation10 + $0x41c] ss:$56 sps:$4 sm:$0xff]  }
 0x1a2   :  { %2052 = vmatprep.subr.bf16.mxu0 %v6771_v35  ;;  %v6918_v35 = vld [vmem:[#allocation10 + $0x114] ss:$56 sps:$4 sm:$0xff]  }
 0x1a3   :  { %2090 = vmatpush1.bf16.msra.mxu1 %v6874_v60  ;;  %v6895_v60 = vld [vmem:[#allocation10 + $0x6b8] ss:$56 sps:$4 sm:$0xff]  }
 0x1a4   :  { %2091 = vmatprep.subr.bf16.mxu1 %v6882_v62  ;;  %v6939_v62 = vld [vmem:[#allocation10 + $0x424] ss:$56 sps:$4 sm:$0xff]  }
 0x1a5   :  { %2053 = vmatpush1.bf16.msra.mxu0 %v6769_v38  ;;  %v6867_v38 = vld [vmem:[#allocation10 + $0x48c] ss:$56 sps:$4 sm:$0xff]  }
 0x1a6   :  { %2054 = vmatprep.subr.bf16.mxu0 %v6777_v39  ;;  %v6921_v39 = vld [vmem:[#allocation10 + $0x184] ss:$56 sps:$4 sm:$0xff]  }
 0x1a7   :  { %2092 = vmatpush1.bf16.msra.mxu1 %v6880_v0  ;;  %v6937_v0 = vld [vmem:[#allocation10 + $0x420] ss:$56 sps:$4 sm:$0xff]  }
 0x1a8   :  { %2093 = vmatprep.subr.bf16.mxu1 %v6888_v2  ;;  %v7792_v2 = vmov 0.0  }
 0x1a9   :  { %2055 = vmatpush1.bf16.msra.mxu0 %v6775_v42  ;;  %v6873_v42 = vld [vmem:[#allocation10 + $0x4fc] ss:$56 sps:$4 sm:$0xff]  }
 0x1aa   :  { %2056 = vmatprep.subr.bf16.mxu0 %v6783_v44  ;;  %v6871_v44 = vld [vmem:[#allocation10 + $0x4f8] ss:$56 sps:$4 sm:$0xff]  }
 0x1ab   :  { %2094 = vmatpush1.bf16.msra.mxu1 %v6886_v4  ;;  %v6940_v4 = vld [vmem:[#allocation10 + $0x490] ss:$56 sps:$4 sm:$0xff]  }
 0x1ac   :  { %2095 = vmatprep.subr.bf16.mxu1 %v6894_v6  ;;  %v6943_v6 = vld [vmem:[#allocation10 + $0x500] ss:$56 sps:$4 sm:$0xff]  }
 0x1ad   :  { %2057 = vmatpush1.bf16.msra.mxu0 %v6781_v46  ;;  %v6879_v46 = vld [vmem:[#allocation10 + $0x56c] ss:$56 sps:$4 sm:$0xff]  }
 0x1ae   :  { %2058 = vmatprep.subr.bf16.mxu0 %v6789_v48  ;;  %v6925_v48 = vld [vmem:[#allocation10 + $0x260] ss:$56 sps:$4 sm:$0xff]  }
 0x1af   :  { %2096 = vmatpush1.bf16.msra.mxu1 %v6892_v8  ;;  %v6946_v8 = vld [vmem:[#allocation10 + $0x570] ss:$56 sps:$4 sm:$0xff]  }
 0x1b0   :  { %2097 = vmatprep.subr.bf16.mxu1 %v6900_v10 }
 0x1b1   :  { %2059 = vmatpush1.bf16.msra.mxu0 %v6787_v50  ;;  %v6930_v50 = vld [vmem:[#allocation10 + $0x2d4] ss:$56 sps:$4 sm:$0xff]  }
 0x1b2   :  { %2060 = vmatprep.subr.bf16.mxu0 %v6795_v52  ;;  %v6928_v52 = vld [vmem:[#allocation10 + $0x2d0] ss:$56 sps:$4 sm:$0xff]  }
 0x1b3   :  { %2098 = vmatpush1.bf16.msra.mxu1 %v6898_v12  ;;  %v276_v12 = vld [vmem:[#allocation8] sm:$0x3] }
 0x1b4   :  { %2099 = vmatprep.subr.bf16.mxu1 %v6903_v14 }
 0x1b5   :  { %2061 = vmatpush1.bf16.msra.mxu0 %v6793_v54  ;;  %v6933_v54 = vld [vmem:[#allocation10 + $0x344] ss:$56 sps:$4 sm:$0xff]  }
 0x1b6   :  { %2062 = vmatprep.subr.bf16.mxu0 %v6801_v57  ;;  %v6931_v57 = vld [vmem:[#allocation10 + $0x340] ss:$56 sps:$4 sm:$0xff]  }
 0x1b7   :  { %2100 = vmatpush1.bf16.msra.mxu1 %v6901_v16  ;;  %v6957_v16 = vld [vmem:[#allocation10 + $0x6c4] ss:$56 sps:$4 sm:$0xff]  }
 0x1b8   :  { %2101 = vmatprep.subr.bf16.mxu1 %v6906_v18 }
 0x1b9   :  { %2063 = vmatpush1.bf16.msra.mxu0 %v6799_v59  ;;  %v6936_v59 = vld [vmem:[#allocation10 + $0x3b4] ss:$56 sps:$4 sm:$0xff]  }
 0x1ba   :  { %2114 = vmatprep.subr.bf16.mxu0 %v6807_v61  ;;  %v6934_v61 = vld [vmem:[#allocation10 + $0x3b0] ss:$56 sps:$4 sm:$0xff]  }
 0x1bb   :  { %2102 = vmatpush1.bf16.msra.mxu1 %v6904_v20 }
 0x1bc   :  { %2065 = vmatmul.mubr.bf16.vlgmr.msra.gmra.mrb[8].mxu0 %v8070_v26  ;;  %2103 = vmatprep.subr.bf16.mxu1 %v6909_v22 }
 0x1bd   :  { %2115 = vmatpush1.bf16.msra.mxu0 %v6805_v63  ;;  %2146 = vmatprep.mubr.bf16.mxu0 %v8066_v56  ;;  %v278_v63 = vlaneseq }
 0x1be   :  { %2116 = vmatprep.subr.bf16.mxu0 %v6813_v1  ;;  %v6942_v1 = vld [vmem:[#allocation10 + $0x494] ss:$56 sps:$4 sm:$0xff]  }
 0x1bf   :  { %2104 = vmatpush1.bf16.msra.mxu1 %v6907_v24 }
 0x1c0   :  { %2155 = vmatprep.subr.bf16.mxu1 %v6912_v27 }
 0x1c1   :  { %2117 = vmatpush1.bf16.msra.mxu0 %v6811_v3  ;;  %v8083_v3 = vshrl.u32 %v278_v63, 7 }
 0x1c2   :  { %2118 = vmatprep.subr.bf16.mxu0 %v6819_v5  ;;  %2106 = vmatmul.mubr.bf16.vlgmr.msra.gmra.mrb[8].mxu1 %v8070_v26  ;;  %v6945_v5 = vld [vmem:[#allocation10 + $0x504] ss:$56 sps:$4 sm:$0xff]  }
 0x1c3   :  { %2156 = vmatpush1.bf16.msra.mxu1 %v6910_v29  ;;  %2187 = vmatprep.mubr.bf16.mxu1 %v8066_v56  ;;  %v6877_v56 = vld [vmem:[#allocation10 + $0x568] ss:$56 sps:$4 sm:$0xff]   ;;  %v8089_v10 = vsub.s32 1, %v8083_v3 }
 0x1c4   :  { %2157 = vmatprep.subr.bf16.mxu1 %v6915_v31  ;;  %v8101_v29 = vld [vmem:[#allocation11] sm:$0xff]  ;;  %v8106_v31 = vsub.s32 0, %v8083_v3 }
 0x1c5   :  { %2119 = vmatpush1.bf16.msra.mxu0 %v6817_v7  ;;  %v6948_v7 = vld [vmem:[#allocation10 + $0x574] ss:$56 sps:$4 sm:$0xff]   ;;  %v285_v14 = vrot.slane %v276_v12, %v8089_v10 }
 0x1c6   :  { %2120 = vmatprep.subr.bf16.mxu0 %v6825_v9  ;;  %v6951_v9 = vld [vmem:[#allocation10 + $0x5e4] ss:$56 sps:$4 sm:$0xff]  }
 0x1c7   :  { %2158 = vmatpush1.bf16.msra.mxu1 %v6913_v33 }
 0x1c8   :  { %2159 = vmatprep.subr.bf16.mxu1 %v6918_v35 }
 0x1c9   :  { %2121 = vmatpush1.bf16.msra.mxu0 %v6823_v11  ;;  %v6949_v11 = vld [vmem:[#allocation10 + $0x5e0] ss:$56 sps:$4 sm:$0xff]  }
 0x1ca   :  { %2122 = vmatprep.subr.bf16.mxu0 %v6831_v13  ;;  %v6954_v13 = vld [vmem:[#allocation10 + $0x654] ss:$56 sps:$4 sm:$0xff]  }
 0x1cb   :  { %2160 = vmatpush1.bf16.msra.mxu1 %v6916_v37 }
 0x1cc   :  { %2161 = vmatprep.subr.bf16.mxu1 %v6921_v39 }
 0x1cd   :  { %2123 = vmatpush1.bf16.msra.mxu0 %v6829_v15  ;;  %v6952_v15 = vld [vmem:[#allocation10 + $0x650] ss:$56 sps:$4 sm:$0xff]  }
 0x1ce   :  { %2124 = vmatprep.subr.bf16.mxu0 %v6837_v17 }
 0x1cf   :  { %2162 = vmatpush1.bf16.msra.mxu1 %v6919_v41 }
 0x1d0   :  { %2163 = vmatprep.subr.bf16.mxu1 %v6924_v43 }
 0x1d1   :  { %2125 = vmatpush1.bf16.msra.mxu0 %v6835_v19 }
 0x1d2   :  { %2126 = vmatprep.subr.bf16.mxu0 %v6843_v21  ;;  %v6955_v21 = vld [vmem:[#allocation10 + $0x6c0] ss:$56 sps:$4 sm:$0xff]  }
 0x1d3   :  { %2164 = vmatpush1.bf16.msra.mxu1 %v6922_v45 }
 0x1d4   :  { %2165 = vmatprep.subr.bf16.mxu1 %v6927_v47 }
 0x1d5   :  { %2127 = vmatpush1.bf16.msra.mxu0 %v6841_v23 }
 0x1d6   :  { %2128 = vmatprep.subr.bf16.mxu0 %v6849_v25 }
 0x1d7   :  { %2166 = vmatpush1.bf16.msra.mxu1 %v6925_v48  ;;  %v745_v48 = vsub.s32 6, %v8083_v3 }
 0x1d8   :  { %2167 = vmatprep.subr.bf16.mxu1 %v6930_v50  ;;  %v749_v50 = vsub.s32 7, %v8083_v3 }
 0x1d9   :  { %2129 = vmatpush1.bf16.msra.mxu0 %v6847_v28  ;;  %v8099_v28 = vsub.s32 2, %v8083_v3 }
 0x1da   :  { %2130 = vmatprep.subr.bf16.mxu0 %v6855_v30 }
 0x1db   :  { %2168 = vmatpush1.bf16.msra.mxu1 %v6928_v52  ;;  %v730_v30 = vrot.slane %v8101_v29, %v8099_v28 }
 0x1dc   :  { %2169 = vmatprep.subr.bf16.mxu1 %v6933_v54 }
 0x1dd   :  { %2131 = vmatpush1.bf16.msra.mxu0 %v6853_v32 }
 0x1de   :  { %2132 = vmatprep.subr.bf16.mxu0 %v6861_v34  ;;  %v281_v34 = vrot.slane %v276_v12, %v8106_v31  ;;  %v8150_v12 = vsub.s32 3, %v8083_v3 }
 0x1df   :  { %2170 = vmatpush1.bf16.msra.mxu1 %v6931_v57 }
 0x1e0   :  { %2171 = vmatprep.subr.bf16.mxu1 %v6936_v59 }
 0x1e1   :  { %2133 = vmatpush1.bf16.msra.mxu0 %v6859_v36 }
 0x1e2   :  { %2134 = vmatprep.subr.bf16.mxu0 %v6867_v38 }
 0x1e3   :  { %2172 = vmatpush1.bf16.msra.mxu1 %v6934_v61 }
 0x1e4   :  { %2173 = vmatprep.subr.bf16.mxu1 %v6939_v62 }
 0x1e5   :  { %2135 = vmatpush1.bf16.msra.mxu0 %v6865_v40  ;;  %v8115_v40 = vsub.s32 4, %v8083_v3 }
 0x1e6   :  { %2136 = vmatprep.subr.bf16.mxu0 %v6873_v42 }
 0x1e7   :  { %2174 = vmatpush1.bf16.msra.mxu1 %v6937_v0  ;;  %v738_v41 = vrot.slane %v8101_v29, %v8115_v40  ;;  %v726_v0 = vrot.slane %v8101_v29, %v8089_v10 }
 0x1e8   :  { %2175 = vmatprep.subr.bf16.mxu1 %v6942_v1 }
 0x1e9   :  { %2137 = vmatpush1.bf16.msra.mxu0 %v6871_v44 }
 0x1ea   :  { %2138 = vmatprep.subr.bf16.mxu0 %v6879_v46 }
 0x1eb   :  { %2176 = vmatpush1.bf16.msra.mxu1 %v6940_v4 }
 0x1ec   :  { %2177 = vmatprep.subr.bf16.mxu1 %v6945_v5 }
 0x1ed   :  { %2139 = vmatpush1.bf16.msra.mxu0 %v6877_v56 }
 0x1ee   :  { %2140 = vmatprep.subr.bf16.mxu0 %v6885_v49  ;;  %v746_v49 = vrot.slane %v8101_v29, %v745_v48 }
 0x1ef   :  { %2178 = vmatpush1.bf16.msra.mxu1 %v6943_v6 }
 0x1f0   :  { %2179 = vmatprep.subr.bf16.mxu1 %v6948_v7 }
 0x1f1   :  { %2141 = vmatpush1.bf16.msra.mxu0 %v6883_v51 }
 0x1f2   :  { %2142 = vmatprep.subr.bf16.mxu0 %v6891_v53  ;;  %v750_v53 = vrot.slane %v8101_v29, %v749_v50 }
 0x1f3   :  { %2180 = vmatpush1.bf16.msra.mxu1 %v6946_v8 }
 0x1f4   :  { %2181 = vmatprep.subr.bf16.mxu1 %v6951_v9  ;;  %v8145_v9 = vld [vmem:[#allocation11 + $0x8] sm:$0x3f] }
 0x1f5   :  { %2143 = vmatpush1.bf16.msra.mxu0 %v6889_v55  ;;  %v722_v55 = vrot.slane %v8101_v29, %v8106_v31 }
 0x1f6   :  { %2144 = vmatprep.subr.bf16.mxu0 %v6897_v58 }
 0x1f7   :  { %2182 = vmatpush1.bf16.msra.mxu1 %v6949_v11  ;;  %v762_v11 = vrot.slane %v8145_v9, %v8099_v28 }
 0x1f8   :  { %2183 = vmatprep.subr.bf16.mxu1 %v6954_v13 }
 0x1f9   :  { %2145 = vmatpush1.bf16.msra.mxu0 %v6895_v60 }
 0x1fa   :  { %6424 = vmatprep.subr.bf16.mxu0 %v7792_v2 }
 0x1fb   :  { %2184 = vmatpush1.bf16.msra.mxu1 %v6952_v15  ;;  %v766_v15 = vrot.slane %v8145_v9, %v8150_v12 }
 0x1fc   :  { %2147 = vmatmul.mubr.bf16.vlgmr.msra.gmra.mrb[12].mxu0 %v8070_v26  ;;  %2185 = vmatprep.subr.bf16.mxu1 %v6957_v16 }
 0x1fd   :  { %6426 = vmatprep.mubr.msk.bf16.mxu0 %vm7793_vm0, %v7792_v2 }
 0x1ff   :  { %2186 = vmatpush1.bf16.msra.mxu1 %v6955_v21 }
 0x200   :  { %6400 = vmatprep.subr.bf16.mxu1 %v7792_v2 }
 0x202   :  { %2188 = vmatmul.mubr.bf16.vlgmr.msra.gmra.mrb[12].mxu1 %v8070_v26 }
 0x203   :  { %6402 = vmatprep.mubr.msk.bf16.mxu1 %vm7793_vm0, %v7792_v2 }
 0x20f   :  { %v482_v17 = vpop.f32.mrb[0].mxu0 }
 0x210   :  { %v484_v18 = vpop.f32.mrb[1].mxu0  ;;  %v483_v38 = vadd.f32 %v482_v17, %v281_v34 }
 0x211   :  { %v8092_v19 = vadd.f32 %v484_v18, %v285_v14  ;;  %v486_v20 = vpop.f32.mrb[2].mxu0 }
 0x212   :  { %v487_v22 = vpop.f32.mrb[3].mxu0  ;;  %v489_v39 = vpack.c.bf16 %v483_v38, %v483_v38 }
 0x215   :  { %v1943_v23 = vpop.f32.mrb[0].mxu1 }
 0x216   :  { %v1945_v24 = vpop.f32.mrb[1].mxu1  ;;  %v1944_v61 = vadd.f32 %v1943_v23, %v722_v55 }
 0x217   :  { %v1947_v25 = vpop.f32.mrb[2].mxu1  ;;  %v1946_v1 = vadd.f32 %v1945_v24, %v726_v0 }
 0x218   :  { %v1948_v27 = vpop.f32.mrb[3].mxu1  ;;  %v2196_v63 = vpack.c.bf16 %v1944_v61, %v1944_v61 }
 0x219   :  { %v2197_v4 = vpack.c.bf16 %v1946_v1, %v1946_v1  ;;  %v230_v1 = vld [vmem:[#allocation19] sm:$0xff] }
 0x24f   :  { %v1984_v32 = vpop.f32.mrb[4].mxu0 }
 0x250   :  { %v1985_v26 = vadd.f32 %v1984_v32, %v730_v30  ;;  %v8108_v33 = vpop.f32.mrb[5].mxu0  ;;  %v8161_v30 = vld [vmem:[#allocation16] sm:$0xff] }
 0x251   :  { %v1988_v35 = vpop.f32.mrb[6].mxu0 }
 0x252   :  { %v2198_v36 = vpack.c.bf16 %v1985_v26, %v1985_v26  ;;  %v1989_v37 = vpop.f32.mrb[7].mxu0 }
 0x254   :  { %6401 = vmatpush3.bf16.xpose.msra.mxu1 %v2198_v36 }
 0x255   :  { %6406 = vmatprep.subr.bf16.mxu1 %v7792_v2  ;;  %v2025_v42 = vpop.f32.mrb[4].mxu1 }
 0x256   :  { %v2026_v43 = vadd.f32 %v2025_v42, %v738_v41  ;;  %v8119_v44 = vpop.f32.mrb[5].mxu1 }
 0x257   :  { %v2029_v45 = vpop.f32.mrb[6].mxu1 }
 0x258   :  { %v2200_v46 = vpack.c.bf16 %v2026_v43, %v2026_v43  ;;  %v2030_v47 = vpop.f32.mrb[7].mxu1 }
 0x25a   :  { %v2268_v56 = vsel %vm2266_vm1, %v2200_v46, 0 }
 0x25b   :  { %6403 = vmatmul.mubr.bf16.vlgmr.msra.gmra.mrb[16].mxu1 %v489_v39 }
 0x25c   :  { %6408 = vmatprep.mubr.msk.bf16.mxu1 %vm7793_vm0, %v7792_v2  ;;  %6407 = vmatpush3.bf16.msra.mxu1 %v2268_v56 }
 0x25d   :  { %6412 = vmatprep.subr.bf16.mxu1 %v7792_v2 }
 0x28f   :  { %v2066_v51 = vpop.f32.mrb[8].mxu0 }
 0x290   :  { %v2067_v52 = vadd.f32 %v2066_v51, %v746_v49  ;;  %v2068_v54 = vpop.f32.mrb[9].mxu0 }
 0x291   :  { %v2070_v57 = vpop.f32.mrb[10].mxu0  ;;  %v2069_v60 = vadd.f32 %v2068_v54, %v750_v53 }
 0x292   :  { %v2202_v58 = vpack.c.bf16 %v2067_v52, %v2067_v52  ;;  %v2071_v59 = vpop.f32.mrb[11].mxu0 }
 0x293   :  { %v2203_v62 = vpack.c.bf16 %v2069_v60, %v2069_v60 }
 0x294   :  { %6425 = vmatpush3.bf16.xpose.msra.mxu0 %v2202_v58 }
 0x295   :  { %6436 = vmatprep.subr.bf16.mxu0 %v7792_v2  ;;  %v8141_v5 = vpop.f32.mrb[8].mxu1 }
 0x296   :  { %v8143_v6 = vpop.f32.mrb[9].mxu1 }
 0x297   :  { %v2111_v7 = vpop.f32.mrb[10].mxu1 }
 0x298   :  { %v2112_v8 = vpop.f32.mrb[11].mxu1 }
 0x29b   :  { %6427 = vmatmul.mubr.bf16.vlgmr.msra.gmra.mrb[16].mxu0 %v2196_v63 }
 0x29c   :  { %6437 = vmatpush3.bf16.xpose.msra.mxu0 %v2203_v62  ;;  %6438 = vmatprep.mubr.msk.bf16.mxu0 %vm7793_vm0, %v7792_v2  ;;  %v228_v62 = vld [vmem:[#allocation17] sm:$0xff] }
 0x29d   :  { %6448 = vmatprep.subr.bf16.mxu0 %v7792_v2 }
 0x2a3   :  { %6439 = vmatmul.mubr.bf16.vlgmr.msra.gmra.mrb[20].mxu0 %v2197_v4 }
 0x2a4   :  { %6450 = vmatprep.mubr.msk.bf16.mxu0 %vm7793_vm0, %v7792_v2 }
 0x2cf   :  { %v2148_v13 = vpop.f32.mrb[12].mxu0 }
 0x2d0   :  { %v2149_v14 = vadd.f32 %v2148_v13, %v762_v11  ;;  %v2150_v16 = vpop.f32.mrb[13].mxu0  ;;  %v734_v13 = vrot.slane %v8101_v29, %v8150_v12 }
 0x2d1   :  { %v2152_v17 = vpop.f32.mrb[14].mxu0  ;;  %v2151_v21 = vadd.f32 %v2150_v16, %v766_v15 }
 0x2d2   :  { %v2206_v18 = vpack.c.bf16 %v2149_v14, %v2149_v14  ;;  %v2153_v20 = vpop.f32.mrb[15].mxu0  ;;  %v8171_v14 = vsub.s32 5, %v8083_v3  ;;  %v1987_v16 = vadd.f32 %v8108_v33, %v734_v13  ;;  %v490_v33 = vpack.c.bf16 %v8092_v19, %v8092_v19 }
 0x2d3   :  { %v2207_v22 = vpack.c.bf16 %v2151_v21, %v2151_v21 }
 0x2d4   :  { %6449 = vmatpush3.bf16.xpose.msra.mxu0 %v2206_v18  ;;  %v742_v17 = vrot.slane %v8101_v29, %v8171_v14  ;;  %v2199_v21 = vpack.c.bf16 %v1987_v16, %v1987_v16  ;;  %v227_v16 = vld [vmem:[%s8506_s11] sm:$0xff]  ;;  %s7795_s11 = smov [#allocation23]  }
 0x2d5   :  { %6460 = vmatprep.subr.bf16.mxu0 %v7792_v2  ;;  %v8157_v23 = vpop.f32.mrb[12].mxu1 }
 0x2d6   :  { %v8159_v24 = vpop.f32.mrb[13].mxu1 }
 0x2d7   :  { %v2193_v25 = vpop.f32.mrb[14].mxu1 }
 0x2d8   :  { %v2194_v27 = vpop.f32.mrb[15].mxu1 }
 0x2db   :  { %6451 = vmatmul.mubr.bf16.vlgmr.msra.gmra.mrb[24].mxu0 %v2196_v63 }
 0x2dc   :  { %6461 = vmatpush3.bf16.xpose.msra.mxu0 %v2207_v22  ;;  %6462 = vmatprep.mubr.msk.bf16.mxu0 %vm7793_vm0, %v7792_v2  ;;  %v2028_v22 = vadd.f32 %v8119_v44, %v742_v17  ;;  %v229_v17 = vld [vmem:[%s8507_s12] sm:$0xff]  ;;  %s5760_s12 = sshll.u32 %s7795_s11, 4  ;;  %s5761_s12 = int_to_ptr.vmem [resolvable:$true] %s5760_s12 }
 0x2dd   :  { %s7707_s9 = scalar_lea.vmem %s5761_s12, 128  ;;  %p7712_p7 = scmp.lt.s32.totalorder %s5761_s12, %s5761_s12 }
 0x2de   :  { %v2201_v25 = vpack.c.bf16 %v2028_v22, %v2028_v22  ;;  %p7708_p6 = scmp.ne.s32.totalorder %s5761_s12, %s7707_s9  ;;  %p7713_p8 = scmp.lt.s32.totalorder %s7707_s9, %s7707_s9 }
 0x2e0   :  { %v2366_v27 = vsel %vm2266_vm1, %v2201_v25, 0  ;;  %p7714_p9 = por %p7713_p8, %p7712_p7 }
 0x2e2   :  { %p7715_p10 = pnand %p7714_p9, %p7708_p6 }
 0x2e3   :  { %6463 = vmatmul.mubr.bf16.vlgmr.msra.gmra.mrb[28].mxu0 %v2197_v4 }
 0x32e   :  { %v2244_v32 = vpop.f32.mrb[16].mxu1 }
 0x32f   :  { %v2245_v26 = vadd.f32 %v2244_v32, %v8161_v30  ;;  %v6404_v34 = vpop.f32.mrb[17].mxu1 }
 0x330   :  { %v2247_v35 = vpop.f32.mrb[18].mxu1 }
 0x331   :  { %v6405_v36 = vpop.f32.mrb[19].mxu1  ;;  %v2251_v37 = vsel %vm2250_vm2, %v2245_v26, -inf }
 0x332   :  { %2252 = vmax.xlane.f32.xlu0 %v2251_v37 }
 0x36e   :  { %v2449_v38 = vpop.f32.mrb[16].mxu0 }
 0x36f   :  { %v6428_v39 = vpop.f32.mrb[17].mxu0  ;;  %v2450_v19 = vadd.f32 %v2449_v38, %v228_v62 }
 0x370   :  { %v2452_v41 = vpop.f32.mrb[18].mxu0 }
 0x371   :  { %v6429_v42 = vpop.f32.mrb[19].mxu0 }
 0x376   :  { %v2547_v43 = vpop.f32.mrb[20].mxu0 }
 0x377   :  { %v6440_v45 = vpop.f32.mrb[21].mxu0  ;;  %v2548_v63 = vadd.f32 %v2547_v43, %v228_v62  ;;  %v2455_v43 = vsel %vm2250_vm2, %v2450_v19, -inf }
 0x378   :  { %v2550_v46 = vpop.f32.mrb[22].mxu0 }
 0x379   :  { %v6441_v47 = vpop.f32.mrb[23].mxu0  ;;  %v2553_v7 = vsel %vm2250_vm2, %v2548_v63, -inf  ;;  %v7794_v46 = vmov 0  }
 0x37a   :  { %6572 = vset.pattern.permute.xlu0 %v7794_v46  ;;  %6573 = vset.pattern.permute.xlu1 %v7794_v46 }
 0x3ae   :  { %v2652_v56 = vpop.f32.mrb[24].mxu0 }
 0x3af   :  { %v6452_v49 = vpop.f32.mrb[25].mxu0  ;;  %v2653_v42 = vadd.f32 %v2652_v56, %v230_v1 }
 0x3b0   :  { %v2655_v51 = vpop.f32.mrb[26].mxu0 }
 0x3b1   :  { %v6453_v52 = vpop.f32.mrb[27].mxu0  ;;  %v2658_v45 = vsel %vm2250_vm2, %v2653_v42, -inf }
 0x3b6   :  { %v2750_v53 = vpop.f32.mrb[28].mxu0 }
 0x3b7   :  { %v6464_v54 = vpop.f32.mrb[29].mxu0  ;;  %v2751_v4 = vadd.f32 %v2750_v53, %v230_v1 }
 0x3b8   :  { %v2753_v55 = vpop.f32.mrb[30].mxu0 }
 0x3b9   :  { %v6465_v57 = vpop.f32.mrb[31].mxu0  ;;  %v2756_v8 = vsel %vm2250_vm2, %v2751_v4, -inf }
 0x3bf   :  { %v2253_v58 = vpop.xlane.xlu0 %2252 }
 0x3c0   :  { %v2254_v59 = vsub.f32 %v2245_v26, %v2253_v58 }
 0x3c2   :  { %v2255_v60 = vmul.f32 1.442695, %v2254_v59 }
 0x3c4   :  { %7358 = vpow2.f32 %v2255_v60 }
 0x3ce   :  { %v7359_v61 = vpop.eup %7358 }
 0x3cf   :  { %v2257_v0 = vsel %vm2250_vm2, %v7359_v61, 0.0 }
 0x3d0   :  { %2258 = vadd.xlane.f32.xlu0 %v2257_v0 }
 0x3d4   :  { %2554 = vmax.xlane.f32.xlu0 %v2553_v7 }
 0x3d8   :  { %2757 = vmax.xlane.f32.xlu0 %v2756_v8 }
 0x45d   :  { %v2259_v11 = vpop.xlane.xlu0 %2258 }
 0x45e   :  { %7360 = vrcp.f32 %v2259_v11 }
 0x461   :  { %v2555_v47 = vpop.xlane.xlu0 %2554 }
 0x462   :  { %v2556_v49 = vsub.f32 %v2548_v63, %v2555_v47 }
 0x464   :  { %v2557_v38 = vmul.f32 1.442695, %v2556_v49 }
 0x468   :  { %v7361_v15 = vpop.eup %7360 }
 0x469   :  { %v2261_v18 = vmul.f32 %v7361_v15, %v7359_v61 }
 0x46b   :  { %v2262_v20 = vpack.c.bf16 %v2261_v18, %v2261_v18  ;;  %v231_v18 = vld [vmem:[%s8508_s13] sm:$0xff]  ;;  %s7796_s13 = smov [#allocation24]  }
 0x46c   :  { %s5770_s1 = sshll.u32 %s7796_s13, 4  ;;  %s5771_s1 = int_to_ptr.vmem [resolvable:$true] %s5770_s1 }
 0x46d   :  { %6409 = vmatmul.mubr.msk.bf16.vlgmr.msra.gmra.mrb[20].mxu1 %vm2250_vm2, %v2262_v20 }
 0x46e   :  { %6413 = vmatpush3.bf16.xpose.msra.mxu1 %v2199_v21  ;;  %6414 = vmatprep.mubr.msk.bf16.mxu1 %vm7793_vm0, %v7792_v2  ;;  %v754_v21 = vrot.slane %v8145_v9, %v8106_v31 }
 0x46f   :  { %6418 = vmatprep.subr.bf16.mxu1 %v7792_v2 }
 0x470   :  { %v2108_v25 = vadd.f32 %v8141_v5, %v754_v21 }
 0x475   :  { %6415 = vmatmul.mubr.bf16.vlgmr.msra.gmra.mrb[24].mxu1 %v490_v33 }
 0x476   :  { %6419 = vmatpush3.bf16.msra.mxu1 %v2366_v27  ;;  %6420 = vmatprep.mubr.msk.bf16.mxu1 %vm7793_vm0, %v7792_v2 }
 0x477   :  { %6430 = vmatprep.subr.bf16.mxu1 %v7792_v2 }
 0x540   :  { %v8187_v29 = vpop.f32.mrb[20].mxu1 }
 0x541   :  { %v6410_v44 = vpop.f32.mrb[21].mxu1 }
 0x542   :  { %v2307_v32 = vpop.f32.mrb[22].mxu1  ;;  %v2204_v44 = vpack.c.bf16 %v2108_v25, %v2108_v25 }
 0x543   :  { %v6411_v26 = vpop.f32.mrb[23].mxu1  ;;  %v758_v32 = vrot.slane %v8145_v9, %v8089_v10 }
 0x548   :  { %v2344_v34 = vpop.f32.mrb[24].mxu1 }
 0x549   :  { %v2345_v35 = vadd.f32 %v2344_v34, %v8161_v30  ;;  %v6416_v36 = vpop.f32.mrb[25].mxu1  ;;  %v2758_v30 = vpop.xlane.xlu0 %2757 }
 0x54a   :  { %v2347_v37 = vpop.f32.mrb[26].mxu1  ;;  %v2759_v53 = vsub.f32 %v2751_v4, %v2758_v30  ;;  %v2471_v36 = vsel %vm2266_vm1, %v2204_v44, 0  ;;  %v774_v30 = vrot.slane %v8145_v9, %v8171_v14 }
 0x54b   :  { %v6417_v39 = vpop.f32.mrb[27].mxu1  ;;  %v2350_v41 = vsel %vm2250_vm2, %v2345_v35, -inf  ;;  %v2110_v37 = vadd.f32 %v8143_v6, %v758_v32 }
 0x54c   :  { %2351 = vmax.xlane.f32.xlu1 %v2350_v41  ;;  %v2760_v57 = vmul.f32 1.442695, %v2759_v53  ;;  %v770_v41 = vrot.slane %v8145_v9, %v8115_v40 }
 0x54d   :  { %v2205_v39 = vpack.c.bf16 %v2110_v37, %v2110_v37 }
 0x54e   :  { %v2190_v6 = vadd.f32 %v8157_v23, %v770_v41  ;;  %v2192_v23 = vadd.f32 %v8159_v24, %v774_v30 }
 0x550   :  { %2456 = vmax.xlane.f32.xlu1 %v2455_v43  ;;  %v2208_v49 = vpack.c.bf16 %v2190_v6, %v2190_v6  ;;  %v7416_v6 = vld [vmem:[#allocation5] sm:$0xff] }
 0x554   :  { %2659 = vmax.xlane.f32.xlu1 %v2658_v45  ;;  %v2569_v45 = vsel %vm2266_vm1, %v2205_v39, 0 }
 0x5d9   :  { %v2352_v51 = vpop.xlane.xlu1 %2351 }
 0x5da   :  { %v2353_v52 = vsub.f32 %v2345_v35, %v2352_v51 }
 0x5dc   :  { %v2354_v54 = vmul.f32 1.442695, %v2353_v52 }
 0x5dd   :  { %v2457_v55 = vpop.xlane.xlu1 %2456 }
 0x5de   :  { %7362 = vpow2.f32 %v2354_v54  ;;  %v2458_v56 = vsub.f32 %v2450_v19, %v2457_v55  ;;  %v2209_v54 = vpack.c.bf16 %v2192_v23, %v2192_v23  ;;  %v6961_v23 = vld [vmem:[#allocation7 + $0x110] ss:$8 sps:$4 sm:$0xff]  }
 0x5df   :  { %7364 = vpow2.f32 %v2557_v38  ;;  %v2674_v38 = vsel %vm2266_vm1, %v2208_v49, 0 }
 0x5e0   :  { %v2459_v58 = vmul.f32 1.442695, %v2458_v56  ;;  %v2772_v9 = vsel %vm2266_vm1, %v2209_v54, 0  ;;  %v6988_v54 = vld [vmem:[#allocation10 + $0x700] ss:$56 sps:$4 sm:$0xff]  }
 0x5e1   :  { %v2660_v59 = vpop.xlane.xlu1 %2659 }
 0x5e2   :  { %7366 = vpow2.f32 %v2459_v58  ;;  %v2661_v60 = vsub.f32 %v2653_v42, %v2660_v59 }
 0x5e3   :  { %7368 = vpow2.f32 %v2760_v57 }
 0x5e4   :  { %v2662_v61 = vmul.f32 1.442695, %v2661_v60 }
 0x5e6   :  { %7370 = vpow2.f32 %v2662_v61 }
 0x5e8   :  { %v7363_v62 = vpop.eup %7362 }
 0x5e9   :  { %v2356_v63 = vsel %vm2250_vm2, %v7363_v62, 0.0  ;;  %v7365_v0 = vpop.eup %7364 }
 0x5ea   :  { %2357 = vadd.xlane.f32.xlu1 %v2356_v63  ;;  %v2559_v4 = vsel %vm2250_vm2, %v7365_v0, 0.0 }
 0x5ec   :  { %v7367_v1 = vpop.eup %7366 }
 0x5ed   :  { %v2461_v7 = vsel %vm2250_vm2, %v7367_v1, 0.0  ;;  %v8196_v8 = vpop.eup %7368 }
 0x5ee   :  { %2560 = vadd.xlane.f32.xlu1 %v2559_v4  ;;  %2462 = vadd.xlane.f32.xlu0 %v2461_v7  ;;  %v2762_v13 = vsel %vm2250_vm2, %v8196_v8, 0.0  ;;  %v7415_v7 = vld [vmem:[#allocation2] sm:$0xff] }
 0x5f0   :  { %v7371_v11 = vpop.eup %7370 }
 0x5f1   :  { %v2664_v15 = vsel %vm2250_vm2, %v7371_v11, 0.0 }
 0x5f2   :  { %2763 = vadd.xlane.f32.xlu1 %v2762_v13  ;;  %2665 = vadd.xlane.f32.xlu0 %v2664_v15 }
 0x603   :  { %2613 = vperm.xlu1 %6573, %v229_v17  }
 0x607   :  { %2816 = vperm.xlu1 %6573, %v231_v18  }
 0x608   :  { %2410 = vperm.xlu0 %6572, %v227_v16  }
 0x677   :  { %v2358_v20 = vpop.xlane.xlu1 %2357 }
 0x678   :  { %7372 = vrcp.f32 %v2358_v20 }
 0x67b   :  { %v2463_v22 = vpop.xlane.xlu0 %2462  ;;  %v2561_v33 = vpop.xlane.xlu1 %2560 }
 0x67c   :  { %7374 = vrcp.f32 %v2463_v22 }
 0x67d   :  { %7376 = vrcp.f32 %v2561_v33 }
 0x67f   :  { %v2666_v19 = vpop.xlane.xlu0 %2665  ;;  %v2764_v47 = vpop.xlane.xlu1 %2763 }
 0x680   :  { %7378 = vrcp.f32 %v2666_v19 }
 0x681   :  { %7380 = vrcp.f32 %v2764_v47  ;;  %v7417_v47 = vld [vmem:[#allocation5 + $0x8] sm:$0xff] }
 0x682   :  { %v7373_v27 = vpop.eup %7372 }
 0x683   :  { %v2360_v26 = vmul.f32 %v7373_v27, %v7363_v62  ;;  %v8254_v20 = vpop.permute.xlu1 %2613 }
 0x685   :  { %v2361_v34 = vpack.c.bf16 %v2360_v26, %v2360_v26 }
 0x686   :  { %v7375_v35 = vpop.eup %7374 }
 0x687   :  { %6421 = vmatmul.mubr.msk.bf16.vlgmr.msra.gmra.mrb[28].mxu1 %vm2250_vm2, %v2361_v34  ;;  %v2465_v5 = vmul.f32 %v7375_v35, %v7367_v1  ;;  %v7377_v43 = vpop.eup %7376  ;;  %v8243_v58 = vpop.permute.xlu0 %2410 }
 0x688   :  { %6431 = vmatpush3.bf16.msra.mxu1 %v2471_v36  ;;  %6432 = vmatprep.mubr.msk.bf16.mxu1 %vm7793_vm0, %v7792_v2  ;;  %v2563_v46 = vmul.f32 %v7377_v43, %v7365_v0  ;;  %v2413_v59 = vmul.f32 %v8243_v58, %v8187_v29  ;;  %v7414_v0 = vld [vmem:[#allocation2 + $0x8] sm:$0xff]  ;;  %v8256_v25 = vpop.permute.xlu1 %2816 }
 0x689   :  { %6442 = vmatprep.subr.bf16.mxu1 %v7792_v2  ;;  %v2466_v42 = vpack.c.bf16 %v2465_v5, %v2465_v5 }
 0x68a   :  { %v2564_v51 = vpack.c.bf16 %v2563_v46, %v2563_v46  ;;  %v7379_v52 = vpop.eup %7378 }
 0x68b   :  { %v2668_v53 = vmul.f32 %v7379_v52, %v7371_v11  ;;  %v7381_v56 = vpop.eup %7380  ;;  %v8250_v11 = vadd.f32 %v7415_v7, %v2413_v59  ;;  %v6960_v52 = vld [vmem:[#allocation7 + $0x104] ss:$8 sps:$4 sm:$0xff]   ;;  %v6967_v59 = vld [vmem:[#allocation7 + $0x130] ss:$8 sps:$4 sm:$0xff]   ;;  %v6981_v7 = vld [vmem:[#allocation7 + $0x174] ss:$8 sps:$4 sm:$0xff]  }
 0x68c   :  { %v2766_v24 = vmul.f32 %v7381_v56, %v8196_v8  ;;  %3124 = vmatprep.subr.bf16.mxu0 %v6960_v52  ;;  %v6990_v56 = vld [vmem:[#allocation10 + $0x704] ss:$56 sps:$4 sm:$0xff]   ;;  %v7018_v52 = vld [vmem:[#allocation10 + $0x930] ss:$56 sps:$4 sm:$0xff]  }
 0x68d   :  { %v2669_v55 = vpack.c.bf16 %v2668_v53, %v2668_v53  ;;  %v6966_v53 = vld [vmem:[#allocation7 + $0x124] ss:$8 sps:$4 sm:$0xff]  }
 0x68e   :  { %v2767_v57 = vpack.c.bf16 %v2766_v24, %v2766_v24  ;;  %v6996_v24 = vld [vmem:[#allocation10 + $0x774] ss:$56 sps:$4 sm:$0xff]  }
 0x68f   :  { %6433 = vmatmul.mubr.msk.bf16.vlgmr.msra.gmra.mrb[32].mxu1 %vm2250_vm2, %v2466_v42 }
 0x690   :  { %6443 = vmatpush3.bf16.msra.mxu1 %v2569_v45  ;;  %6444 = vmatprep.mubr.msk.bf16.mxu1 %vm7793_vm0, %v7792_v2 }
 0x691   :  { %6454 = vmatprep.subr.bf16.mxu1 %v7792_v2 }
 0x697   :  { %6445 = vmatmul.mubr.msk.bf16.vlgmr.msra.gmra.mrb[36].mxu1 %vm2250_vm2, %v2564_v51  ;;  %v6958_v51 = vld [vmem:[#allocation7 + $0x100] ss:$8 sps:$4 sm:$0xff]  }
 0x698   :  { %6455 = vmatpush3.bf16.msra.mxu1 %v2674_v38  ;;  %6456 = vmatprep.mubr.msk.bf16.mxu1 %vm7793_vm0, %v7792_v2  ;;  %v6963_v38 = vld [vmem:[#allocation7 + $0x114] ss:$8 sps:$4 sm:$0xff]  }
 0x699   :  { %6466 = vmatprep.subr.bf16.mxu1 %v7792_v2  ;;  %3125 = vmatpush1.bf16.msra.mxu0 %v6958_v51  ;;  %v7015_v51 = vld [vmem:[#allocation7 + $0x1e0] ss:$8 sps:$4 sm:$0xff]  }
 0x69a   :  { %3126 = vmatprep.subr.bf16.mxu0 %v6963_v38 }
 0x69d   :  { %3127 = vmatpush1.bf16.msra.mxu0 %v6961_v23 }
 0x69e   :  { %3128 = vmatprep.subr.bf16.mxu0 %v6966_v53  ;;  %v7023_v53 = vld [vmem:[#allocation7 + $0x1f4] ss:$8 sps:$4 sm:$0xff]  }
 0x69f   :  { %6457 = vmatmul.mubr.msk.bf16.vlgmr.msra.gmra.mrb[40].mxu1 %vm2250_vm2, %v2669_v55  ;;  %v6964_v55 = vld [vmem:[#allocation7 + $0x120] ss:$8 sps:$4 sm:$0xff]  }
 0x6a0   :  { %6467 = vmatpush3.bf16.msra.mxu1 %v2772_v9  ;;  %6468 = vmatprep.mubr.msk.bf16.mxu1 %vm7793_vm0, %v7792_v2  ;;  %v6969_v9 = vld [vmem:[#allocation7 + $0x134] ss:$8 sps:$4 sm:$0xff]  }
 0x6a1   :  { %4587 = vmatprep.subr.bf16.mxu1 %v6990_v56  ;;  %3129 = vmatpush1.bf16.msra.mxu0 %v6964_v55  ;;  %v7021_v55 = vld [vmem:[#allocation7 + $0x1f0] ss:$8 sps:$4 sm:$0xff]   ;;  %v7024_v56 = vld [vmem:[#allocation10 + $0x9a0] ss:$56 sps:$4 sm:$0xff]  }
 0x6a2   :  { %3130 = vmatprep.subr.bf16.mxu0 %v6969_v9 }
 0x6a5   :  { %3131 = vmatpush1.bf16.msra.mxu0 %v6967_v59  ;;  %v7027_v59 = vld [vmem:[#allocation10 + $0xa10] ss:$56 sps:$4 sm:$0xff]  }
 0x6a7   :  { %6469 = vmatmul.mubr.msk.bf16.vlgmr.msra.gmra.mrb[44].mxu1 %vm2250_vm2, %v2767_v57  ;;  %v6994_v57 = vld [vmem:[#allocation10 + $0x770] ss:$56 sps:$4 sm:$0xff]  }
 0x6a8   :  { %4588 = vmatpush1.bf16.msra.mxu1 %v6988_v54  ;;  %v7026_v54 = vld [vmem:[#allocation10 + $0x9a4] ss:$56 sps:$4 sm:$0xff]  }
 0x6a9   :  { %4589 = vmatprep.subr.bf16.mxu1 %v6996_v24 }
 0x6ac   :  { %4590 = vmatpush1.bf16.msra.mxu1 %v6994_v57  ;;  %v7032_v57 = vld [vmem:[#allocation10 + $0x70c] ss:$56 sps:$4 sm:$0xff]  }
 0x75a   :  { %v2402_v60 = vpop.f32.mrb[28].mxu1 }
 0x75b   :  { %v2414_v61 = vmul.f32 %v8243_v58, %v2402_v60  ;;  %v6422_v62 = vpop.f32.mrb[29].mxu1  ;;  %v6972_v60 = vld [vmem:[#allocation7 + $0x144] ss:$8 sps:$4 sm:$0xff]  }
 0x75c   :  { %v2405_v63 = vpop.f32.mrb[30].mxu1  ;;  %3132 = vmatprep.subr.bf16.mxu0 %v6972_v60  ;;  %v6975_v62 = vld [vmem:[#allocation7 + $0x154] ss:$8 sps:$4 sm:$0xff]  }
 0x75d   :  { %v8248_v1 = vadd.f32 %v7414_v0, %v2414_v61  ;;  %v6423_v4 = vpop.f32.mrb[31].mxu1  ;;  %v6970_v61 = vld [vmem:[#allocation7 + $0x140] ss:$8 sps:$4 sm:$0xff]   ;;  %v6973_v63 = vld [vmem:[#allocation7 + $0x150] ss:$8 sps:$4 sm:$0xff]  }
 0x75e   :  { %3133 = vmatpush1.bf16.msra.mxu0 %v6970_v61  ;;  %v6978_v0 = vld [vmem:[#allocation7 + $0x164] ss:$8 sps:$4 sm:$0xff]   ;;  %v6976_v4 = vld [vmem:[#allocation7 + $0x160] ss:$8 sps:$4 sm:$0xff]  }
 0x75f   :  { %v2827_v8 = vadd.f32 %v8248_v1, %v8250_v11  ;;  %3134 = vmatprep.subr.bf16.mxu0 %v6975_v62  ;;  %v7033_v60 = vld [vmem:[#allocation10 + $0xa80] ss:$56 sps:$4 sm:$0xff]   ;;  %v7035_v61 = vld [vmem:[#allocation10 + $0xa84] ss:$56 sps:$4 sm:$0xff]   ;;  %v7039_v62 = vld [vmem:[#allocation10 + $0xaf0] ss:$56 sps:$4 sm:$0xff]  }
 0x761   :  { %2828 = vadd.xlane.f32.xlu1 %v2827_v8  ;;  %v6979_v8 = vld [vmem:[#allocation7 + $0x170] ss:$8 sps:$4 sm:$0xff]  }
 0x762   :  { %v2507_v13 = vpop.f32.mrb[32].mxu1  ;;  %3135 = vmatpush1.bf16.msra.mxu0 %v6973_v63  ;;  %v7041_v63 = vld [vmem:[#allocation10 + $0xaf4] ss:$56 sps:$4 sm:$0xff]  }
 0x763   :  { %v6434_v15 = vpop.f32.mrb[33].mxu1  ;;  %v2616_v27 = vmul.f32 %v8254_v20, %v2507_v13  ;;  %3136 = vmatprep.subr.bf16.mxu0 %v6978_v0  ;;  %v6984_v13 = vld [vmem:[#allocation7 + $0x184] ss:$8 sps:$4 sm:$0xff]  }
 0x764   :  { %v2510_v16 = vpop.f32.mrb[34].mxu1  ;;  %v6982_v15 = vld [vmem:[#allocation7 + $0x180] ss:$8 sps:$4 sm:$0xff]   ;;  %v7045_v0 = vld [vmem:[#allocation10 + $0xb60] ss:$56 sps:$4 sm:$0xff]  }
 0x765   :  { %v6435_v29 = vpop.f32.mrb[35].mxu1  ;;  %v6987_v16 = vld [vmem:[#allocation7 + $0x194] ss:$8 sps:$4 sm:$0xff]  }
 0x766   :  { %3137 = vmatpush1.bf16.msra.mxu0 %v6976_v4  ;;  %v6985_v29 = vld [vmem:[#allocation7 + $0x190] ss:$8 sps:$4 sm:$0xff]   ;;  %v7047_v4 = vld [vmem:[#allocation10 + $0xb64] ss:$56 sps:$4 sm:$0xff]  }
 0x767   :  { %3138 = vmatprep.subr.bf16.mxu0 %v6981_v7  ;;  %v7053_v7 = vld [vmem:[#allocation10 + $0xbd4] ss:$56 sps:$4 sm:$0xff]  }
 0x76a   :  { %v2605_v17 = vpop.f32.mrb[36].mxu1  ;;  %3139 = vmatpush1.bf16.msra.mxu0 %v6979_v8  ;;  %v7051_v8 = vld [vmem:[#allocation10 + $0xbd0] ss:$56 sps:$4 sm:$0xff]  }
 0x76b   :  { %v6446_v18 = vpop.f32.mrb[37].mxu1  ;;  %v2617_v37 = vmul.f32 %v8254_v20, %v2605_v17  ;;  %3140 = vmatprep.subr.bf16.mxu0 %v6984_v13  ;;  %v6993_v17 = vld [vmem:[#allocation7 + $0x1a4] ss:$8 sps:$4 sm:$0xff]   ;;  %v7059_v13 = vld [vmem:[#allocation10 + $0xc44] ss:$56 sps:$4 sm:$0xff]  }
 0x76c   :  { %v2608_v21 = vpop.f32.mrb[38].mxu1  ;;  %v6991_v18 = vld [vmem:[#allocation7 + $0x1a0] ss:$8 sps:$4 sm:$0xff]  }
 0x76d   :  { %v6447_v22 = vpop.f32.mrb[39].mxu1 }
 0x76e   :  { %3141 = vmatpush1.bf16.msra.mxu0 %v6982_v15  ;;  %v7057_v15 = vld [vmem:[#allocation10 + $0xc40] ss:$56 sps:$4 sm:$0xff]  }
 0x76f   :  { %3142 = vmatprep.subr.bf16.mxu0 %v6987_v16  ;;  %v7065_v16 = vld [vmem:[#allocation10 + $0xcb4] ss:$56 sps:$4 sm:$0xff]  }
 0x772   :  { %v2710_v33 = vpop.f32.mrb[40].mxu1  ;;  %3143 = vmatpush1.bf16.msra.mxu0 %v6985_v29  ;;  %v7063_v29 = vld [vmem:[#allocation10 + $0xcb0] ss:$56 sps:$4 sm:$0xff]  }
 0x773   :  { %v2819_v44 = vmul.f32 %v8256_v25, %v2710_v33  ;;  %v6458_v32 = vpop.f32.mrb[41].mxu1  ;;  %3144 = vmatprep.subr.bf16.mxu0 %v6993_v17  ;;  %v7071_v17 = vld [vmem:[#allocation10 + $0xd24] ss:$56 sps:$4 sm:$0xff]  }
 0x774   :  { %v2713_v26 = vpop.f32.mrb[42].mxu1 }
 0x775   :  { %v2821_v34 = vadd.f32 %v2819_v44, %v2616_v27  ;;  %v6459_v35 = vpop.f32.mrb[43].mxu1 }
 0x776   :  { %3145 = vmatpush1.bf16.msra.mxu0 %v6991_v18  ;;  %v7002_v35 = vld [vmem:[#allocation10 + $0x7e4] ss:$56 sps:$4 sm:$0xff]   ;;  %v7069_v18 = vld [vmem:[#allocation10 + $0xd20] ss:$56 sps:$4 sm:$0xff]  }
 0x777   :  { %v2823_v41 = vmul.f32 0.5, %v2821_v34  ;;  %v6999_v34 = vld [vmem:[#allocation7 + $0x1b4] ss:$8 sps:$4 sm:$0xff]   ;;  %4591 = vmatprep.subr.bf16.mxu1 %v7002_v35  ;;  %v232_v35 = vld [vmem:[#allocation13] sm:$0x3] }
 0x778   :  { %3146 = vmatprep.subr.bf16.mxu0 %v6999_v34 }
 0x779   :  { %v8262_v46 = vadd.f32 %v7416_v6, %v2823_v41  ;;  %v7014_v41 = vld [vmem:[#allocation10 + $0x8c4] ss:$56 sps:$4 sm:$0xff]  }
 0x77a   :  { %v2808_v36 = vpop.f32.mrb[44].mxu1 }
 0x77b   :  { %v2820_v5 = vmul.f32 %v8256_v25, %v2808_v36  ;;  %v6470_v19 = vpop.f32.mrb[45].mxu1  ;;  %v6997_v36 = vld [vmem:[#allocation7 + $0x1b0] ss:$8 sps:$4 sm:$0xff]  }
 0x77c   :  { %v2811_v39 = vpop.f32.mrb[46].mxu1  ;;  %3147 = vmatpush1.bf16.msra.mxu0 %v6997_v36  ;;  %v7006_v19 = vld [vmem:[#allocation10 + $0x850] ss:$56 sps:$4 sm:$0xff]   ;;  %v236_v36 = vld [vmem:[#allocation14] sm:$0x3] }
 0x77d   :  { %v2822_v42 = vadd.f32 %v2820_v5, %v2617_v37  ;;  %v6471_v43 = vpop.f32.mrb[47].mxu1  ;;  %v7000_v37 = vld [vmem:[#allocation10 + $0x7e0] ss:$56 sps:$4 sm:$0xff]   ;;  %v7008_v5 = vld [vmem:[#allocation10 + $0x854] ss:$56 sps:$4 sm:$0xff]  }
 0x77e   :  { %4592 = vmatpush1.bf16.msra.mxu1 %v7000_v37  ;;  %v7011_v39 = vld [vmem:[#allocation7 + $0x1d4] ss:$8 sps:$4 sm:$0xff]   ;;  %v2848_v37 = vrot.slane %v232_v35, %v8106_v31 }
 0x77f   :  { %v2824_v45 = vmul.f32 0.5, %v2822_v42  ;;  %4593 = vmatprep.subr.bf16.mxu1 %v7008_v5  ;;  %v7009_v42 = vld [vmem:[#allocation7 + $0x1d0] ss:$8 sps:$4 sm:$0xff]   ;;  %v7012_v43 = vld [vmem:[#allocation10 + $0x8c0] ss:$56 sps:$4 sm:$0xff]  }
 0x781   :  { %v8264_v49 = vadd.f32 %v7417_v47, %v2824_v45  ;;  %v7017_v47 = vld [vmem:[#allocation7 + $0x1e4] ss:$8 sps:$4 sm:$0xff]  }
 0x782   :  { %4594 = vmatpush1.bf16.msra.mxu1 %v7006_v19 }
 0x783   :  { %v2872_v30 = vadd.f32 %v8264_v49, %v8262_v46  ;;  %4595 = vmatprep.subr.bf16.mxu1 %v7014_v41  ;;  %v2865_v41 = vrot.slane %v236_v36, %v8089_v10 }
 0x785   :  { %2873 = vadd.xlane.f32.xlu0 %v2872_v30  ;;  %v7020_v30 = vld [vmem:[#allocation10 + $0x934] ss:$56 sps:$4 sm:$0xff]  }
 0x786   :  { %4596 = vmatpush1.bf16.msra.mxu1 %v7012_v43 }
 0x787   :  { %4597 = vmatprep.subr.bf16.mxu1 %v7020_v30  ;;  %v7030_v30 = vld [vmem:[#allocation10 + $0x708] ss:$56 sps:$4 sm:$0xff]  }
 0x78a   :  { %4598 = vmatpush1.bf16.msra.mxu1 %v7018_v52  ;;  %v7044_v52 = vld [vmem:[#allocation10 + $0x7ec] ss:$56 sps:$4 sm:$0xff]  }
 0x78b   :  { %4599 = vmatprep.subr.bf16.mxu1 %v7026_v54  ;;  %v7050_v54 = vld [vmem:[#allocation10 + $0x85c] ss:$56 sps:$4 sm:$0xff]  }
 0x78e   :  { %4600 = vmatpush1.bf16.msra.mxu1 %v7024_v56  ;;  %v7056_v56 = vld [vmem:[#allocation10 + $0x8cc] ss:$56 sps:$4 sm:$0xff]  }
 0x7ee   :  { %v2829_v21 = vpop.xlane.xlu1 %2828 }
 0x7ef   :  { %v2831_v22 = vmul.f32 0.00390625, %v2829_v21  ;;  %v7077_v21 = vld [vmem:[#allocation10 + $0xd94] ss:$56 sps:$4 sm:$0xff]  }
 0x7f1   :  { %v8269_v33 = vsub.f32 %v8250_v11, %v2831_v22  ;;  %v8272_v27 = vsub.f32 %v8248_v1, %v2831_v22  ;;  %v7005_v11 = vld [vmem:[#allocation7 + $0x1c4] ss:$8 sps:$4 sm:$0xff]   ;;  %v7003_v1 = vld [vmem:[#allocation7 + $0x1c0] ss:$8 sps:$4 sm:$0xff]  }
 0x7f2   :  { %3148 = vmatprep.subr.bf16.mxu0 %v7005_v11  ;;  %v7075_v22 = vld [vmem:[#allocation10 + $0xd90] ss:$56 sps:$4 sm:$0xff]   ;;  %v2852_v11 = vrot.slane %v232_v35, %v8089_v10 }
 0x7f3   :  { %v2834_v44 = vmul.f32 %v8269_v33, %v8269_v33  ;;  %v2835_v32 = vmul.f32 %v8272_v27, %v8272_v27  ;;  %3149 = vmatpush1.bf16.msra.mxu0 %v7003_v1 }
 0x7f4   :  { %3150 = vmatprep.subr.bf16.mxu0 %v7011_v39  ;;  %v2861_v39 = vrot.slane %v236_v36, %v8106_v31 }
 0x7f5   :  { %v2836_v26 = vadd.f32 %v2835_v32, %v2834_v44  ;;  %v7086_v44 = vld [vmem:[#allocation10 + $0x714] ss:$56 sps:$4 sm:$0xff]  }
 0x7f7   :  { %2837 = vadd.xlane.f32.xlu1 %v2836_v26  ;;  %3151 = vmatpush1.bf16.msra.mxu0 %v7009_v42 }
 0x7f8   :  { %3152 = vmatprep.subr.bf16.mxu0 %v7017_v47 }
 0x7fb   :  { %3153 = vmatpush1.bf16.msra.mxu0 %v7015_v51 }
 0x7fc   :  { %3154 = vmatprep.subr.bf16.mxu0 %v7023_v53  ;;  %v7042_v53 = vld [vmem:[#allocation10 + $0x7e8] ss:$56 sps:$4 sm:$0xff]  }
 0x7ff   :  { %3155 = vmatpush1.bf16.msra.mxu0 %v7021_v55  ;;  %v7048_v55 = vld [vmem:[#allocation10 + $0x858] ss:$56 sps:$4 sm:$0xff]  }
 0x800   :  { %4628 = vmatprep.subr.bf16.mxu0 %v7032_v57  ;;  %v7062_v57 = vld [vmem:[#allocation10 + $0x93c] ss:$56 sps:$4 sm:$0xff]  }
 0x812   :  { %v2874_v45 = vpop.xlane.xlu0 %2873 }
 0x813   :  { %v2875_v6 = vmul.f32 0.00390625, %v2874_v45 }
 0x815   :  { %v8279_v38 = vsub.f32 %v8262_v46, %v2875_v6  ;;  %v8282_v23 = vsub.f32 %v8264_v49, %v2875_v6  ;;  %v7029_v49 = vld [vmem:[#allocation10 + $0xa14] ss:$56 sps:$4 sm:$0xff]  }
 0x816   :  { %4601 = vmatprep.subr.bf16.mxu1 %v7029_v49 }
 0x817   :  { %v2878_v9 = vmul.f32 %v8279_v38, %v8279_v38  ;;  %v2879_v24 = vmul.f32 %v8282_v23, %v8282_v23  ;;  %4602 = vmatpush1.bf16.msra.mxu1 %v7027_v59  ;;  %v7060_v59 = vld [vmem:[#allocation10 + $0x938] ss:$56 sps:$4 sm:$0xff]  }
 0x818   :  { %4603 = vmatprep.subr.bf16.mxu1 %v7035_v61  ;;  %v7066_v61 = vld [vmem:[#allocation10 + $0x9a8] ss:$56 sps:$4 sm:$0xff]  }
 0x819   :  { %v2880_v46 = vadd.f32 %v2879_v24, %v2878_v9 }
 0x81b   :  { %2881 = vadd.xlane.f32.xlu1 %v2880_v46  ;;  %4604 = vmatpush1.bf16.msra.mxu1 %v7033_v60  ;;  %v7054_v46 = vld [vmem:[#allocation10 + $0x8c8] ss:$56 sps:$4 sm:$0xff]   ;;  %v7068_v60 = vld [vmem:[#allocation10 + $0x9ac] ss:$56 sps:$4 sm:$0xff]  }
 0x81c   :  { %4605 = vmatprep.subr.bf16.mxu1 %v7041_v63  ;;  %v7074_v63 = vld [vmem:[#allocation10 + $0xa1c] ss:$56 sps:$4 sm:$0xff]  }
 0x81f   :  { %4606 = vmatpush1.bf16.msra.mxu1 %v7039_v62  ;;  %v233_v62 = vld [vmem:[#allocation13 + $0x2] sm:$0x3] }
 0x820   :  { %4607 = vmatprep.subr.bf16.mxu1 %v7047_v4  ;;  %v2892_v4 = vrot.slane %v233_v62, %v8106_v31 }
 0x823   :  { %4608 = vmatpush1.bf16.msra.mxu1 %v7045_v0  ;;  %v237_v0 = vld [vmem:[#allocation14 + $0x2] sm:$0x3] }
 0x824   :  { %4609 = vmatprep.subr.bf16.mxu1 %v7053_v7  ;;  %v2896_v7 = vrot.slane %v233_v62, %v8089_v10  ;;  %v7126_v62 = vld [vmem:[#allocation10 + $0x718] ss:$56 sps:$4 sm:$0xff]  }
 0x827   :  { %4610 = vmatpush1.bf16.msra.mxu1 %v7051_v8  ;;  %v7072_v8 = vld [vmem:[#allocation10 + $0xa18] ss:$56 sps:$4 sm:$0xff]  }
 0x828   :  { %4611 = vmatprep.subr.bf16.mxu1 %v7059_v13 }
 0x82b   :  { %4612 = vmatpush1.bf16.msra.mxu1 %v7057_v15  ;;  %v7080_v15 = vld [vmem:[#allocation10 + $0xa8c] ss:$56 sps:$4 sm:$0xff]  }
 0x82c   :  { %4613 = vmatprep.subr.bf16.mxu1 %v7065_v16  ;;  %v2905_v16 = vrot.slane %v237_v0, %v8106_v31 }
 0x82f   :  { %4614 = vmatpush1.bf16.msra.mxu1 %v7063_v29  ;;  %v2909_v29 = vrot.slane %v237_v0, %v8089_v10  ;;  %v7134_v0 = vld [vmem:[#allocation10 + $0x78c] ss:$56 sps:$4 sm:$0xff]  }
 0x830   :  { %4615 = vmatprep.subr.bf16.mxu1 %v7071_v17 }
 0x833   :  { %4616 = vmatpush1.bf16.msra.mxu1 %v7069_v18 }
 0x834   :  { %4617 = vmatprep.subr.bf16.mxu1 %v7077_v21 }
 0x837   :  { %4618 = vmatpush1.bf16.msra.mxu1 %v7075_v22 }
 0x838   :  { %4669 = vmatprep.subr.bf16.mxu1 %v7086_v44  ;;  %v7078_v44 = vld [vmem:[#allocation10 + $0xa88] ss:$56 sps:$4 sm:$0xff]  }
 0x884   :  { %v2838_v32 = vpop.xlane.xlu1 %2837 }
 0x885   :  { %v2839_v26 = vmul.f32 0.00390625, %v2838_v32  ;;  %v7083_v32 = vld [vmem:[#allocation10 + $0xafc] ss:$56 sps:$4 sm:$0xff]  }
 0x887   :  { %v2840_v34 = vadd.f32 1e-05, %v2839_v26 }
 0x889   :  { %7382 = vrsqrt.f32 %v2840_v34 }
 0x893   :  { %v7383_v5 = vpop.eup %7382 }
 0x894   :  { %v2842_v1 = vmul.f32 %v7383_v5, %v8269_v33  ;;  %v2843_v19 = vmul.f32 %v7383_v5, %v8272_v27  ;;  %v7038_v33 = vld [vmem:[#allocation10 + $0x77c] ss:$56 sps:$4 sm:$0xff]   ;;  %v7036_v27 = vld [vmem:[#allocation10 + $0x778] ss:$56 sps:$4 sm:$0xff]   ;;  %v7087_v5 = vld [vmem:[#allocation10 + $0xb68] ss:$56 sps:$4 sm:$0xff]  }
 0x896   :  { %v2856_v42 = vmul.f32 %v2852_v11, %v2843_v19  ;;  %v2855_v43 = vmul.f32 %v2848_v37, %v2842_v1  ;;  %v7089_v37 = vld [vmem:[#allocation10 + $0xb6c] ss:$56 sps:$4 sm:$0xff]   ;;  %v7090_v1 = vld [vmem:[#allocation10 + $0x780] ss:$56 sps:$4 sm:$0xff]   ;;  %v7095_v19 = vld [vmem:[#allocation10 + $0xbdc] ss:$56 sps:$4 sm:$0xff]  }
 0x897   :  { %v7092_v11 = vld [vmem:[#allocation10 + $0x784] ss:$56 sps:$4 sm:$0xff]  }
 0x898   :  { %v8294_v45 = vadd.f32 %v2865_v41, %v2856_v42  ;;  %v8296_v6 = vadd.f32 %v2861_v39, %v2855_v43  ;;  %v7098_v39 = vld [vmem:[#allocation10 + $0x7f4] ss:$56 sps:$4 sm:$0xff]   ;;  %v7093_v41 = vld [vmem:[#allocation10 + $0xbd8] ss:$56 sps:$4 sm:$0xff]  }
 0x899   :  { %v7096_v42 = vld [vmem:[#allocation10 + $0x7f0] ss:$56 sps:$4 sm:$0xff]   ;;  %v7101_v43 = vld [vmem:[#allocation10 + $0xc4c] ss:$56 sps:$4 sm:$0xff]  }
 0x89a   :  { %v2915_v47 = vpack.c.bf16 %v8294_v45, %v8294_v45  ;;  %v2914_v51 = vpack.c.bf16 %v8296_v6, %v8296_v6 }
 0x89c   :  { %3156 = vmatprep.mubr.bf16.mxu0 %v2915_v47  ;;  %v7104_v47 = vld [vmem:[#allocation10 + $0x864] ss:$56 sps:$4 sm:$0xff]  }
 0x89d   :  { %3157 = vmatmul.mubr.bf16.vlgmr.msra.gmra.mrb[32].mxu0 %v2914_v51  ;;  %v7102_v51 = vld [vmem:[#allocation10 + $0x860] ss:$56 sps:$4 sm:$0xff]  }
 0x89e   :  { %4629 = vmatpush1.bf16.msra.mxu0 %v7030_v30  ;;  %v7099_v30 = vld [vmem:[#allocation10 + $0xc48] ss:$56 sps:$4 sm:$0xff]  }
 0x89f   :  { %4630 = vmatprep.subr.bf16.mxu0 %v7038_v33  ;;  %v7107_v33 = vld [vmem:[#allocation10 + $0xcbc] ss:$56 sps:$4 sm:$0xff]  }
 0x8a2   :  { %4631 = vmatpush1.bf16.msra.mxu0 %v7036_v27  ;;  %v7110_v27 = vld [vmem:[#allocation10 + $0x8d4] ss:$56 sps:$4 sm:$0xff]  }
 0x8a3   :  { %4632 = vmatprep.subr.bf16.mxu0 %v7044_v52  ;;  %v7105_v52 = vld [vmem:[#allocation10 + $0xcb8] ss:$56 sps:$4 sm:$0xff]  }
 0x8a6   :  { %4633 = vmatpush1.bf16.msra.mxu0 %v7042_v53  ;;  %v7108_v53 = vld [vmem:[#allocation10 + $0x8d0] ss:$56 sps:$4 sm:$0xff]  }
 0x8a7   :  { %4634 = vmatprep.subr.bf16.mxu0 %v7050_v54  ;;  %v7113_v54 = vld [vmem:[#allocation10 + $0xd2c] ss:$56 sps:$4 sm:$0xff]  }
 0x8a8   :  { %v2882_v9 = vpop.xlane.xlu1 %2881 }
 0x8a9   :  { %v2883_v24 = vmul.f32 0.00390625, %v2882_v9  ;;  %v7114_v9 = vld [vmem:[#allocation10 + $0x940] ss:$56 sps:$4 sm:$0xff]  }
 0x8aa   :  { %4635 = vmatpush1.bf16.msra.mxu0 %v7048_v55  ;;  %v7116_v55 = vld [vmem:[#allocation10 + $0x944] ss:$56 sps:$4 sm:$0xff]  }
 0x8ab   :  { %v2884_v49 = vadd.f32 1e-05, %v2883_v24  ;;  %4636 = vmatprep.subr.bf16.mxu0 %v7056_v56  ;;  %v7111_v56 = vld [vmem:[#allocation10 + $0xd28] ss:$56 sps:$4 sm:$0xff]   ;;  %v7119_v24 = vld [vmem:[#allocation10 + $0xd9c] ss:$56 sps:$4 sm:$0xff]  }
 0x8ad   :  { %7384 = vrsqrt.f32 %v2884_v49  ;;  %v7117_v49 = vld [vmem:[#allocation10 + $0xd98] ss:$56 sps:$4 sm:$0xff]  }
 0x8ae   :  { %4637 = vmatpush1.bf16.msra.mxu0 %v7054_v46  ;;  %v7122_v46 = vld [vmem:[#allocation10 + $0x9b4] ss:$56 sps:$4 sm:$0xff]  }
 0x8af   :  { %4638 = vmatprep.subr.bf16.mxu0 %v7062_v57  ;;  %v7120_v57 = vld [vmem:[#allocation10 + $0x9b0] ss:$56 sps:$4 sm:$0xff]  }
 0x8b2   :  { %4639 = vmatpush1.bf16.msra.mxu0 %v7060_v59  ;;  %v7125_v59 = vld [vmem:[#allocation10 + $0xa24] ss:$56 sps:$4 sm:$0xff]  }
 0x8b3   :  { %4640 = vmatprep.subr.bf16.mxu0 %v7068_v60  ;;  %v7128_v60 = vld [vmem:[#allocation10 + $0x71c] ss:$56 sps:$4 sm:$0xff]  }
 0x8b6   :  { %4641 = vmatpush1.bf16.msra.mxu0 %v7066_v61  ;;  %v7123_v61 = vld [vmem:[#allocation10 + $0xa20] ss:$56 sps:$4 sm:$0xff]  }
 0x8b7   :  { %v7385_v13 = vpop.eup %7384  ;;  %4642 = vmatprep.subr.bf16.mxu0 %v7074_v63  ;;  %v7131_v63 = vld [vmem:[#allocation10 + $0xa94] ss:$56 sps:$4 sm:$0xff]  }
 0x8b8   :  { %v2886_v17 = vmul.f32 %v7385_v13, %v8279_v38  ;;  %v2887_v18 = vmul.f32 %v7385_v13, %v8282_v23  ;;  %v7081_v38 = vld [vmem:[#allocation10 + $0xaf8] ss:$56 sps:$4 sm:$0xff]   ;;  %v7140_v13 = vld [vmem:[#allocation10 + $0x7fc] ss:$56 sps:$4 sm:$0xff]  }
 0x8b9   :  { %v7084_v23 = vld [vmem:[#allocation10 + $0x710] ss:$56 sps:$4 sm:$0xff]  }
 0x8ba   :  { %v2899_v21 = vmul.f32 %v2892_v4, %v2886_v17  ;;  %v2900_v22 = vmul.f32 %v2896_v7, %v2887_v18  ;;  %4643 = vmatpush1.bf16.msra.mxu0 %v7072_v8  ;;  %v7129_v4 = vld [vmem:[#allocation10 + $0xa90] ss:$56 sps:$4 sm:$0xff]   ;;  %v7137_v8 = vld [vmem:[#allocation10 + $0xb04] ss:$56 sps:$4 sm:$0xff]  }
 0x8bb   :  { %4644 = vmatprep.subr.bf16.mxu0 %v7080_v15  ;;  %v7132_v7 = vld [vmem:[#allocation10 + $0x788] ss:$56 sps:$4 sm:$0xff]   ;;  %v7146_v17 = vld [vmem:[#allocation10 + $0x86c] ss:$56 sps:$4 sm:$0xff]  }
 0x8bc   :  { %v8308_v26 = vadd.f32 %v2905_v16, %v2899_v21  ;;  %v8310_v34 = vadd.f32 %v2909_v29, %v2900_v22  ;;  %v7135_v15 = vld [vmem:[#allocation10 + $0xb00] ss:$56 sps:$4 sm:$0xff]   ;;  %v7143_v29 = vld [vmem:[#allocation10 + $0xb74] ss:$56 sps:$4 sm:$0xff]   ;;  %v7141_v18 = vld [vmem:[#allocation10 + $0xb70] ss:$56 sps:$4 sm:$0xff]  }
 0x8bd   :  { %v7138_v16 = vld [vmem:[#allocation10 + $0x7f8] ss:$56 sps:$4 sm:$0xff]   ;;  %v7144_v21 = vld [vmem:[#allocation10 + $0x868] ss:$56 sps:$4 sm:$0xff]   ;;  %v7149_v22 = vld [vmem:[#allocation10 + $0xbe4] ss:$56 sps:$4 sm:$0xff]  }
 0x8be   :  { %v8314_v35 = vpack.c.bf16 %v8308_v26, %v8308_v26  ;;  %v8318_v36 = vpack.c.bf16 %v8310_v34, %v8310_v34  ;;  %4645 = vmatpush1.bf16.msra.mxu0 %v7078_v44  ;;  %v7152_v44 = vld [vmem:[#allocation10 + $0x8dc] ss:$56 sps:$4 sm:$0xff]  }
 0x8bf   :  { %4646 = vmatprep.subr.bf16.mxu0 %v7083_v32  ;;  %v7147_v32 = vld [vmem:[#allocation10 + $0xbe0] ss:$56 sps:$4 sm:$0xff]  }
 0x8c0   :  { %4619 = vmatprep.mubr.bf16.mxu1 %v8318_v36  ;;  %4660 = vmatprep.mubr.bf16.mxu0 %v8318_v36 }
 0x8c1   :  { %4620 = vmatmul.mubr.bf16.vlgmr.msra.gmra.mrb[48].mxu1 %v8314_v35 }
 0x8c2   :  { %4647 = vmatpush1.bf16.msra.mxu0 %v7081_v38  ;;  %4670 = vmatpush1.bf16.msra.mxu1 %v7084_v23  ;;  %v7150_v38 = vld [vmem:[#allocation10 + $0x8d8] ss:$56 sps:$4 sm:$0xff]   ;;  %v7155_v23 = vld [vmem:[#allocation10 + $0xc54] ss:$56 sps:$4 sm:$0xff]  }
 0x8c3   :  { %4701 = vmatprep.mubr.bf16.mxu1 %v8318_v36  ;;  %4648 = vmatprep.subr.bf16.mxu0 %v7089_v37  ;;  %v7158_v37 = vld [vmem:[#allocation10 + $0x94c] ss:$56 sps:$4 sm:$0xff]  }
 0x8c4   :  { %4671 = vmatprep.subr.bf16.mxu1 %v7092_v11  ;;  %v7153_v11 = vld [vmem:[#allocation10 + $0xc50] ss:$56 sps:$4 sm:$0xff]  }
 0x8c6   :  { %4649 = vmatpush1.bf16.msra.mxu0 %v7087_v5  ;;  %4672 = vmatpush1.bf16.msra.mxu1 %v7090_v1  ;;  %v7156_v5 = vld [vmem:[#allocation10 + $0x948] ss:$56 sps:$4 sm:$0xff]   ;;  %v7161_v1 = vld [vmem:[#allocation10 + $0xcc4] ss:$56 sps:$4 sm:$0xff]  }
 0x8c7   :  { %4650 = vmatprep.subr.bf16.mxu0 %v7095_v19  ;;  %4673 = vmatprep.subr.bf16.mxu1 %v7098_v39  ;;  %v7164_v19 = vld [vmem:[#allocation10 + $0x9bc] ss:$56 sps:$4 sm:$0xff]   ;;  %v7159_v39 = vld [vmem:[#allocation10 + $0xcc0] ss:$56 sps:$4 sm:$0xff]  }
 0x8ca   :  { %4651 = vmatpush1.bf16.msra.mxu0 %v7093_v41  ;;  %4674 = vmatpush1.bf16.msra.mxu1 %v7096_v42  ;;  %v7162_v41 = vld [vmem:[#allocation10 + $0x9b8] ss:$56 sps:$4 sm:$0xff]   ;;  %v7167_v42 = vld [vmem:[#allocation10 + $0xd34] ss:$56 sps:$4 sm:$0xff]  }
 0x8cb   :  { %4652 = vmatprep.subr.bf16.mxu0 %v7101_v43  ;;  %4675 = vmatprep.subr.bf16.mxu1 %v7104_v47  ;;  %v7170_v43 = vld [vmem:[#allocation10 + $0xa2c] ss:$56 sps:$4 sm:$0xff]   ;;  %v7165_v47 = vld [vmem:[#allocation10 + $0xd30] ss:$56 sps:$4 sm:$0xff]  }
 0x8ce   :  { %4653 = vmatpush1.bf16.msra.mxu0 %v7099_v30  ;;  %4676 = vmatpush1.bf16.msra.mxu1 %v7102_v51  ;;  %v7168_v30 = vld [vmem:[#allocation10 + $0xa28] ss:$56 sps:$4 sm:$0xff]   ;;  %v7173_v51 = vld [vmem:[#allocation10 + $0xda4] ss:$56 sps:$4 sm:$0xff]  }
 0x8cf   :  { %4654 = vmatprep.subr.bf16.mxu0 %v7107_v33  ;;  %4677 = vmatprep.subr.bf16.mxu1 %v7110_v27  ;;  %v7176_v33 = vld [vmem:[#allocation10 + $0xa9c] ss:$56 sps:$4 sm:$0xff]   ;;  %v7171_v27 = vld [vmem:[#allocation10 + $0xda0] ss:$56 sps:$4 sm:$0xff]  }
 0x8d2   :  { %4655 = vmatpush1.bf16.msra.mxu0 %v7105_v52  ;;  %4678 = vmatpush1.bf16.msra.mxu1 %v7108_v53  ;;  %v7174_v52 = vld [vmem:[#allocation10 + $0xa98] ss:$56 sps:$4 sm:$0xff]   ;;  %v7179_v53 = vld [vmem:[#allocation10 + $0xb0c] ss:$56 sps:$4 sm:$0xff]  }
 0x8d3   :  { %4656 = vmatprep.subr.bf16.mxu0 %v7113_v54  ;;  %4679 = vmatprep.subr.bf16.mxu1 %v7116_v55  ;;  %v7182_v54 = vld [vmem:[#allocation10 + $0x724] ss:$56 sps:$4 sm:$0xff]   ;;  %v7177_v55 = vld [vmem:[#allocation10 + $0xb08] ss:$56 sps:$4 sm:$0xff]  }
 0x8d6   :  { %4657 = vmatpush1.bf16.msra.mxu0 %v7111_v56  ;;  %4680 = vmatpush1.bf16.msra.mxu1 %v7114_v9  ;;  %v7180_v56 = vld [vmem:[#allocation10 + $0x720] ss:$56 sps:$4 sm:$0xff]   ;;  %v7185_v9 = vld [vmem:[#allocation10 + $0xb7c] ss:$56 sps:$4 sm:$0xff]  }
 0x8d7   :  { %4658 = vmatprep.subr.bf16.mxu0 %v7119_v24  ;;  %4681 = vmatprep.subr.bf16.mxu1 %v7122_v46  ;;  %v7188_v24 = vld [vmem:[#allocation10 + $0x794] ss:$56 sps:$4 sm:$0xff]   ;;  %v7183_v46 = vld [vmem:[#allocation10 + $0xb78] ss:$56 sps:$4 sm:$0xff]  }
 0x8da   :  { %4659 = vmatpush1.bf16.msra.mxu0 %v7117_v49  ;;  %4682 = vmatpush1.bf16.msra.mxu1 %v7120_v57  ;;  %v7186_v49 = vld [vmem:[#allocation10 + $0x790] ss:$56 sps:$4 sm:$0xff]   ;;  %v7191_v57 = vld [vmem:[#allocation10 + $0xbec] ss:$56 sps:$4 sm:$0xff]  }
 0x8db   :  { %4683 = vmatprep.subr.bf16.mxu1 %v7125_v59  ;;  %4710 = vmatprep.subr.bf16.mxu0 %v7128_v60  ;;  %v7194_v59 = vld [vmem:[#allocation10 + $0x804] ss:$56 sps:$4 sm:$0xff]   ;;  %v7189_v60 = vld [vmem:[#allocation10 + $0xbe8] ss:$56 sps:$4 sm:$0xff]  }
 0x8dd   :  { %4661 = vmatmul.mubr.bf16.vlgmr.msra.gmra.mrb[36].mxu0 %v8314_v35 }
 0x8de   :  { %4684 = vmatpush1.bf16.msra.mxu1 %v7123_v61  ;;  %4711 = vmatpush1.bf16.msra.mxu0 %v7126_v62  ;;  %v7192_v61 = vld [vmem:[#allocation10 + $0x800] ss:$56 sps:$4 sm:$0xff]   ;;  %v7197_v62 = vld [vmem:[#allocation10 + $0xc5c] ss:$56 sps:$4 sm:$0xff]  }
 0x8df   :  { %4742 = vmatprep.mubr.bf16.mxu0 %v8318_v36  ;;  %4685 = vmatprep.subr.bf16.mxu1 %v7131_v63  ;;  %v7200_v63 = vld [vmem:[#allocation10 + $0x874] ss:$56 sps:$4 sm:$0xff]  }
 0x8e0   :  { %4712 = vmatprep.subr.bf16.mxu0 %v7134_v0  ;;  %v7195_v0 = vld [vmem:[#allocation10 + $0xc58] ss:$56 sps:$4 sm:$0xff]  }
 0x8e2   :  { %4686 = vmatpush1.bf16.msra.mxu1 %v7129_v4  ;;  %4713 = vmatpush1.bf16.msra.mxu0 %v7132_v7  ;;  %v7198_v4 = vld [vmem:[#allocation10 + $0x870] ss:$56 sps:$4 sm:$0xff]   ;;  %v7203_v7 = vld [vmem:[#allocation10 + $0xccc] ss:$56 sps:$4 sm:$0xff]  }
 0x8e3   :  { %4687 = vmatprep.subr.bf16.mxu1 %v7137_v8  ;;  %4714 = vmatprep.subr.bf16.mxu0 %v7140_v13  ;;  %v7206_v8 = vld [vmem:[#allocation10 + $0x8e4] ss:$56 sps:$4 sm:$0xff]   ;;  %v7201_v13 = vld [vmem:[#allocation10 + $0xcc8] ss:$56 sps:$4 sm:$0xff]  }
 0x8e6   :  { %4688 = vmatpush1.bf16.msra.mxu1 %v7135_v15  ;;  %4715 = vmatpush1.bf16.msra.mxu0 %v7138_v16  ;;  %v7204_v15 = vld [vmem:[#allocation10 + $0x8e0] ss:$56 sps:$4 sm:$0xff]   ;;  %v7209_v16 = vld [vmem:[#allocation10 + $0xd3c] ss:$56 sps:$4 sm:$0xff]  }
 0x8e7   :  { %4689 = vmatprep.subr.bf16.mxu1 %v7143_v29  ;;  %4716 = vmatprep.subr.bf16.mxu0 %v7146_v17  ;;  %v7212_v29 = vld [vmem:[#allocation10 + $0x954] ss:$56 sps:$4 sm:$0xff]   ;;  %v7207_v17 = vld [vmem:[#allocation10 + $0xd38] ss:$56 sps:$4 sm:$0xff]  }
 0x8ea   :  { %4690 = vmatpush1.bf16.msra.mxu1 %v7141_v18  ;;  %4717 = vmatpush1.bf16.msra.mxu0 %v7144_v21  ;;  %v7210_v18 = vld [vmem:[#allocation10 + $0x950] ss:$56 sps:$4 sm:$0xff]   ;;  %v7215_v21 = vld [vmem:[#allocation10 + $0xdac] ss:$56 sps:$4 sm:$0xff]  }
 0x8eb   :  { %4691 = vmatprep.subr.bf16.mxu1 %v7149_v22  ;;  %4718 = vmatprep.subr.bf16.mxu0 %v7152_v44  ;;  %v7218_v22 = vld [vmem:[#allocation10 + $0x9c4] ss:$56 sps:$4 sm:$0xff]   ;;  %v7213_v44 = vld [vmem:[#allocation10 + $0xda8] ss:$56 sps:$4 sm:$0xff]  }
 0x8ee   :  { %4692 = vmatpush1.bf16.msra.mxu1 %v7147_v32  ;;  %4719 = vmatpush1.bf16.msra.mxu0 %v7150_v38  ;;  %v7216_v32 = vld [vmem:[#allocation10 + $0x9c0] ss:$56 sps:$4 sm:$0xff]   ;;  %v7221_v38 = vld [vmem:[#allocation10 + $0xa34] ss:$56 sps:$4 sm:$0xff]  }
 0x8ef   :  { %4693 = vmatprep.subr.bf16.mxu1 %v7155_v23  ;;  %4720 = vmatprep.subr.bf16.mxu0 %v7158_v37  ;;  %v7224_v23 = vld [vmem:[#allocation10 + $0x72c] ss:$56 sps:$4 sm:$0xff]   ;;  %v7219_v37 = vld [vmem:[#allocation10 + $0xa30] ss:$56 sps:$4 sm:$0xff]  }
 0x8f2   :  { %4694 = vmatpush1.bf16.msra.mxu1 %v7153_v11  ;;  %4721 = vmatpush1.bf16.msra.mxu0 %v7156_v5  ;;  %v7222_v11 = vld [vmem:[#allocation10 + $0x728] ss:$56 sps:$4 sm:$0xff]   ;;  %v7227_v5 = vld [vmem:[#allocation10 + $0xaa4] ss:$56 sps:$4 sm:$0xff]  }
 0x8f3   :  { %4695 = vmatprep.subr.bf16.mxu1 %v7161_v1  ;;  %4722 = vmatprep.subr.bf16.mxu0 %v7164_v19  ;;  %v7230_v1 = vld [vmem:[#allocation10 + $0x79c] ss:$56 sps:$4 sm:$0xff]   ;;  %v7225_v19 = vld [vmem:[#allocation10 + $0xaa0] ss:$56 sps:$4 sm:$0xff]  }
 0x8f6   :  { %4696 = vmatpush1.bf16.msra.mxu1 %v7159_v39  ;;  %4723 = vmatpush1.bf16.msra.mxu0 %v7162_v41  ;;  %v7228_v39 = vld [vmem:[#allocation10 + $0x798] ss:$56 sps:$4 sm:$0xff]   ;;  %v7233_v41 = vld [vmem:[#allocation10 + $0xb14] ss:$56 sps:$4 sm:$0xff]  }
 0x8f7   :  { %4697 = vmatprep.subr.bf16.mxu1 %v7167_v42  ;;  %4724 = vmatprep.subr.bf16.mxu0 %v7170_v43  ;;  %v7236_v42 = vld [vmem:[#allocation10 + $0x80c] ss:$56 sps:$4 sm:$0xff]   ;;  %v7231_v43 = vld [vmem:[#allocation10 + $0xb10] ss:$56 sps:$4 sm:$0xff]  }
 0x8fa   :  { %4698 = vmatpush1.bf16.msra.mxu1 %v7165_v47  ;;  %4725 = vmatpush1.bf16.msra.mxu0 %v7168_v30  ;;  %v7234_v47 = vld [vmem:[#allocation10 + $0x808] ss:$56 sps:$4 sm:$0xff]   ;;  %v7239_v30 = vld [vmem:[#allocation10 + $0xb84] ss:$56 sps:$4 sm:$0xff]  }
 0x8fb   :  { %4699 = vmatprep.subr.bf16.mxu1 %v7173_v51  ;;  %4726 = vmatprep.subr.bf16.mxu0 %v7176_v33  ;;  %v7242_v51 = vld [vmem:[#allocation10 + $0x87c] ss:$56 sps:$4 sm:$0xff]   ;;  %v7237_v33 = vld [vmem:[#allocation10 + $0xb80] ss:$56 sps:$4 sm:$0xff]  }
 0x8fe   :  { %4700 = vmatpush1.bf16.msra.mxu1 %v7171_v27  ;;  %4727 = vmatpush1.bf16.msra.mxu0 %v7174_v52  ;;  %v7240_v27 = vld [vmem:[#allocation10 + $0x878] ss:$56 sps:$4 sm:$0xff]   ;;  %v7245_v52 = vld [vmem:[#allocation10 + $0xbf4] ss:$56 sps:$4 sm:$0xff]  }
 0x8ff   :  { %4728 = vmatprep.subr.bf16.mxu0 %v7179_v53  ;;  %4751 = vmatprep.subr.bf16.mxu1 %v7182_v54  ;;  %v7248_v53 = vld [vmem:[#allocation10 + $0x8ec] ss:$56 sps:$4 sm:$0xff]   ;;  %v7243_v54 = vld [vmem:[#allocation10 + $0xbf0] ss:$56 sps:$4 sm:$0xff]  }
 0x901   :  { %4702 = vmatmul.mubr.bf16.vlgmr.msra.gmra.mrb[52].mxu1 %v8314_v35 }
 0x902   :  { %4729 = vmatpush1.bf16.msra.mxu0 %v7177_v55  ;;  %4752 = vmatpush1.bf16.msra.mxu1 %v7180_v56  ;;  %v7246_v55 = vld [vmem:[#allocation10 + $0x8e8] ss:$56 sps:$4 sm:$0xff]   ;;  %v7251_v56 = vld [vmem:[#allocation10 + $0xc64] ss:$56 sps:$4 sm:$0xff]  }
 0x903   :  { %4783 = vmatprep.mubr.bf16.mxu1 %v8318_v36  ;;  %4730 = vmatprep.subr.bf16.mxu0 %v7185_v9  ;;  %v7254_v9 = vld [vmem:[#allocation10 + $0x95c] ss:$56 sps:$4 sm:$0xff]  }
 0x904   :  { %4753 = vmatprep.subr.bf16.mxu1 %v7188_v24  ;;  %v7249_v24 = vld [vmem:[#allocation10 + $0xc60] ss:$56 sps:$4 sm:$0xff]  }
 0x906   :  { %4731 = vmatpush1.bf16.msra.mxu0 %v7183_v46  ;;  %4754 = vmatpush1.bf16.msra.mxu1 %v7186_v49  ;;  %v7252_v46 = vld [vmem:[#allocation10 + $0x958] ss:$56 sps:$4 sm:$0xff]   ;;  %v7257_v49 = vld [vmem:[#allocation10 + $0xcd4] ss:$56 sps:$4 sm:$0xff]  }
 0x907   :  { %4732 = vmatprep.subr.bf16.mxu0 %v7191_v57  ;;  %4755 = vmatprep.subr.bf16.mxu1 %v7194_v59  ;;  %v7260_v57 = vld [vmem:[#allocation10 + $0x9cc] ss:$56 sps:$4 sm:$0xff]   ;;  %v7255_v59 = vld [vmem:[#allocation10 + $0xcd0] ss:$56 sps:$4 sm:$0xff]  }
 0x90a   :  { %4733 = vmatpush1.bf16.msra.mxu0 %v7189_v60  ;;  %4756 = vmatpush1.bf16.msra.mxu1 %v7192_v61  ;;  %v7258_v60 = vld [vmem:[#allocation10 + $0x9c8] ss:$56 sps:$4 sm:$0xff]   ;;  %v7263_v61 = vld [vmem:[#allocation10 + $0xd44] ss:$56 sps:$4 sm:$0xff]  }
 0x90b   :  { %4734 = vmatprep.subr.bf16.mxu0 %v7197_v62  ;;  %4757 = vmatprep.subr.bf16.mxu1 %v7200_v63  ;;  %v7266_v62 = vld [vmem:[#allocation10 + $0xa3c] ss:$56 sps:$4 sm:$0xff]   ;;  %v7261_v63 = vld [vmem:[#allocation10 + $0xd40] ss:$56 sps:$4 sm:$0xff]  }
 0x90e   :  { %4735 = vmatpush1.bf16.msra.mxu0 %v7195_v0  ;;  %4758 = vmatpush1.bf16.msra.mxu1 %v7198_v4  ;;  %v7264_v0 = vld [vmem:[#allocation10 + $0xa38] ss:$56 sps:$4 sm:$0xff]   ;;  %v7269_v4 = vld [vmem:[#allocation10 + $0xdb4] ss:$56 sps:$4 sm:$0xff]  }
 0x90f   :  { %4736 = vmatprep.subr.bf16.mxu0 %v7203_v7  ;;  %4759 = vmatprep.subr.bf16.mxu1 %v7206_v8  ;;  %v7272_v7 = vld [vmem:[#allocation10 + $0xaac] ss:$56 sps:$4 sm:$0xff]   ;;  %v7267_v8 = vld [vmem:[#allocation10 + $0xdb0] ss:$56 sps:$4 sm:$0xff]  }
 0x912   :  { %4737 = vmatpush1.bf16.msra.mxu0 %v7201_v13  ;;  %4760 = vmatpush1.bf16.msra.mxu1 %v7204_v15  ;;  %v7270_v13 = vld [vmem:[#allocation10 + $0xaa8] ss:$56 sps:$4 sm:$0xff]   ;;  %v7275_v15 = vld [vmem:[#allocation10 + $0xb1c] ss:$56 sps:$4 sm:$0xff]  }
 0x913   :  { %4738 = vmatprep.subr.bf16.mxu0 %v7209_v16  ;;  %4761 = vmatprep.subr.bf16.mxu1 %v7212_v29  ;;  %v7278_v16 = vld [vmem:[#allocation10 + $0x734] ss:$56 sps:$4 sm:$0xff]   ;;  %v7273_v29 = vld [vmem:[#allocation10 + $0xb18] ss:$56 sps:$4 sm:$0xff]  }
 0x916   :  { %4739 = vmatpush1.bf16.msra.mxu0 %v7207_v17  ;;  %4762 = vmatpush1.bf16.msra.mxu1 %v7210_v18  ;;  %v7276_v17 = vld [vmem:[#allocation10 + $0x730] ss:$56 sps:$4 sm:$0xff]   ;;  %v7281_v18 = vld [vmem:[#allocation10 + $0xb8c] ss:$56 sps:$4 sm:$0xff]  }
 0x917   :  { %4740 = vmatprep.subr.bf16.mxu0 %v7215_v21  ;;  %4763 = vmatprep.subr.bf16.mxu1 %v7218_v22  ;;  %v7284_v21 = vld [vmem:[#allocation10 + $0x7a4] ss:$56 sps:$4 sm:$0xff]   ;;  %v7279_v22 = vld [vmem:[#allocation10 + $0xb88] ss:$56 sps:$4 sm:$0xff]  }
 0x91a   :  { %4741 = vmatpush1.bf16.msra.mxu0 %v7213_v44  ;;  %4764 = vmatpush1.bf16.msra.mxu1 %v7216_v32  ;;  %v7282_v44 = vld [vmem:[#allocation10 + $0x7a0] ss:$56 sps:$4 sm:$0xff]   ;;  %v7287_v32 = vld [vmem:[#allocation10 + $0xbfc] ss:$56 sps:$4 sm:$0xff]  }
 0x91b   :  { %4765 = vmatprep.subr.bf16.mxu1 %v7221_v38  ;;  %4792 = vmatprep.subr.bf16.mxu0 %v7224_v23  ;;  %v7290_v38 = vld [vmem:[#allocation10 + $0x814] ss:$56 sps:$4 sm:$0xff]   ;;  %v7285_v23 = vld [vmem:[#allocation10 + $0xbf8] ss:$56 sps:$4 sm:$0xff]  }
 0x91d   :  { %4743 = vmatmul.mubr.bf16.vlgmr.msra.gmra.mrb[40].mxu0 %v8314_v35 }
 0x91e   :  { %4766 = vmatpush1.bf16.msra.mxu1 %v7219_v37  ;;  %4793 = vmatpush1.bf16.msra.mxu0 %v7222_v11  ;;  %v7288_v37 = vld [vmem:[#allocation10 + $0x810] ss:$56 sps:$4 sm:$0xff]   ;;  %v7293_v11 = vld [vmem:[#allocation10 + $0xc6c] ss:$56 sps:$4 sm:$0xff]  }
 0x91f   :  { %4824 = vmatprep.mubr.bf16.mxu0 %v8318_v36  ;;  %4767 = vmatprep.subr.bf16.mxu1 %v7227_v5  ;;  %v7296_v5 = vld [vmem:[#allocation10 + $0x884] ss:$56 sps:$4 sm:$0xff]  }
 0x920   :  { %4794 = vmatprep.subr.bf16.mxu0 %v7230_v1  ;;  %v7291_v1 = vld [vmem:[#allocation10 + $0xc68] ss:$56 sps:$4 sm:$0xff]  }
 0x922   :  { %4768 = vmatpush1.bf16.msra.mxu1 %v7225_v19  ;;  %4795 = vmatpush1.bf16.msra.mxu0 %v7228_v39  ;;  %v7294_v19 = vld [vmem:[#allocation10 + $0x880] ss:$56 sps:$4 sm:$0xff]   ;;  %v7299_v39 = vld [vmem:[#allocation10 + $0xcdc] ss:$56 sps:$4 sm:$0xff]  }
 0x923   :  { %4769 = vmatprep.subr.bf16.mxu1 %v7233_v41  ;;  %4796 = vmatprep.subr.bf16.mxu0 %v7236_v42  ;;  %v7297_v41 = vld [vmem:[#allocation10 + $0xcd8] ss:$56 sps:$4 sm:$0xff]  }
 0x924   :  { %v7300_v42 = vld [vmem:[#allocation10 + $0x8f0] ss:$56 sps:$4 sm:$0xff]  }
 0x926   :  { %4770 = vmatpush1.bf16.msra.mxu1 %v7231_v43  ;;  %4797 = vmatpush1.bf16.msra.mxu0 %v7234_v47  ;;  %v7305_v43 = vld [vmem:[#allocation10 + $0xd4c] ss:$56 sps:$4 sm:$0xff]  }
 0x927   :  { %4771 = vmatprep.subr.bf16.mxu1 %v7239_v30  ;;  %4798 = vmatprep.subr.bf16.mxu0 %v7242_v51  ;;  %v7308_v47 = vld [vmem:[#allocation10 + $0x964] ss:$56 sps:$4 sm:$0xff]   ;;  %v7303_v30 = vld [vmem:[#allocation10 + $0xd48] ss:$56 sps:$4 sm:$0xff]  }
 0x928   :  { %v7306_v51 = vld [vmem:[#allocation10 + $0x960] ss:$56 sps:$4 sm:$0xff]  }
 0x92a   :  { %4772 = vmatpush1.bf16.msra.mxu1 %v7237_v33  ;;  %4799 = vmatpush1.bf16.msra.mxu0 %v7240_v27  ;;  %v7311_v33 = vld [vmem:[#allocation10 + $0xdbc] ss:$56 sps:$4 sm:$0xff]  }
 0x92b   :  { %4773 = vmatprep.subr.bf16.mxu1 %v7245_v52  ;;  %4800 = vmatprep.subr.bf16.mxu0 %v7248_v53  ;;  %v7314_v27 = vld [vmem:[#allocation10 + $0x9d4] ss:$56 sps:$4 sm:$0xff]   ;;  %v7309_v52 = vld [vmem:[#allocation10 + $0xdb8] ss:$56 sps:$4 sm:$0xff]  }
 0x92c   :  { %v7312_v53 = vld [vmem:[#allocation10 + $0x9d0] ss:$56 sps:$4 sm:$0xff]  }
 0x92e   :  { %4774 = vmatpush1.bf16.msra.mxu1 %v7243_v54  ;;  %4801 = vmatpush1.bf16.msra.mxu0 %v7246_v55  ;;  %v7317_v54 = vld [vmem:[#allocation10 + $0xa44] ss:$56 sps:$4 sm:$0xff]   ;;  %v7315_v55 = vld [vmem:[#allocation10 + $0xa40] ss:$56 sps:$4 sm:$0xff]  }
 0x92f   :  { %4775 = vmatprep.subr.bf16.mxu1 %v7251_v56  ;;  %4802 = vmatprep.subr.bf16.mxu0 %v7254_v9  ;;  %v7320_v56 = vld [vmem:[#allocation10 + $0xab4] ss:$56 sps:$4 sm:$0xff]   ;;  %v7318_v9 = vld [vmem:[#allocation10 + $0xab0] ss:$56 sps:$4 sm:$0xff]  }
 0x932   :  { %4776 = vmatpush1.bf16.msra.mxu1 %v7249_v24  ;;  %4803 = vmatpush1.bf16.msra.mxu0 %v7252_v46  ;;  %v7323_v24 = vld [vmem:[#allocation10 + $0xb24] ss:$56 sps:$4 sm:$0xff]   ;;  %v7321_v46 = vld [vmem:[#allocation10 + $0xb20] ss:$56 sps:$4 sm:$0xff]  }
 0x933   :  { %4777 = vmatprep.subr.bf16.mxu1 %v7257_v49  ;;  %4804 = vmatprep.subr.bf16.mxu0 %v7260_v57  ;;  %v7326_v49 = vld [vmem:[#allocation10 + $0xb94] ss:$56 sps:$4 sm:$0xff]   ;;  %v7324_v57 = vld [vmem:[#allocation10 + $0xb90] ss:$56 sps:$4 sm:$0xff]  }
 0x936   :  { %4778 = vmatpush1.bf16.msra.mxu1 %v7255_v59  ;;  %4805 = vmatpush1.bf16.msra.mxu0 %v7258_v60  ;;  %v7329_v59 = vld [vmem:[#allocation10 + $0xc04] ss:$56 sps:$4 sm:$0xff]   ;;  %v7327_v60 = vld [vmem:[#allocation10 + $0xc00] ss:$56 sps:$4 sm:$0xff]  }
 0x937   :  { %4779 = vmatprep.subr.bf16.mxu1 %v7263_v61  ;;  %4806 = vmatprep.subr.bf16.mxu0 %v7266_v62  ;;  %v7332_v61 = vld [vmem:[#allocation10 + $0xc74] ss:$56 sps:$4 sm:$0xff]   ;;  %v7330_v62 = vld [vmem:[#allocation10 + $0xc70] ss:$56 sps:$4 sm:$0xff]  }
 0x93a   :  { %4780 = vmatpush1.bf16.msra.mxu1 %v7261_v63  ;;  %4807 = vmatpush1.bf16.msra.mxu0 %v7264_v0  ;;  %v7335_v63 = vld [vmem:[#allocation10 + $0xce4] ss:$56 sps:$4 sm:$0xff]  }
 0x93b   :  { %4781 = vmatprep.subr.bf16.mxu1 %v7269_v4  ;;  %4808 = vmatprep.subr.bf16.mxu0 %v7272_v7 }
 0x93e   :  { %4782 = vmatpush1.bf16.msra.mxu1 %v7267_v8  ;;  %4809 = vmatpush1.bf16.msra.mxu0 %v7270_v13  ;;  %v7333_v8 = vld [vmem:[#allocation10 + $0xce0] ss:$56 sps:$4 sm:$0xff]  }
 0x93f   :  { %4810 = vmatprep.subr.bf16.mxu0 %v7275_v15  ;;  %4833 = vmatprep.subr.bf16.mxu1 %v7278_v16  ;;  %v7338_v15 = vld [vmem:[#allocation10 + $0xd54] ss:$56 sps:$4 sm:$0xff]   ;;  %v7336_v16 = vld [vmem:[#allocation10 + $0xd50] ss:$56 sps:$4 sm:$0xff]  }
 0x941   :  { %4784 = vmatmul.mubr.bf16.vlgmr.msra.gmra.mrb[56].mxu1 %v8314_v35 }
 0x942   :  { %4811 = vmatpush1.bf16.msra.mxu0 %v7273_v29  ;;  %4834 = vmatpush1.bf16.msra.mxu1 %v7276_v17  ;;  %v7341_v29 = vld [vmem:[#allocation10 + $0xdc4] ss:$56 sps:$4 sm:$0xff]   ;;  %v7339_v17 = vld [vmem:[#allocation10 + $0xdc0] ss:$56 sps:$4 sm:$0xff]  }
 0x943   :  { %4865 = vmatprep.mubr.bf16.mxu1 %v8318_v36  ;;  %4812 = vmatprep.subr.bf16.mxu0 %v7281_v18  ;;  %v7302_v36 = vld [vmem:[#allocation10 + $0x8f4] ss:$56 sps:$4 sm:$0xff]  }
 0x944   :  { %4835 = vmatprep.subr.bf16.mxu1 %v7284_v21 }
 0x946   :  { %4813 = vmatpush1.bf16.msra.mxu0 %v7279_v22  ;;  %4836 = vmatpush1.bf16.msra.mxu1 %v7282_v44 }
 0x947   :  { %4814 = vmatprep.subr.bf16.mxu0 %v7287_v32  ;;  %4837 = vmatprep.subr.bf16.mxu1 %v7290_v38  ;;  %v8340_v32 = vld [vmem:[#allocation11 + $0xe] sm:$0xff] }
 0x948   :  { %v3408_v38 = vrot.slane %v8340_v32, %v8099_v28 }
 0x94a   :  { %4815 = vmatpush1.bf16.msra.mxu0 %v7285_v23  ;;  %4838 = vmatpush1.bf16.msra.mxu1 %v7288_v37  ;;  %v2952_v23 = vld [vmem:[#allocation8 + $0x2] sm:$0x3] }
 0x94b   :  { %4816 = vmatprep.subr.bf16.mxu0 %v7293_v11  ;;  %4839 = vmatprep.subr.bf16.mxu1 %v7296_v5 }
 0x94e   :  { %4817 = vmatpush1.bf16.msra.mxu0 %v7291_v1  ;;  %4840 = vmatpush1.bf16.msra.mxu1 %v7294_v19  ;;  %v2957_v1 = vrot.slane %v2952_v23, %v8106_v31 }
 0x94f   :  { %4818 = vmatprep.subr.bf16.mxu0 %v7299_v39  ;;  %4841 = vmatprep.subr.bf16.mxu1 %v7302_v36  ;;  %v3412_v39 = vrot.slane %v8340_v32, %v8150_v12 }
 0x952   :  { %4819 = vmatpush1.bf16.msra.mxu0 %v7297_v41  ;;  %4842 = vmatpush1.bf16.msra.mxu1 %v7300_v42 }
 0x953   :  { %4820 = vmatprep.subr.bf16.mxu0 %v7305_v43  ;;  %4843 = vmatprep.subr.bf16.mxu1 %v7308_v47  ;;  %v2961_v47 = vrot.slane %v2952_v23, %v8089_v10 }
 0x956   :  { %4821 = vmatpush1.bf16.msra.mxu0 %v7303_v30  ;;  %4844 = vmatpush1.bf16.msra.mxu1 %v7306_v51 }
 0x957   :  { %4822 = vmatprep.subr.bf16.mxu0 %v7311_v33  ;;  %4845 = vmatprep.subr.bf16.mxu1 %v7314_v27  ;;  %v3416_v27 = vrot.slane %v8340_v32, %v8115_v40 }
 0x95a   :  { %4823 = vmatpush1.bf16.msra.mxu0 %v7309_v52  ;;  %4846 = vmatpush1.bf16.msra.mxu1 %v7312_v53 }
 0x95b   :  { %4847 = vmatprep.subr.bf16.mxu1 %v7317_v54  ;;  %6472 = vmatprep.subr.bf16.mxu0 %v7792_v2 }
 0x95d   :  { %4825 = vmatmul.mubr.bf16.vlgmr.msra.gmra.mrb[44].mxu0 %v8314_v35 }
 0x95e   :  { %4848 = vmatpush1.bf16.msra.mxu1 %v7315_v55  ;;  %6474 = vmatprep.mubr.msk.bf16.mxu0 %vm7793_vm0, %v7792_v2 }
 0x95f   :  { %4849 = vmatprep.subr.bf16.mxu1 %v7320_v56 }
 0x962   :  { %4850 = vmatpush1.bf16.msra.mxu1 %v7318_v9 }
 0x963   :  { %4851 = vmatprep.subr.bf16.mxu1 %v7323_v24 }
 0x966   :  { %4852 = vmatpush1.bf16.msra.mxu1 %v7321_v46  ;;  %v3424_v46 = vrot.slane %v8340_v32, %v745_v48  ;;  %v3404_v48 = vrot.slane %v8340_v32, %v8089_v10 }
 0x967   :  { %4853 = vmatprep.subr.bf16.mxu1 %v7326_v49 }
 0x96a   :  { %4854 = vmatpush1.bf16.msra.mxu1 %v7324_v57 }
 0x96b   :  { %4855 = vmatprep.subr.bf16.mxu1 %v7329_v59 }
 0x96e   :  { %4856 = vmatpush1.bf16.msra.mxu1 %v7327_v60  ;;  %v3400_v60 = vrot.slane %v8340_v32, %v8106_v31 }
 0x96f   :  { %4857 = vmatprep.subr.bf16.mxu1 %v7332_v61 }
 0x970   :  { %v3158_v0 = vpop.f32.mrb[32].mxu0 }
 0x971   :  { %v3160_v4 = vpop.f32.mrb[33].mxu0  ;;  %v3159_v41 = vadd.f32 %v3158_v0, %v2957_v1 }
 0x972   :  { %4858 = vmatpush1.bf16.msra.mxu1 %v7330_v62  ;;  %v3162_v7 = vpop.f32.mrb[34].mxu0  ;;  %v3161_v51 = vadd.f32 %v3160_v4, %v2961_v47 }
 0x973   :  { %v3163_v13 = vpop.f32.mrb[35].mxu0  ;;  %4859 = vmatprep.subr.bf16.mxu1 %v7335_v63  ;;  %v3165_v43 = vpack.c.bf16 %v3159_v41, %v3159_v41  ;;  %v3428_v63 = vrot.slane %v8340_v32, %v749_v50 }
 0x974   :  { %v3166_v33 = vpack.c.bf16 %v3161_v51, %v3161_v51 }
 0x976   :  { %4860 = vmatpush1.bf16.msra.mxu1 %v7333_v8 }
 0x977   :  { %4861 = vmatprep.subr.bf16.mxu1 %v7338_v15 }
 0x97a   :  { %4862 = vmatpush1.bf16.msra.mxu1 %v7336_v16 }
 0x97b   :  { %4863 = vmatprep.subr.bf16.mxu1 %v7341_v29 }
 0x97e   :  { %4864 = vmatpush1.bf16.msra.mxu1 %v7339_v17 }
 0x97f   :  { %6478 = vmatprep.subr.bf16.mxu1 %v7792_v2 }
 0x981   :  { %4866 = vmatmul.mubr.bf16.vlgmr.msra.gmra.mrb[60].mxu1 %v8314_v35 }
 0x982   :  { %6480 = vmatprep.mubr.msk.bf16.mxu1 %vm7793_vm0, %v7792_v2 }
 0x994   :  { %v4621_v18 = vpop.f32.mrb[48].mxu1 }
 0x995   :  { %v4623_v21 = vpop.f32.mrb[49].mxu1  ;;  %v4622_v4 = vadd.f32 %v4621_v18, %v3400_v60  ;;  %v8380_v18 = vld [vmem:[#allocation11 + $0x16] sm:$0x3f] }
 0x996   :  { %v4625_v22 = vpop.f32.mrb[50].mxu1  ;;  %v4624_v15 = vadd.f32 %v4623_v21, %v3404_v48  ;;  %v7420_v48 = vld [vmem:[#allocation19] sm:$0xff] }
 0x997   :  { %v4626_v44 = vpop.f32.mrb[51].mxu1  ;;  %v4874_v8 = vpack.c.bf16 %v4622_v4, %v4622_v4  ;;  %v3440_v22 = vrot.slane %v8380_v18, %v8099_v28 }
 0x998   :  { %v4875_v3 = vpack.c.bf16 %v4624_v15, %v4624_v15 }
 0x9b0   :  { %v4662_v37 = vpop.f32.mrb[36].mxu0 }
 0x9b1   :  { %v4663_v11 = vadd.f32 %v4662_v37, %v3408_v38  ;;  %v4664_v5 = vpop.f32.mrb[37].mxu0 }
 0x9b2   :  { %v4666_v19 = vpop.f32.mrb[38].mxu0  ;;  %v4665_v42 = vadd.f32 %v4664_v5, %v3412_v39 }
 0x9b3   :  { %v4876_v35 = vpack.c.bf16 %v4663_v11, %v4663_v11  ;;  %v4667_v36 = vpop.f32.mrb[39].mxu0  ;;  %v3444_v11 = vrot.slane %v8380_v18, %v8150_v12  ;;  %v7418_v12 = vld [vmem:[#allocation16] sm:$0xff] }
 0x9b4   :  { %v4877_v30 = vpack.c.bf16 %v4665_v42, %v4665_v42 }
 0x9b5   :  { %6473 = vmatpush3.bf16.xpose.msra.mxu0 %v4876_v35 }
 0x9b6   :  { %6484 = vmatprep.subr.bf16.mxu0 %v7792_v2 }
 0x9bc   :  { %6475 = vmatmul.mubr.bf16.vlgmr.msra.gmra.mrb[48].mxu0 %v3165_v43 }
 0x9bd   :  { %6485 = vmatpush3.bf16.xpose.msra.mxu0 %v4877_v30  ;;  %6486 = vmatprep.mubr.msk.bf16.mxu0 %vm7793_vm0, %v7792_v2 }
 0x9be   :  { %6496 = vmatprep.subr.bf16.mxu0 %v7792_v2 }
 0x9c4   :  { %6487 = vmatmul.mubr.bf16.vlgmr.msra.gmra.mrb[52].mxu0 %v3166_v33 }
 0x9c5   :  { %6498 = vmatprep.mubr.msk.bf16.mxu0 %vm7793_vm0, %v7792_v2 }
 0x9d4   :  { %v4703_v52 = vpop.f32.mrb[52].mxu1 }
 0x9d5   :  { %v4704_v53 = vadd.f32 %v4703_v52, %v3416_v27  ;;  %v8356_v54 = vpop.f32.mrb[53].mxu1 }
 0x9d6   :  { %v4707_v55 = vpop.f32.mrb[54].mxu1 }
 0x9d7   :  { %v4878_v56 = vpack.c.bf16 %v4704_v53, %v4704_v53  ;;  %v4708_v9 = vpop.f32.mrb[55].mxu1 }
 0x9d9   :  { %v4944_v24 = vsel %vm2266_vm1, %v4878_v56, 0 }
 0x9da   :  { %6479 = vmatpush3.bf16.msra.mxu1 %v4944_v24  ;;  %v7419_v24 = vld [vmem:[#allocation17] sm:$0xff] }
 0x9db   :  { %6490 = vmatprep.subr.bf16.mxu1 %v7792_v2 }
 0x9f0   :  { %v4744_v49 = vpop.f32.mrb[40].mxu0 }
 0x9f1   :  { %v4745_v57 = vadd.f32 %v4744_v49, %v3424_v46  ;;  %v4746_v59 = vpop.f32.mrb[41].mxu0 }
 0x9f2   :  { %v4748_v61 = vpop.f32.mrb[42].mxu0  ;;  %v4747_v7 = vadd.f32 %v4746_v59, %v3428_v63 }
 0x9f3   :  { %v4880_v62 = vpack.c.bf16 %v4745_v57, %v4745_v57  ;;  %v4749_v0 = vpop.f32.mrb[43].mxu0 }
 0x9f4   :  { %v4881_v13 = vpack.c.bf16 %v4747_v7, %v4747_v7 }
 0x9f5   :  { %6497 = vmatpush3.bf16.xpose.msra.mxu0 %v4880_v62 }
 0x9f6   :  { %6508 = vmatprep.subr.bf16.mxu0 %v7792_v2 }
 0x9fc   :  { %6499 = vmatmul.mubr.bf16.vlgmr.msra.gmra.mrb[56].mxu0 %v4874_v8 }
 0x9fd   :  { %6509 = vmatpush3.bf16.xpose.msra.mxu0 %v4881_v13  ;;  %6510 = vmatprep.mubr.msk.bf16.mxu0 %vm7793_vm0, %v7792_v2 }
 0x9fe   :  { %6520 = vmatprep.subr.bf16.mxu0 %v7792_v2 }
 0xa04   :  { %6511 = vmatmul.mubr.bf16.vlgmr.msra.gmra.mrb[60].mxu0 %v4875_v3 }
 0xa05   :  { %6522 = vmatprep.mubr.msk.bf16.mxu0 %vm7793_vm0, %v7792_v2 }
 0xa14   :  { %v8376_v50 = vpop.f32.mrb[56].mxu1 }
 0xa15   :  { %v8378_v16 = vpop.f32.mrb[57].mxu1 }
 0xa16   :  { %v4789_v29 = vpop.f32.mrb[58].mxu1 }
 0xa17   :  { %v4790_v17 = vpop.f32.mrb[59].mxu1 }
 0xa30   :  { %v4826_v44 = vpop.f32.mrb[44].mxu0 }
 0xa31   :  { %v4827_v21 = vadd.f32 %v4826_v44, %v3440_v22  ;;  %v4828_v38 = vpop.f32.mrb[45].mxu0 }
 0xa32   :  { %v4830_v23 = vpop.f32.mrb[46].mxu0  ;;  %v4829_v1 = vadd.f32 %v4828_v38, %v3444_v11 }
 0xa33   :  { %v4884_v37 = vpack.c.bf16 %v4827_v21, %v4827_v21  ;;  %v4831_v5 = vpop.f32.mrb[47].mxu0 }
 0xa34   :  { %v4885_v19 = vpack.c.bf16 %v4829_v1, %v4829_v1 }
 0xa35   :  { %6521 = vmatpush3.bf16.xpose.msra.mxu0 %v4884_v37 }
 0xa36   :  { %6532 = vmatprep.subr.bf16.mxu0 %v7792_v2 }
 0xa3c   :  { %6523 = vmatmul.mubr.bf16.vlgmr.msra.gmra.mrb[64].mxu0 %v4874_v8 }
 0xa3d   :  { %6533 = vmatpush3.bf16.xpose.msra.mxu0 %v4885_v19  ;;  %6534 = vmatprep.mubr.msk.bf16.mxu0 %vm7793_vm0, %v7792_v2 }
 0xa44   :  { %6535 = vmatmul.mubr.bf16.vlgmr.msra.gmra.mrb[68].mxu0 %v4875_v3 }
 0xa54   :  { %v8389_v28 = vpop.f32.mrb[60].mxu1 }
 0xa55   :  { %v8391_v35 = vpop.f32.mrb[61].mxu1 }
 0xa56   :  { %v4871_v39 = vpop.f32.mrb[62].mxu1 }
 0xa57   :  { %v4872_v36 = vpop.f32.mrb[63].mxu1 }
 0xa8f   :  { %v4922_v41 = vpop.f32.mrb[48].mxu0 }
 0xa90   :  { %v4923_v42 = vadd.f32 %v7418_v12, %v4922_v41  ;;  %v6476_v43 = vpop.f32.mrb[49].mxu0 }
 0xa91   :  { %v4925_v47 = vpop.f32.mrb[50].mxu0 }
 0xa92   :  { %v6477_v30 = vpop.f32.mrb[51].mxu0  ;;  %v4928_v51 = vsel %vm2250_vm2, %v4923_v42, -inf }
 0xa93   :  { %4929 = vmax.xlane.f32.xlu1 %v4928_v51 }
 0xa97   :  { %v5020_v33 = vpop.f32.mrb[52].mxu0 }
 0xa98   :  { %v5021_v27 = vadd.f32 %v7418_v12, %v5020_v33  ;;  %v6488_v52 = vpop.f32.mrb[53].mxu0 }
 0xa99   :  { %v5023_v53 = vpop.f32.mrb[54].mxu0 }
 0xa9a   :  { %v6489_v55 = vpop.f32.mrb[55].mxu0  ;;  %v5026_v56 = vsel %vm2250_vm2, %v5021_v27, -inf }
 0xa9b   :  { %5027 = vmax.xlane.f32.xlu1 %v5026_v56 }
 0xacf   :  { %v5120_v9 = vpop.f32.mrb[56].mxu0 }
 0xad0   :  { %v5121_v46 = vadd.f32 %v7419_v24, %v5120_v9  ;;  %v6500_v49 = vpop.f32.mrb[57].mxu0 }
 0xad1   :  { %v5123_v57 = vpop.f32.mrb[58].mxu0 }
 0xad2   :  { %v6501_v59 = vpop.f32.mrb[59].mxu0  ;;  %v5126_v60 = vsel %vm2250_vm2, %v5121_v46, -inf }
 0xad3   :  { %5127 = vmax.xlane.f32.xlu1 %v5126_v60 }
 0xad7   :  { %v5218_v61 = vpop.f32.mrb[60].mxu0 }
 0xad8   :  { %v5219_v62 = vadd.f32 %v7419_v24, %v5218_v61  ;;  %v6512_v63 = vpop.f32.mrb[61].mxu0 }
 0xad9   :  { %v5221_v0 = vpop.f32.mrb[62].mxu0 }
 0xada   :  { %v6513_v4 = vpop.f32.mrb[63].mxu0  ;;  %v5224_v7 = vsel %vm2250_vm2, %v5219_v62, -inf }
 0xadb   :  { %5225 = vmax.xlane.f32.xlu0 %v5224_v7  ;;  %v3420_v7 = vrot.slane %v8340_v32, %v8171_v14 }
 0xb0f   :  { %v5318_v8 = vpop.f32.mrb[64].mxu0 }
 0xb10   :  { %v5319_v13 = vadd.f32 %v7420_v48, %v5318_v8  ;;  %v6524_v15 = vpop.f32.mrb[65].mxu0  ;;  %v4706_v8 = vadd.f32 %v8356_v54, %v3420_v7 }
 0xb11   :  { %v5321_v3 = vpop.f32.mrb[66].mxu0 }
 0xb12   :  { %v6525_v29 = vpop.f32.mrb[67].mxu0  ;;  %v5324_v17 = vsel %vm2250_vm2, %v5319_v13, -inf  ;;  %v4879_v15 = vpack.c.bf16 %v4706_v8, %v4706_v8  ;;  %v3432_v3 = vrot.slane %v8380_v18, %v8106_v31 }
 0xb13   :  { %5325 = vmax.xlane.f32.xlu1 %v5324_v17 }
 0xb17   :  { %v5416_v22 = vpop.f32.mrb[68].mxu0 }
 0xb18   :  { %v5417_v44 = vadd.f32 %v7420_v48, %v5416_v22  ;;  %v6536_v21 = vpop.f32.mrb[69].mxu0  ;;  %v5042_v22 = vsel %vm2266_vm1, %v4879_v15, 0 }
 0xb19   :  { %v5419_v38 = vpop.f32.mrb[70].mxu0 }
 0xb1a   :  { %v6537_v23 = vpop.f32.mrb[71].mxu0  ;;  %v5422_v37 = vsel %vm2250_vm2, %v5417_v44, -inf }
 0xb1b   :  { %5423 = vmax.xlane.f32.xlu0 %v5422_v37  ;;  %v3436_v37 = vrot.slane %v8380_v18, %v8089_v10 }
 0xb20   :  { %v4930_v11 = vpop.xlane.xlu1 %4929 }
 0xb21   :  { %v4931_v5 = vsub.f32 %v4923_v42, %v4930_v11  ;;  %v4788_v11 = vadd.f32 %v8378_v16, %v3436_v37 }
 0xb23   :  { %v4932_v1 = vmul.f32 1.442695, %v4931_v5 }
 0xb25   :  { %7386 = vpow2.f32 %v4932_v1 }
 0xb28   :  { %v5028_v19 = vpop.xlane.xlu1 %5027 }
 0xb29   :  { %v5029_v39 = vsub.f32 %v5021_v27, %v5028_v19  ;;  %v4883_v19 = vpack.c.bf16 %v4788_v11, %v4788_v11 }
 0xb2b   :  { %v5030_v36 = vmul.f32 1.442695, %v5029_v39  ;;  %v3448_v39 = vrot.slane %v8380_v18, %v8115_v40 }
 0xb2d   :  { %7388 = vpow2.f32 %v5030_v36 }
 0xb2f   :  { %v7387_v41 = vpop.eup %7386 }
 0xb30   :  { %v4934_v12 = vsel %vm2250_vm2, %v7387_v41, 0.0 }
 0xb31   :  { %4935 = vadd.xlane.f32.xlu1 %v4934_v12  ;;  %v5240_v12 = vsel %vm2266_vm1, %v4883_v19, 0 }
 0xb37   :  { %v7389_v43 = vpop.eup %7388 }
 0xb38   :  { %v5032_v47 = vsel %vm2250_vm2, %v7389_v43, 0.0 }
 0xb39   :  { %5033 = vadd.xlane.f32.xlu0 %v5032_v47 }
 0xb60   :  { %v5128_v30 = vpop.xlane.xlu1 %5127 }
 0xb61   :  { %v5129_v51 = vsub.f32 %v5121_v46, %v5128_v30 }
 0xb63   :  { %v5130_v33 = vmul.f32 1.442695, %v5129_v51 }
 0xb65   :  { %7390 = vpow2.f32 %v5130_v33  ;;  %v3452_v33 = vrot.slane %v8380_v18, %v8171_v14 }
 0xb68   :  { %v5226_v52 = vpop.xlane.xlu0 %5225 }
 0xb69   :  { %v5227_v42 = vsub.f32 %v5219_v62, %v5226_v52  ;;  %v4870_v52 = vadd.f32 %v8391_v35, %v3452_v33  ;;  %v7344_v33 = vld [vmem:[#allocation20 + $0x48] sm:$0xff]  }
 0xb6b   :  { %v5228_v53 = vmul.f32 1.442695, %v5227_v42 }
 0xb6d   :  { %7392 = vpow2.f32 %v5228_v53 }
 0xb6f   :  { %v7391_v55 = vpop.eup %7390 }
 0xb70   :  { %v5132_v27 = vsel %vm2250_vm2, %v7391_v55, 0.0 }
 0xb71   :  { %5133 = vadd.xlane.f32.xlu1 %v5132_v27 }
 0xb77   :  { %v7393_v56 = vpop.eup %7392 }
 0xb78   :  { %v5230_v9 = vsel %vm2250_vm2, %v7393_v56, 0.0 }
 0xb79   :  { %5231 = vadd.xlane.f32.xlu0 %v5230_v9 }
 0xba0   :  { %v5326_v24 = vpop.xlane.xlu1 %5325 }
 0xba1   :  { %v5327_v49 = vsub.f32 %v5319_v13, %v5326_v24 }
 0xba3   :  { %v5328_v57 = vmul.f32 1.442695, %v5327_v49 }
 0xba5   :  { %7394 = vpow2.f32 %v5328_v57 }
 0xba8   :  { %v5424_v59 = vpop.xlane.xlu0 %5423 }
 0xba9   :  { %v5425_v46 = vsub.f32 %v5417_v44, %v5424_v59  ;;  %v4786_v44 = vadd.f32 %v8376_v50, %v3432_v3 }
 0xbab   :  { %v5426_v60 = vmul.f32 1.442695, %v5425_v46  ;;  %v4882_v54 = vpack.c.bf16 %v4786_v44, %v4786_v44 }
 0xbad   :  { %7396 = vpow2.f32 %v5426_v60  ;;  %v5142_v23 = vsel %vm2266_vm1, %v4882_v54, 0 }
 0xbaf   :  { %v8403_v61 = vpop.eup %7394 }
 0xbb0   :  { %v5330_v62 = vsel %vm2250_vm2, %v8403_v61, 0.0 }
 0xbb1   :  { %5331 = vadd.xlane.f32.xlu1 %v5330_v62 }
 0xbb7   :  { %v8407_v63 = vpop.eup %7396 }
 0xbb8   :  { %v5428_v0 = vsel %vm2250_vm2, %v8407_v63, 0.0 }
 0xbb9   :  { %5429 = vadd.xlane.f32.xlu0 %v5428_v0 }
 0xbbe   :  { %v4936_v4 = vpop.xlane.xlu1 %4935 }
 0xbbf   :  { %7398 = vrcp.f32 %v4936_v4 }
 0xbc6   :  { %v5034_v48 = vpop.xlane.xlu0 %5033 }
 0xbc7   :  { %7400 = vrcp.f32 %v5034_v48 }
 0xbc9   :  { %v7399_v13 = vpop.eup %7398 }
 0xbca   :  { %v4938_v29 = vmul.f32 %v7399_v13, %v7387_v41 }
 0xbcc   :  { %v4939_v17 = vpack.c.bf16 %v4938_v29, %v4938_v29 }
 0xbce   :  { %6481 = vmatmul.mubr.msk.bf16.vlgmr.msra.gmra.mrb[64].mxu1 %vm2250_vm2, %v4939_v17 }
 0xbcf   :  { %6491 = vmatpush3.bf16.msra.mxu1 %v5042_v22  ;;  %6492 = vmatprep.mubr.msk.bf16.mxu1 %vm7793_vm0, %v7792_v2 }
 0xbd0   :  { %6502 = vmatprep.subr.bf16.mxu1 %v7792_v2 }
 0xbd1   :  { %v7401_v32 = vpop.eup %7400 }
 0xbd2   :  { %v5036_v21 = vmul.f32 %v7401_v32, %v7389_v43  ;;  %v4868_v43 = vadd.f32 %v8389_v28, %v3448_v39 }
 0xbd4   :  { %v5037_v38 = vpack.c.bf16 %v5036_v21, %v5036_v21  ;;  %v4886_v47 = vpack.c.bf16 %v4868_v43, %v4868_v43 }
 0xbd6   :  { %6493 = vmatmul.mubr.msk.bf16.vlgmr.msra.gmra.mrb[68].mxu1 %vm2250_vm2, %v5037_v38  ;;  %v5340_v40 = vsel %vm2266_vm1, %v4886_v47, 0 }
 0xbd7   :  { %6503 = vmatpush3.bf16.msra.mxu1 %v5142_v23  ;;  %6504 = vmatprep.mubr.msk.bf16.mxu1 %vm7793_vm0, %v7792_v2 }
 0xbd8   :  { %6514 = vmatprep.subr.bf16.mxu1 %v7792_v2 }
 0xbfe   :  { %v5134_v50 = vpop.xlane.xlu1 %5133 }
 0xbff   :  { %7402 = vrcp.f32 %v5134_v50 }
 0xc06   :  { %v5232_v5 = vpop.xlane.xlu0 %5231 }
 0xc07   :  { %7404 = vrcp.f32 %v5232_v5 }
 0xc09   :  { %v7403_v1 = vpop.eup %7402 }
 0xc0a   :  { %v5136_v36 = vmul.f32 %v7403_v1, %v7391_v55  ;;  %v4887_v55 = vpack.c.bf16 %v4870_v52, %v4870_v52  ;;  %v7345_v52 = vld [vmem:[#allocation20 + $0x8] sm:$0xff]  }
 0xc0c   :  { %v5137_v41 = vpack.c.bf16 %v5136_v36, %v5136_v36  ;;  %v5438_v9 = vsel %vm2266_vm1, %v4887_v55, 0 }
 0xc0e   :  { %6505 = vmatmul.mubr.msk.bf16.vlgmr.msra.gmra.mrb[72].mxu1 %vm2250_vm2, %v5137_v41 }
 0xc0f   :  { %6515 = vmatpush3.bf16.msra.mxu1 %v5240_v12  ;;  %6516 = vmatprep.mubr.msk.bf16.mxu1 %vm7793_vm0, %v7792_v2 }
 0xc10   :  { %6526 = vmatprep.subr.bf16.mxu1 %v7792_v2 }
 0xc11   :  { %v7405_v16 = vpop.eup %7404 }
 0xc12   :  { %v5234_v30 = vmul.f32 %v7405_v16, %v7393_v56 }
 0xc14   :  { %v5235_v51 = vpack.c.bf16 %v5234_v30, %v5234_v30 }
 0xc16   :  { %6517 = vmatmul.mubr.msk.bf16.vlgmr.msra.gmra.mrb[76].mxu1 %vm2250_vm2, %v5235_v51 }
 0xc17   :  { %6527 = vmatpush3.bf16.msra.mxu1 %v5340_v40  ;;  %6528 = vmatprep.mubr.msk.bf16.mxu1 %vm7793_vm0, %v7792_v2 }
 0xc18   :  { %6538 = vmatprep.subr.bf16.mxu1 %v7792_v2 }
 0xc3e   :  { %v5332_v28 = vpop.xlane.xlu1 %5331 }
 0xc3f   :  { %7406 = vrcp.f32 %v5332_v28  ;;  %v7343_v28 = vld [vmem:[#allocation20] sm:$0xff]  }
 0xc46   :  { %v5430_v42 = vpop.xlane.xlu0 %5429 }
 0xc47   :  { %7408 = vrcp.f32 %v5430_v42 }
 0xc49   :  { %v7407_v53 = vpop.eup %7406 }
 0xc4a   :  { %v5334_v27 = vmul.f32 %v7407_v53, %v8403_v61 }
 0xc4c   :  { %v5335_v56 = vpack.c.bf16 %v5334_v27, %v5334_v27 }
 0xc4e   :  { %6529 = vmatmul.mubr.msk.bf16.vlgmr.msra.gmra.mrb[80].mxu1 %vm2250_vm2, %v5335_v56 }
 0xc4f   :  { %6539 = vmatpush3.bf16.msra.mxu1 %v5438_v9  ;;  %6540 = vmatprep.mubr.msk.bf16.mxu1 %vm7793_vm0, %v7792_v2  ;;  %v7346_v9 = vld [vmem:[#allocation20 + $0x50] sm:$0xff]  }
 0xc51   :  { %v7409_v24 = vpop.eup %7408 }
 0xc52   :  { %v5432_v14 = vmul.f32 %v7409_v24, %v8407_v63  ;;  %v7347_v24 = vld [vmem:[#allocation20 + $0x10] sm:$0xff]  }
 0xc54   :  { %v5433_v18 = vpack.c.bf16 %v5432_v14, %v5432_v14  ;;  %v7348_v14 = vld [vmem:[#allocation20 + $0x58] sm:$0xff]  }
 0xc56   :  { %6541 = vmatmul.mubr.msk.bf16.vlgmr.msra.gmra.mrb[84].mxu1 %vm2250_vm2, %v5433_v18  ;;  %v7349_v18 = vld [vmem:[#allocation20 + $0x18] sm:$0xff]  }
 0xca1   :  { %v4980_v35 = vpop.f32.mrb[64].mxu1 }
 0xca2   :  { %v6482_v49 = vpop.f32.mrb[65].mxu1  ;;  %v5084_v46 = vmul.f32 %v4980_v35, %v8243_v58  ;;  %v7350_v35 = vld [vmem:[#allocation20 + $0x60] sm:$0xff]  }
 0xca3   :  { %v4983_v57 = vpop.f32.mrb[66].mxu1  ;;  %v7351_v49 = vld [vmem:[#allocation20 + $0x20] sm:$0xff]  }
 0xca4   :  { %v6483_v59 = vpop.f32.mrb[67].mxu1  ;;  %v5486_v4 = vadd.f32 %v5084_v46, %v8296_v6  ;;  %v7352_v57 = vld [vmem:[#allocation20 + $0x68] sm:$0xff]   ;;  %v7354_v46 = vld [vmem:[#allocation20 + $0x70] sm:$0xff]  }
 0xca5   :  { %v7353_v59 = vld [vmem:[#allocation20 + $0x28] sm:$0xff]  }
 0xca9   :  { %v5078_v60 = vpop.f32.mrb[68].mxu1 }
 0xcaa   :  { %v5085_v61 = vmul.f32 %v5078_v60, %v8243_v58  ;;  %v6494_v62 = vpop.f32.mrb[69].mxu1  ;;  %v7355_v60 = vld [vmem:[#allocation20 + $0x30] sm:$0xff]  }
 0xcab   :  { %v5081_v0 = vpop.f32.mrb[70].mxu1  ;;  %v7357_v62 = vld [vmem:[#allocation20 + $0x38] sm:$0xff]  }
 0xcac   :  { %v5487_v2 = vadd.f32 %v5085_v61, %v8294_v45  ;;  %v6495_v7 = vpop.f32.mrb[71].mxu1  ;;  %v7356_v61 = vld [vmem:[#allocation20 + $0x78] sm:$0xff]  }
 0xcae   :  { %v5488_v63 = vadd.f32 %v5487_v2, %v5486_v4 }
 0xcb0   :  { %5489 = vadd.xlane.f32.xlu1 %v5488_v63 }
 0xce1   :  { %v5178_v8 = vpop.f32.mrb[72].mxu1 }
 0xce2   :  { %v6506_v48 = vpop.f32.mrb[73].mxu1  ;;  %v5282_v58 = vmul.f32 %v5178_v8, %v8254_v20 }
 0xce3   :  { %v5181_v13 = vpop.f32.mrb[74].mxu1 }
 0xce4   :  { %v6507_v15 = vpop.f32.mrb[75].mxu1  ;;  %v234_v13 = vld [vmem:[#allocation13 + $0x4] sm:$0x3] }
 0xce9   :  { %v5276_v3 = vpop.f32.mrb[76].mxu1 }
 0xcea   :  { %v6518_v29 = vpop.f32.mrb[77].mxu1  ;;  %v5283_v23 = vmul.f32 %v5276_v3, %v8254_v20  ;;  %v235_v3 = vld [vmem:[#allocation13 + $0x6] sm:$0x3] }
 0xceb   :  { %v5279_v17 = vpop.f32.mrb[78].mxu1 }
 0xcec   :  { %v6519_v22 = vpop.f32.mrb[79].mxu1  ;;  %v5508_v17 = vrot.slane %v234_v13, %v8106_v31 }
 0xced   :  { %v5512_v22 = vrot.slane %v234_v13, %v8089_v10 }
 0xd21   :  { %v5376_v44 = vpop.f32.mrb[80].mxu1 }
 0xd22   :  { %v5480_v32 = vmul.f32 %v5376_v44, %v8256_v25  ;;  %v6530_v54 = vpop.f32.mrb[81].mxu1  ;;  %v238_v44 = vld [vmem:[#allocation14 + $0x4] sm:$0x3] }
 0xd23   :  { %v5379_v6 = vpop.f32.mrb[82].mxu1  ;;  %v5556_v54 = vrot.slane %v235_v3, %v8089_v10 }
 0xd24   :  { %v5482_v21 = vadd.f32 %v5480_v32, %v5282_v58  ;;  %v6531_v45 = vpop.f32.mrb[83].mxu1  ;;  %v239_v58 = vld [vmem:[#allocation14 + $0x6] sm:$0x3]  ;;  %v5552_v32 = vrot.slane %v235_v3, %v8106_v31 }
 0xd25   :  { %v5521_v45 = vrot.slane %v238_v44, %v8106_v31 }
 0xd26   :  { %v5484_v5 = vmul.f32 0.5, %v5482_v21 }
 0xd28   :  { %v5530_v36 = vadd.f32 %v5484_v5, %v8308_v26  ;;  %v5569_v5 = vrot.slane %v239_v58, %v8089_v10 }
 0xd29   :  { %v5474_v38 = vpop.f32.mrb[84].mxu1 }
 0xd2a   :  { %v5481_v50 = vmul.f32 %v5474_v38, %v8256_v25  ;;  %v6542_v37 = vpop.f32.mrb[85].mxu1  ;;  %v7342_v25 = vld [vmem:[#allocation20 + $0x40] sm:$0xff]   ;;  %v5525_v38 = vrot.slane %v238_v44, %v8089_v10 }
 0xd2b   :  { %v5477_v11 = vpop.f32.mrb[86].mxu1  ;;  %6378 = vmatprep.subr.bf16.mxu0 %v7342_v25 }
 0xd2c   :  { %v5483_v1 = vadd.f32 %v5481_v50, %v5283_v23  ;;  %v6543_v19 = vpop.f32.mrb[87].mxu1  ;;  %6379 = vmatpush3.bf16.msra.mxu0 %v7343_v28  ;;  %v5565_v11 = vrot.slane %v239_v58, %v8106_v31 }
 0xd2d   :  { %6380 = vmatprep.subr.bf16.mxu0 %v7344_v33 }
 0xd2e   :  { %v5485_v39 = vmul.f32 0.5, %v5483_v1 }
 0xd30   :  { %v5531_v41 = vadd.f32 %v5485_v39, %v8310_v34  ;;  %6381 = vmatpush3.bf16.msra.mxu0 %v7345_v52 }
 0xd31   :  { %6382 = vmatprep.subr.bf16.mxu0 %v7346_v9 }
 0xd32   :  { %v5532_v12 = vadd.f32 %v5531_v41, %v5530_v36 }
 0xd34   :  { %5533 = vadd.xlane.f32.xlu0 %v5532_v12  ;;  %6383 = vmatpush3.bf16.msra.mxu0 %v7347_v24 }
 0xd35   :  { %6384 = vmatprep.subr.bf16.mxu0 %v7348_v14 }
 0xd38   :  { %6385 = vmatpush3.bf16.msra.mxu0 %v7349_v18 }
 0xd39   :  { %6386 = vmatprep.subr.bf16.mxu0 %v7350_v35 }
 0xd3c   :  { %6387 = vmatpush3.bf16.msra.mxu0 %v7351_v49 }
 0xd3d   :  { %v5490_v43 = vpop.xlane.xlu1 %5489  ;;  %6388 = vmatprep.subr.bf16.mxu0 %v7352_v57 }
 0xd3e   :  { %v5491_v16 = vmul.f32 0.00390625, %v5490_v43 }
 0xd40   :  { %v5492_v47 = vsub.f32 %v5486_v4, %v5491_v16  ;;  %v5493_v30 = vsub.f32 %v5487_v2, %v5491_v16  ;;  %6389 = vmatpush3.bf16.msra.mxu0 %v7353_v59 }
 0xd41   :  { %6390 = vmatprep.subr.bf16.mxu0 %v7354_v46 }
 0xd42   :  { %v5494_v51 = vmul.f32 %v5492_v47, %v5492_v47  ;;  %v5495_v20 = vmul.f32 %v5493_v30, %v5493_v30 }
 0xd44   :  { %v5496_v40 = vadd.f32 %v5495_v20, %v5494_v51  ;;  %6391 = vmatpush3.bf16.msra.mxu0 %v7355_v60 }
 0xd45   :  { %6392 = vmatprep.subr.bf16.mxu0 %v7356_v61 }
 0xd46   :  { %5497 = vadd.xlane.f32.xlu1 %v5496_v40 }
 0xd48   :  { %6393 = vmatpush3.bf16.msra.mxu0 %v7357_v62 }
 0xdc1   :  { %v5534_v26 = vpop.xlane.xlu0 %5533 }
 0xdc2   :  { %v5535_v34 = vmul.f32 0.00390625, %v5534_v26 }
 0xdc4   :  { %v5536_v42 = vsub.f32 %v5530_v36, %v5535_v34  ;;  %v5537_v53 = vsub.f32 %v5531_v41, %v5535_v34 }
 0xdc6   :  { %v5538_v55 = vmul.f32 %v5536_v42, %v5536_v42  ;;  %v5539_v27 = vmul.f32 %v5537_v53, %v5537_v53 }
 0xdc8   :  { %v5540_v56 = vadd.f32 %v5539_v27, %v5538_v55 }
 0xdca   :  { %5541 = vadd.xlane.f32.xlu0 %v5540_v56 }
 0xdd3   :  { %v5498_v0 = vpop.xlane.xlu1 %5497 }
 0xdd4   :  { %v5499_v4 = vmul.f32 0.00390625, %v5498_v0 }
 0xdd6   :  { %v5500_v2 = vadd.f32 1e-05, %v5499_v4 }
 0xdd8   :  { %7410 = vrsqrt.f32 %v5500_v2 }
 0xde2   :  { %v7411_v48 = vpop.eup %7410 }
 0xde3   :  { %v5502_v15 = vmul.f32 %v7411_v48, %v5492_v47  ;;  %v5503_v29 = vmul.f32 %v7411_v48, %v5493_v30  ;;  %v6313_v30 = vld [vmem:[#allocation22] ss:$0 sm:$0xff] }
 0xde5   :  { %v5516_v21 = vmul.f32 %v5512_v22, %v5503_v29  ;;  %v5515_v23 = vmul.f32 %v5508_v17, %v5502_v15 }
 0xde7   :  { %v5529_v39 = vadd.f32 %v5525_v38, %v5516_v21  ;;  %v5528_v41 = vadd.f32 %v5521_v45, %v5515_v23 }
 0xe57   :  { %v5542_v7 = vpop.xlane.xlu0 %5541 }
 0xe58   :  { %v5543_v63 = vmul.f32 0.00390625, %v5542_v7 }
 0xe5a   :  { %v5544_v8 = vadd.f32 1e-05, %v5543_v63 }
 0xe5c   :  { %7412 = vrsqrt.f32 %v5544_v8 }
 0xe66   :  { %v7413_v6 = vpop.eup %7412 }
 0xe67   :  { %v5546_v50 = vmul.f32 %v7413_v6, %v5536_v42  ;;  %v5547_v37 = vmul.f32 %v7413_v6, %v5537_v53 }
 0xe69   :  { %v5560_v1 = vmul.f32 %v5556_v54, %v5547_v37  ;;  %v5559_v19 = vmul.f32 %v5552_v32, %v5546_v50 }
 0xe6b   :  { %v5573_v36 = vadd.f32 %v5569_v5, %v5560_v1  ;;  %v5572_v12 = vadd.f32 %v5565_v11, %v5559_v19 }
 0xe6d   :  { %v5575_v43 = vpack.c.bf16 %v5573_v36, %v5529_v39  ;;  %v5574_v16 = vpack.c.bf16 %v5572_v12, %v5528_v41 }
 0xe6f   :  { %5743 = vmatprep.mubr.bf16.mxu0 %v5575_v43 }
 0xe70   :  { %5744 = vmatmul.mubr.bf16.vlgmr.msra.gmra.mrb[72].mxu0 %v5574_v16 }
 0xf43   :  { %v6394_v47 = vpop.f32.mrb[72].mxu0 }
 0xf44   :  { %v6395_v51 = vpop.f32.mrb[73].mxu0 }
 0xf45   :  { %v6396_v20 = vadd.f32 %v6395_v51, %v6394_v47  ;;  %v6397_v40 = vpop.f32.mrb[74].mxu0 }
 0xf46   :  { %v6398_v31 = vpop.f32.mrb[75].mxu0 }
 0xf47   :  { %v5746_v10 = vadd.f32 %v6396_v20, %v6313_v30  ;;  %v6399_v25 = vadd.f32 %v6398_v31, %v6397_v40 }
 0xf49   :  { %5752 = vst [vmem:[#allocation23] sm:$0xff] %v5746_v10  ;;  %v5749_v28 = vadd.f32 %v6399_v25, %v6313_v30 }
 0xf4a   :  { %7718 = shalt.err (!%p7715_p10)
}
 0xf4b   :  { %s7719_s4 = scalar_lea.hbm %s8511_s16, 128 }
 0xf4c   :  { %p7720_p11 = scmp.ne.s32.totalorder %s8511_s16, %s7719_s4  ;;  %p7723_p12 = scmp.lt.u32.totalorder %s7719_s4, %s8511_s16 }
 0xf4e   :  { %p7725_p13 = pnand %p7723_p12, %p7720_p11 }
 0xf50   :  { %7728 = shalt.err (!%p7725_p13)
}
 0xf51   :  { %5763 = dma.vmem_to_hbm [thread:$0]  %s5761_s12, 128, %s8511_s16, [#allocation4]   ;;  %5753 = vst [vmem:[#allocation24] sm:$0xff] %v5749_v28 }
 0xf52   :  { %s7729_s2 = scalar_lea.vmem %s5771_s1, 128  ;;  %p7734_p1 = scmp.lt.s32.totalorder %s5771_s1, %s5771_s1 }
 0xf53   :  { %p7730_p0 = scmp.ne.s32.totalorder %s5771_s1, %s7729_s2  ;;  %p7735_p2 = scmp.lt.s32.totalorder %s7729_s2, %s7729_s2 }
 0xf55   :  { %p7736_p3 = por %p7735_p2, %p7734_p1 }
 0xf57   :  { %p7737_p4 = pnand %p7736_p3, %p7730_p0 }
 0xf59   :  { %7740 = shalt.err (!%p7737_p4)
}
 0xf5a   :  { %s7741_s27 = scalar_lea.hbm %s8512_s17, 128 }
 0xf5b   :  { %p7742_p5 = scmp.ne.s32.totalorder %s8512_s17, %s7741_s27  ;;  %p7745_p6 = scmp.lt.u32.totalorder %s7741_s27, %s8512_s17 }
 0xf5d   :  { %p7747_p7 = pnand %p7745_p6, %p7742_p5 }
 0xf5f   :  { %7750 = shalt.err (!%p7747_p7)
}
 0xf60   :  { %5773 = dma.vmem_to_hbm [thread:$0]  %s5771_s1, 128, %s8512_s17, [#allocation25]  }
 0xf61   :  { %7765 = dma.done.wait [#allocation4], 128  }
 0xf62   :  { %7766 = vsyncadd [#allocation4], 4294967168 }
 0xf63   :  { %7767 = dma.done.wait [#allocation25], 128  }
 0xf64   :  { %7768 = vsyncadd [#allocation25], 4294967168 }
 0xf65   :  { %5780 = vsyncpa [#allocation3], 1 }
 0xf66   :  { %5781 = vsyncpa [#allocation6], 1 }
 0xf67   :  { %5782 = vsyncpa [#allocation9], 1 }
 0xf68   :  { %5783 = vsyncpa [#allocation12], 1 }
 0xf69   :  { %5784 = vsyncpa [#allocation15], 1 }
 0xf6a   :  { %5785 = vsyncpa [#allocation18], 1 }
 0xf6b   :  { %5786 = vsyncpa [#allocation21], 1 }
 0xf6c   :  { %5787 = vsyncpa [#allocation4], 1 }
 0xf6d   :  { %5788 = vsyncpa [#allocation25], 1 }

</bundles_post_ra>
